<compile_context>
chip_gen: v7x
topology: tpu7x:2x2x1
jax: 0.10.0
libtpu: 0.0.40
codegen_flags: <defaults>
</compile_context>

<pallas_src>
import jax
import jax.numpy as jnp
from jax import lax
from jax.experimental import pallas as pl
from jax.experimental.pallas import tpu as pltpu


def _round_up(x, m):
    return ((x + m - 1) // m) * m


# ---------------------------------------------------------------------------
# Fused model kernel
# ---------------------------------------------------------------------------
def make_model_kernel(T, B_pad, D, H_pad, n_extra_lstm, n_fc,
                      unroll_threshold=16, fori_unroll=8):
    """Build the fused forward kernel for a (static) architecture."""
    del D  # implied by the W_ih ref shape

    def lstm_recurrence(gin_scr, whh_ref, seq_scr, write_seq):
        """Serial LSTM recurrence.  gin_scr already holds x@W_ih + b for every
        timestep, so only the small (B_pad,H_pad)@(H_pad,4*H_pad) matmul sits
        on the serial critical path."""
        whh = whh_ref[...]                                   # load once (bf16)

        def step(t, h, c):
            start = t * B_pad
            if not isinstance(start, int):                   # dynamic (fori) path
                start = pl.multiple_of(start, B_pad)
            row = pl.ds(start, B_pad)                        # sublane-aligned slab
            gates = (gin_scr[row, :].astype(jnp.float32)
                     + jnp.dot(h.astype(whh.dtype), whh,
                               preferred_element_type=jnp.float32))
            # H_pad is a lane multiple -> each gate slice is a full lane tile.
            i_t = jax.nn.sigmoid(gates[:, 0 * H_pad:1 * H_pad])
            f_t = jax.nn.sigmoid(gates[:, 1 * H_pad:2 * H_pad])
            g_t = jnp.tanh(gates[:, 2 * H_pad:3 * H_pad])
            o_t = jax.nn.sigmoid(gates[:, 3 * H_pad:4 * H_pad])
            c = f_t * c + i_t * g_t
            h = o_t * jnp.tanh(c)
            if write_seq:
                seq_scr[row, :] = h.astype(seq_scr.dtype)    # stays in VMEM
            return h, c

        h = jnp.zeros((B_pad, H_pad), jnp.float32)
        c = jnp.zeros((B_pad, H_pad), jnp.float32)
        if T <= unroll_threshold:
            # Full unroll: maximum scheduler visibility for short sequences.
            for t in range(T):
                h, c = step(t, h, c)
        else:
            # Bounded unroll: avoids vreg-pressure spills / compile blow-up.
            def body(t, carry):
                return step(t, *carry)
            h, c = lax.fori_loop(0, T, body, (h, c), unroll=fori_unroll)
        return h

    def kernel(*refs):
        it = iter(refs)
        x_ref = next(it)                                     # (T*B_pad, D)      bf16
        wih0, whh0, b0 = next(it), next(it), next(it)        # first LSTM
        extra = [(next(it), next(it), next(it)) for _ in range(n_extra_lstm)]
        fcs = [(next(it), next(it)) for _ in range(n_fc)]    # hidden FC layers
        w_out, b_out = next(it), next(it)                    # output layer
        out_ref = next(it)                                   # (B_pad, O)        f32
        seq_scr = next(it)                                   # (T*B_pad, H_pad)  bf16
        gin_scr = next(it)                                   # (T*B_pad, 4H_pad) bf16

        # ---- first LSTM: hoisted input projection (one MXU matmul) ----------
        gin_scr[...] = (jnp.dot(x_ref[...], wih0[...],
                                preferred_element_type=jnp.float32)
                        + b0[...]).astype(gin_scr.dtype)
        h = lstm_recurrence(gin_scr, whh0, seq_scr,
                            write_seq=(n_extra_lstm > 0))

        # ---- stacked LSTM layers (hidden sequence stays resident in VMEM) ---
        for li, (wih, whh, b) in enumerate(extra):
            # Project the whole previous-layer sequence BEFORE the recurrence
            # below overwrites seq_scr.
            gin_scr[...] = (jnp.dot(seq_scr[...], wih[...],
                                    preferred_element_type=jnp.float32)
                            + b[...]).astype(gin_scr.dtype)
            last = (li == n_extra_lstm - 1)
            h = lstm_recurrence(gin_scr, whh, seq_scr, write_seq=not last)

        # ---- FC chain (affine, as in the PyTorch forward) + output ----------
        out = h                                              # (B_pad, H_pad) f32
        for (w, bb) in fcs:
            wv = w[...]
            out = (jnp.dot(out.astype(wv.dtype), wv,
                           preferred_element_type=jnp.float32) + bb[...])
        wv = w_out[...]
        out = (jnp.dot(out.astype(wv.dtype), wv,
                       preferred_element_type=jnp.float32) + b_out[...])
        out_ref[...] = out.astype(out_ref.dtype)

    return kernel


# ---------------------------------------------------------------------------
# VMEM budgeting
# ---------------------------------------------------------------------------
def _vmem_limit_bytes(T, B_pad, D, H_pad, O, n_extra, n_fc):
    bf16, f32 = 2, 4
    G = 4 * H_pad
    scratch = T * B_pad * (H_pad + G) * bf16
    x_bytes = T * B_pad * D * bf16
    w_bytes = (D * G + H_pad * G) * bf16 + G * f32
    w_bytes += n_extra * (2 * H_pad * G * bf16 + G * f32)
    w_bytes += n_fc * (H_pad * H_pad * bf16 + H_pad * f32)
    w_bytes += H_pad * O * bf16 + O * f32
    out_bytes = B_pad * O * f32
    total = scratch + x_bytes + w_bytes + out_bytes
    # 2x headroom for compiler temporaries; >=8 MiB floor; 128 MiB cap.
    # NOTE: anything that actually needs >64 MiB will not fit v7x's VMEM and
    # should be T-chunked instead (see TODO above).
    return int(min(max(2 * total, 8 << 20), 128 << 20))


# ---------------------------------------------------------------------------
# One-time parameter packing (padding / transposes / bf16 casts)
# ---------------------------------------------------------------------------
def _pad_gate_matrix(w, in_pad, H, H_pad, dtype):
    """(in_dim, 4*H) torch-gate layout -> (in_pad, 4*H_pad), zero-padded per
    gate block.  Zero padding keeps padded h/c exactly 0 -> exact results."""
    in_dim = w.shape[0]
    w4 = w.reshape(in_dim, 4, H)
    out = jnp.zeros((in_pad, 4, H_pad), jnp.float32).at[:in_dim, :, :H].set(w4)
    return out.reshape(in_pad, 4 * H_pad).astype(dtype)


def _pad_gate_bias(b, H, H_pad):
    b4 = b.reshape(4, H)
    out = jnp.zeros((4, H_pad), jnp.float32).at[:, :H].set(b4)
    return out.reshape(1, 4 * H_pad)                          # keep f32


def _pad_linear(w, b, in_pad, out_pad, dtype):
    """PyTorch (out, in) Linear weight -> padded (in_pad, out_pad) kernel
    layout, plus (1, out_pad) f32 bias."""
    out_f, in_f = w.shape
    wt = jnp.zeros((in_pad, out_pad), jnp.float32).at[:in_f, :out_f].set(w.T)
    bp = jnp.zeros((1, out_pad), jnp.float32).at[:, :out_f].set(b)
    return wt.astype(dtype), bp


def pack_params(params, hidden_dim, output_dim, weight_dtype=jnp.bfloat16):
    """Convert sampled (PyTorch-layout) parameters to the kernel's padded,
    lane-aligned, bf16 layout.  Called once; the per-call wrapper then emits
    no transposes / reshapes for weights."""
    H = hidden_dim
    H_pad = _round_up(H, 128)

    wih0, whh0, b0 = params["first_lstm"]
    D = wih0.shape[0]
    args = [
        _pad_gate_matrix(wih0, D, H, H_pad, weight_dtype),
        _pad_gate_matrix(whh0, H_pad, H, H_pad, weight_dtype),
        _pad_gate_bias(b0, H, H_pad),
    ]
    for (wih, whh, b) in params["lstms"]:
        args += [
            _pad_gate_matrix(wih, H_pad, H, H_pad, weight_dtype),
            _pad_gate_matrix(whh, H_pad, H, H_pad, weight_dtype),
            _pad_gate_bias(b, H, H_pad),
        ]
    for (w, b) in params["fc"]:
        wt, bp = _pad_linear(w, b, H_pad, H_pad, weight_dtype)
        args += [wt, bp]
    w_out, b_out = params["out_layer"]
    wt, bp = _pad_linear(w_out, b_out, H_pad, output_dim, weight_dtype)
    args += [wt, bp]

    return {
        "args": args,
        "n_extra": len(params["lstms"]),
        "n_fc": len(params["fc"]),
        "D": D, "H": H, "H_pad": H_pad, "O": output_dim,
        "weight_dtype": weight_dtype,
    }


# ---------------------------------------------------------------------------
# Forward wrapper
# ---------------------------------------------------------------------------
def bayesian_lstm_model_forward(x, packed):
    """x: (B, T, input_dim) batch-first, as in the PyTorch module."""
    B, T, D = x.shape
    assert D == packed["D"], (D, packed["D"])
    H_pad, O = packed["H_pad"], packed["O"]
    n_extra, n_fc = packed["n_extra"], packed["n_fc"]
    B_pad = _round_up(max(B, 1), 8)                    # sublane-aligned batch

    # batch-first -> time-major, pad batch, flatten: a single lane-dense
    # (T*B_pad, D) operand for the hoisted input-projection matmul.
    x_tm = jnp.transpose(x, (1, 0, 2))
    if B_pad != B:
        x_tm = jnp.pad(x_tm, ((0, 0), (0, B_pad - B), (0, 0)))
    x_flat = x_tm.reshape(T * B_pad, D).astype(packed["weight_dtype"])

    kernel = make_model_kernel(T, B_pad, D, H_pad, n_extra, n_fc)
    vmem_limit = _vmem_limit_bytes(T, B_pad, D, H_pad, O, n_extra, n_fc)

    out_pad = pl.pallas_call(
        kernel,
        out_shape=jax.ShapeDtypeStruct((B_pad, O), jnp.float32),
        scratch_shapes=[
            pltpu.VMEM((T * B_pad, H_pad), jnp.bfloat16),      # resident sequence
            pltpu.VMEM((T * B_pad, 4 * H_pad), jnp.bfloat16),  # input projection
        ],
        compiler_params=pltpu.CompilerParams(vmem_limit_bytes=vmem_limit),
    )(x_flat, *packed["args"])
    return out_pad[:B]


# ---------------------------------------------------------------------------
# Deterministic parameter sampling (Bayesian reparameterization)
# ---------------------------------------------------------------------------
def sample_param(key, shape, rho=-3.0):
    k_mu, k_eps = jax.random.split(key)
    mu = 0.1 * jax.random.normal(k_mu, shape, dtype=jnp.float32)
    sigma = jnp.log1p(jnp.exp(jnp.float32(rho)))
    eps = jax.random.normal(k_eps, shape, dtype=jnp.float32)
    return mu + sigma * eps


def init_params(key, input_dim, hidden_dim, layer_dim, output_dim, n_fc_layers):
    H = hidden_dim
    n_keys = 3 + 3 * max(layer_dim - 1, 0) + 2 * max(n_fc_layers - 1, 0) + 2
    keys = iter(jax.random.split(key, n_keys))

    params = {}
    params["first_lstm"] = (
        sample_param(next(keys), (input_dim, 4 * H)),   # W_ih
        sample_param(next(keys), (H, 4 * H)),           # W_hh
        sample_param(next(keys), (4 * H,)),             # single bias (blitz)
    )
    params["lstms"] = [
        (sample_param(next(keys), (H, 4 * H)),
         sample_param(next(keys), (H, 4 * H)),
         sample_param(next(keys), (4 * H,)))
        for _ in range(layer_dim - 1)
    ]
    params["fc"] = [
        (sample_param(next(keys), (H, H)),              # PyTorch (out, in)
         sample_param(next(keys), (H,)))
        for _ in range(n_fc_layers - 1)
    ]
    params["out_layer"] = (
        sample_param(next(keys), (output_dim, H)),      # PyTorch (out, in)
        sample_param(next(keys), (output_dim,)),
    )
    return params


# ---------------------------------------------------------------------------
if __name__ == "__main__":
    B, T = 2, 8
    input_dim, hidden_dim, layer_dim, output_dim, n_fc_layers = 8, 32, 2, 4, 2

    key = jax.random.PRNGKey(0)
    k_x, k_p = jax.random.split(key)
    x = jax.random.normal(k_x, (B, T, input_dim), dtype=jnp.float32)
    raw_params = init_params(k_p, input_dim, hidden_dim, layer_dim,
                             output_dim, n_fc_layers)
    packed = pack_params(raw_params, hidden_dim, output_dim)

    out = bayesian_lstm_model_forward(x, packed)
    out = jax.block_until_ready(out)
    assert out.shape == (B, output_dim), out.shape
    print("KERNEL_OK")
</pallas_src>

<mosaic_0001>
module attributes {stable_mosaic.version = 11 : i64} {
  func.func @kernel(%arg0: memref<64x8xbf16, #tpu.memory_space<vmem>>, %arg1: memref<8x512xbf16, #tpu.memory_space<vmem>>, %arg2: memref<128x512xbf16, #tpu.memory_space<vmem>>, %arg3: memref<1x512xf32, #tpu.memory_space<vmem>>, %arg4: memref<128x512xbf16, #tpu.memory_space<vmem>>, %arg5: memref<128x512xbf16, #tpu.memory_space<vmem>>, %arg6: memref<1x512xf32, #tpu.memory_space<vmem>>, %arg7: memref<128x128xbf16, #tpu.memory_space<vmem>>, %arg8: memref<1x128xf32, #tpu.memory_space<vmem>>, %arg9: memref<128x4xbf16, #tpu.memory_space<vmem>>, %arg10: memref<1x4xf32, #tpu.memory_space<vmem>>, %arg11: memref<8x4xf32, #tpu.memory_space<vmem>>, %arg12: memref<64x128xbf16, #tpu.memory_space<vmem>>, %arg13: memref<64x512xbf16, #tpu.memory_space<vmem>>) attributes {dimension_semantics = [], scalar_prefetch = 0 : i64, scratch_operands = 2 : i64, tpu.core_type = #tpu.core_type<tc>} {
    %c0 = arith.constant 0 : index
    %c0_0 = arith.constant 0 : index
    %0 = vector.load %arg0[%c0, %c0_0] : memref<64x8xbf16, #tpu.memory_space<vmem>>, vector<64x8xbf16>
    %c0_1 = arith.constant 0 : index
    %c0_2 = arith.constant 0 : index
    %1 = vector.load %arg1[%c0_1, %c0_2] : memref<8x512xbf16, #tpu.memory_space<vmem>>, vector<8x512xbf16>
    %cst = arith.constant dense<0.000000e+00> : vector<64x512xf32>
    %2 = tpu.matmul %0, %1, %cst {dimension_numbers = #tpu.dot_dimension_numbers<[1], [0], [0], [1], [0, 0, 1, 1], [], []>} : vector<64x8xbf16>, vector<8x512xbf16>, vector<64x512xf32> -> vector<64x512xf32>
    %c0_3 = arith.constant 0 : index
    %c0_4 = arith.constant 0 : index
    %3 = vector.load %arg3[%c0_3, %c0_4] : memref<1x512xf32, #tpu.memory_space<vmem>>, vector<1x512xf32>
    %4 = vector.broadcast %3 : vector<1x512xf32> to vector<64x512xf32>
    %5 = arith.addf %2, %4 : vector<64x512xf32>
    %6 = arith.truncf %5 : vector<64x512xf32> to vector<64x512xbf16>
    %c0_5 = arith.constant 0 : index
    %c0_6 = arith.constant 0 : index
    %7 = vector.load %arg13[%c0_5, %c0_6] : memref<64x512xbf16, #tpu.memory_space<vmem>>, vector<64x512xbf16>
    tpu.vector_store %arg13[%c0_5, %c0_6], %6 {strides = array<i32>} : memref<64x512xbf16, #tpu.memory_space<vmem>>, vector<64x512xbf16>,
    %c0_7 = arith.constant 0 : index
    %c0_8 = arith.constant 0 : index
    %8 = vector.load %arg2[%c0_7, %c0_8] : memref<128x512xbf16, #tpu.memory_space<vmem>>, vector<128x512xbf16>
    %cst_9 = arith.constant 0.000000e+00 : f32
    %9 = vector.broadcast %cst_9 : f32 to vector<8x128xf32>
    %cst_10 = arith.constant 0.000000e+00 : f32
    %10 = vector.broadcast %cst_10 : f32 to vector<8x128xf32>
    %c0_11 = arith.constant 0 : index
    %c0_12 = arith.constant 0 : index
    %11 = vector.load %arg13[%c0_11, %c0_12] : memref<64x512xbf16, #tpu.memory_space<vmem>>, vector<8x512xbf16>
    %12 = arith.extf %11 : vector<8x512xbf16> to vector<8x512xf32>
    %13 = arith.truncf %9 : vector<8x128xf32> to vector<8x128xbf16>
    %cst_13 = arith.constant dense<0.000000e+00> : vector<8x512xf32>
    %14 = tpu.matmul %13, %8, %cst_13 {dimension_numbers = #tpu.dot_dimension_numbers<[1], [0], [0], [1], [0, 0, 1, 1], [], []>} : vector<8x128xbf16>, vector<128x512xbf16>, vector<8x512xf32> -> vector<8x512xf32>
    %15 = arith.addf %12, %14 : vector<8x512xf32>
    %16 = vector.extract_strided_slice %15 {offsets = [0, 0], sizes = [8, 128], strides = [1, 1]} : vector<8x512xf32> to vector<8x128xf32>
    %17 = arith.negf %16 : vector<8x128xf32>
    %18 = math.exp %17 : vector<8x128xf32>
    %cst_14 = arith.constant 1.000000e+00 : f32
    %19 = vector.broadcast %cst_14 : f32 to vector<8x128xf32>
    %20 = arith.addf %19, %18 : vector<8x128xf32>
    %21 = arith.divf %19, %20 : vector<8x128xf32>
    %22 = vector.extract_strided_slice %15 {offsets = [0, 128], sizes = [8, 128], strides = [1, 1]} : vector<8x512xf32> to vector<8x128xf32>
    %23 = arith.negf %22 : vector<8x128xf32>
    %24 = math.exp %23 : vector<8x128xf32>
    %cst_15 = arith.constant 1.000000e+00 : f32
    %25 = vector.broadcast %cst_15 : f32 to vector<8x128xf32>
    %26 = arith.addf %25, %24 : vector<8x128xf32>
    %27 = arith.divf %25, %26 : vector<8x128xf32>
    %28 = vector.extract_strided_slice %15 {offsets = [0, 256], sizes = [8, 128], strides = [1, 1]} : vector<8x512xf32> to vector<8x128xf32>
    %29 = math.tanh %28 : vector<8x128xf32>
    %30 = vector.extract_strided_slice %15 {offsets = [0, 384], sizes = [8, 128], strides = [1, 1]} : vector<8x512xf32> to vector<8x128xf32>
    %31 = arith.negf %30 : vector<8x128xf32>
    %32 = math.exp %31 : vector<8x128xf32>
    %cst_16 = arith.constant 1.000000e+00 : f32
    %33 = vector.broadcast %cst_16 : f32 to vector<8x128xf32>
    %34 = arith.addf %33, %32 : vector<8x128xf32>
    %35 = arith.divf %33, %34 : vector<8x128xf32>
    %36 = arith.mulf %27, %10 : vector<8x128xf32>
    %37 = arith.mulf %21, %29 : vector<8x128xf32>
    %38 = arith.addf %36, %37 : vector<8x128xf32>
    %39 = math.tanh %38 : vector<8x128xf32>
    %40 = arith.mulf %35, %39 : vector<8x128xf32>
    %41 = arith.truncf %40 : vector<8x128xf32> to vector<8x128xbf16>
    %c0_17 = arith.constant 0 : index
    %c0_18 = arith.constant 0 : index
    %42 = vector.load %arg12[%c0_17, %c0_18] : memref<64x128xbf16, #tpu.memory_space<vmem>>, vector<8x128xbf16>
    tpu.vector_store %arg12[%c0_17, %c0_18], %41 {strides = array<i32>} : memref<64x128xbf16, #tpu.memory_space<vmem>>, vector<8x128xbf16>,
    %c8 = arith.constant 8 : index
    %c0_19 = arith.constant 0 : index
    %43 = vector.load %arg13[%c8, %c0_19] : memref<64x512xbf16, #tpu.memory_space<vmem>>, vector<8x512xbf16>
    %44 = arith.extf %43 : vector<8x512xbf16> to vector<8x512xf32>
    %45 = arith.truncf %40 : vector<8x128xf32> to vector<8x128xbf16>
    %cst_20 = arith.constant dense<0.000000e+00> : vector<8x512xf32>
    %46 = tpu.matmul %45, %8, %cst_20 {dimension_numbers = #tpu.dot_dimension_numbers<[1], [0], [0], [1], [0, 0, 1, 1], [], []>} : vector<8x128xbf16>, vector<128x512xbf16>, vector<8x512xf32> -> vector<8x512xf32>
    %47 = arith.addf %44, %46 : vector<8x512xf32>
    %48 = vector.extract_strided_slice %47 {offsets = [0, 0], sizes = [8, 128], strides = [1, 1]} : vector<8x512xf32> to vector<8x128xf32>
    %49 = arith.negf %48 : vector<8x128xf32>
    %50 = math.exp %49 : vector<8x128xf32>
    %cst_21 = arith.constant 1.000000e+00 : f32
    %51 = vector.broadcast %cst_21 : f32 to vector<8x128xf32>
    %52 = arith.addf %51, %50 : vector<8x128xf32>
    %53 = arith.divf %51, %52 : vector<8x128xf32>
    %54 = vector.extract_strided_slice %47 {offsets = [0, 128], sizes = [8, 128], strides = [1, 1]} : vector<8x512xf32> to vector<8x128xf32>
    %55 = arith.negf %54 : vector<8x128xf32>
    %56 = math.exp %55 : vector<8x128xf32>
    %cst_22 = arith.constant 1.000000e+00 : f32
    %57 = vector.broadcast %cst_22 : f32 to vector<8x128xf32>
    %58 = arith.addf %57, %56 : vector<8x128xf32>
    %59 = arith.divf %57, %58 : vector<8x128xf32>
    %60 = vector.extract_strided_slice %47 {offsets = [0, 256], sizes = [8, 128], strides = [1, 1]} : vector<8x512xf32> to vector<8x128xf32>
    %61 = math.tanh %60 : vector<8x128xf32>
    %62 = vector.extract_strided_slice %47 {offsets = [0, 384], sizes = [8, 128], strides = [1, 1]} : vector<8x512xf32> to vector<8x128xf32>
    %63 = arith.negf %62 : vector<8x128xf32>
    %64 = math.exp %63 : vector<8x128xf32>
    %cst_23 = arith.constant 1.000000e+00 : f32
    %65 = vector.broadcast %cst_23 : f32 to vector<8x128xf32>
    %66 = arith.addf %65, %64 : vector<8x128xf32>
    %67 = arith.divf %65, %66 : vector<8x128xf32>
    %68 = arith.mulf %59, %38 : vector<8x128xf32>
    %69 = arith.mulf %53, %61 : vector<8x128xf32>
    %70 = arith.addf %68, %69 : vector<8x128xf32>
    %71 = math.tanh %70 : vector<8x128xf32>
    %72 = arith.mulf %67, %71 : vector<8x128xf32>
    %73 = arith.truncf %72 : vector<8x128xf32> to vector<8x128xbf16>
    %c8_24 = arith.constant 8 : index
    %c0_25 = arith.constant 0 : index
    %74 = vector.load %arg12[%c8_24, %c0_25] : memref<64x128xbf16, #tpu.memory_space<vmem>>, vector<8x128xbf16>
    tpu.vector_store %arg12[%c8_24, %c0_25], %73 {strides = array<i32>} : memref<64x128xbf16, #tpu.memory_space<vmem>>, vector<8x128xbf16>,
    %c16 = arith.constant 16 : index
    %c0_26 = arith.constant 0 : index
    %75 = vector.load %arg13[%c16, %c0_26] : memref<64x512xbf16, #tpu.memory_space<vmem>>, vector<8x512xbf16>
    %76 = arith.extf %75 : vector<8x512xbf16> to vector<8x512xf32>
    %77 = arith.truncf %72 : vector<8x128xf32> to vector<8x128xbf16>
    %cst_27 = arith.constant dense<0.000000e+00> : vector<8x512xf32>
    %78 = tpu.matmul %77, %8, %cst_27 {dimension_numbers = #tpu.dot_dimension_numbers<[1], [0], [0], [1], [0, 0, 1, 1], [], []>} : vector<8x128xbf16>, vector<128x512xbf16>, vector<8x512xf32> -> vector<8x512xf32>
    %79 = arith.addf %76, %78 : vector<8x512xf32>
    %80 = vector.extract_strided_slice %79 {offsets = [0, 0], sizes = [8, 128], strides = [1, 1]} : vector<8x512xf32> to vector<8x128xf32>
    %81 = arith.negf %80 : vector<8x128xf32>
    %82 = math.exp %81 : vector<8x128xf32>
    %cst_28 = arith.constant 1.000000e+00 : f32
    %83 = vector.broadcast %cst_28 : f32 to vector<8x128xf32>
    %84 = arith.addf %83, %82 : vector<8x128xf32>
    %85 = arith.divf %83, %84 : vector<8x128xf32>
    %86 = vector.extract_strided_slice %79 {offsets = [0, 128], sizes = [8, 128], strides = [1, 1]} : vector<8x512xf32> to vector<8x128xf32>
    %87 = arith.negf %86 : vector<8x128xf32>
    %88 = math.exp %87 : vector<8x128xf32>
    %cst_29 = arith.constant 1.000000e+00 : f32
    %89 = vector.broadcast %cst_29 : f32 to vector<8x128xf32>
    %90 = arith.addf %89, %88 : vector<8x128xf32>
    %91 = arith.divf %89, %90 : vector<8x128xf32>
    %92 = vector.extract_strided_slice %79 {offsets = [0, 256], sizes = [8, 128], strides = [1, 1]} : vector<8x512xf32> to vector<8x128xf32>
    %93 = math.tanh %92 : vector<8x128xf32>
    %94 = vector.extract_strided_slice %79 {offsets = [0, 384], sizes = [8, 128], strides = [1, 1]} : vector<8x512xf32> to vector<8x128xf32>
    %95 = arith.negf %94 : vector<8x128xf32>
    %96 = math.exp %95 : vector<8x128xf32>
    %cst_30 = arith.constant 1.000000e+00 : f32
    %97 = vector.broadcast %cst_30 : f32 to vector<8x128xf32>
    %98 = arith.addf %97, %96 : vector<8x128xf32>
    %99 = arith.divf %97, %98 : vector<8x128xf32>
    %100 = arith.mulf %91, %70 : vector<8x128xf32>
    %101 = arith.mulf %85, %93 : vector<8x128xf32>
    %102 = arith.addf %100, %101 : vector<8x128xf32>
    %103 = math.tanh %102 : vector<8x128xf32>
    %104 = arith.mulf %99, %103 : vector<8x128xf32>
    %105 = arith.truncf %104 : vector<8x128xf32> to vector<8x128xbf16>
    %c16_31 = arith.constant 16 : index
    %c0_32 = arith.constant 0 : index
    %106 = vector.load %arg12[%c16_31, %c0_32] : memref<64x128xbf16, #tpu.memory_space<vmem>>, vector<8x128xbf16>
    tpu.vector_store %arg12[%c16_31, %c0_32], %105 {strides = array<i32>} : memref<64x128xbf16, #tpu.memory_space<vmem>>, vector<8x128xbf16>,
    %c24 = arith.constant 24 : index
    %c0_33 = arith.constant 0 : index
    %107 = vector.load %arg13[%c24, %c0_33] : memref<64x512xbf16, #tpu.memory_space<vmem>>, vector<8x512xbf16>
    %108 = arith.extf %107 : vector<8x512xbf16> to vector<8x512xf32>
    %109 = arith.truncf %104 : vector<8x128xf32> to vector<8x128xbf16>
    %cst_34 = arith.constant dense<0.000000e+00> : vector<8x512xf32>
    %110 = tpu.matmul %109, %8, %cst_34 {dimension_numbers = #tpu.dot_dimension_numbers<[1], [0], [0], [1], [0, 0, 1, 1], [], []>} : vector<8x128xbf16>, vector<128x512xbf16>, vector<8x512xf32> -> vector<8x512xf32>
    %111 = arith.addf %108, %110 : vector<8x512xf32>
    %112 = vector.extract_strided_slice %111 {offsets = [0, 0], sizes = [8, 128], strides = [1, 1]} : vector<8x512xf32> to vector<8x128xf32>
    %113 = arith.negf %112 : vector<8x128xf32>
    %114 = math.exp %113 : vector<8x128xf32>
    %cst_35 = arith.constant 1.000000e+00 : f32
    %115 = vector.broadcast %cst_35 : f32 to vector<8x128xf32>
    %116 = arith.addf %115, %114 : vector<8x128xf32>
    %117 = arith.divf %115, %116 : vector<8x128xf32>
    %118 = vector.extract_strided_slice %111 {offsets = [0, 128], sizes = [8, 128], strides = [1, 1]} : vector<8x512xf32> to vector<8x128xf32>
    %119 = arith.negf %118 : vector<8x128xf32>
    %120 = math.exp %119 : vector<8x128xf32>
    %cst_36 = arith.constant 1.000000e+00 : f32
    %121 = vector.broadcast %cst_36 : f32 to vector<8x128xf32>
    %122 = arith.addf %121, %120 : vector<8x128xf32>
    %123 = arith.divf %121, %122 : vector<8x128xf32>
    %124 = vector.extract_strided_slice %111 {offsets = [0, 256], sizes = [8, 128], strides = [1, 1]} : vector<8x512xf32> to vector<8x128xf32>
    %125 = math.tanh %124 : vector<8x128xf32>
    %126 = vector.extract_strided_slice %111 {offsets = [0, 384], sizes = [8, 128], strides = [1, 1]} : vector<8x512xf32> to vector<8x128xf32>
    %127 = arith.negf %126 : vector<8x128xf32>
    %128 = math.exp %127 : vector<8x128xf32>
    %cst_37 = arith.constant 1.000000e+00 : f32
    %129 = vector.broadcast %cst_37 : f32 to vector<8x128xf32>
    %130 = arith.addf %129, %128 : vector<8x128xf32>
    %131 = arith.divf %129, %130 : vector<8x128xf32>
    %132 = arith.mulf %123, %102 : vector<8x128xf32>
    %133 = arith.mulf %117, %125 : vector<8x128xf32>
    %134 = arith.addf %132, %133 : vector<8x128xf32>
    %135 = math.tanh %134 : vector<8x128xf32>
    %136 = arith.mulf %131, %135 : vector<8x128xf32>
    %137 = arith.truncf %136 : vector<8x128xf32> to vector<8x128xbf16>
    %c24_38 = arith.constant 24 : index
    %c0_39 = arith.constant 0 : index
    %138 = vector.load %arg12[%c24_38, %c0_39] : memref<64x128xbf16, #tpu.memory_space<vmem>>, vector<8x128xbf16>
    tpu.vector_store %arg12[%c24_38, %c0_39], %137 {strides = array<i32>} : memref<64x128xbf16, #tpu.memory_space<vmem>>, vector<8x128xbf16>,
    %c32 = arith.constant 32 : index
    %c0_40 = arith.constant 0 : index
    %139 = vector.load %arg13[%c32, %c0_40] : memref<64x512xbf16, #tpu.memory_space<vmem>>, vector<8x512xbf16>
    %140 = arith.extf %139 : vector<8x512xbf16> to vector<8x512xf32>
    %141 = arith.truncf %136 : vector<8x128xf32> to vector<8x128xbf16>
    %cst_41 = arith.constant dense<0.000000e+00> : vector<8x512xf32>
    %142 = tpu.matmul %141, %8, %cst_41 {dimension_numbers = #tpu.dot_dimension_numbers<[1], [0], [0], [1], [0, 0, 1, 1], [], []>} : vector<8x128xbf16>, vector<128x512xbf16>, vector<8x512xf32> -> vector<8x512xf32>
    %143 = arith.addf %140, %142 : vector<8x512xf32>
    %144 = vector.extract_strided_slice %143 {offsets = [0, 0], sizes = [8, 128], strides = [1, 1]} : vector<8x512xf32> to vector<8x128xf32>
    %145 = arith.negf %144 : vector<8x128xf32>
    %146 = math.exp %145 : vector<8x128xf32>
    %cst_42 = arith.constant 1.000000e+00 : f32
    %147 = vector.broadcast %cst_42 : f32 to vector<8x128xf32>
    %148 = arith.addf %147, %146 : vector<8x128xf32>
    %149 = arith.divf %147, %148 : vector<8x128xf32>
    %150 = vector.extract_strided_slice %143 {offsets = [0, 128], sizes = [8, 128], strides = [1, 1]} : vector<8x512xf32> to vector<8x128xf32>
    %151 = arith.negf %150 : vector<8x128xf32>
    %152 = math.exp %151 : vector<8x128xf32>
    %cst_43 = arith.constant 1.000000e+00 : f32
    %153 = vector.broadcast %cst_43 : f32 to vector<8x128xf32>
    %154 = arith.addf %153, %152 : vector<8x128xf32>
    %155 = arith.divf %153, %154 : vector<8x128xf32>
    %156 = vector.extract_strided_slice %143 {offsets = [0, 256], sizes = [8, 128], strides = [1, 1]} : vector<8x512xf32> to vector<8x128xf32>
    %157 = math.tanh %156 : vector<8x128xf32>
    %158 = vector.extract_strided_slice %143 {offsets = [0, 384], sizes = [8, 128], strides = [1, 1]} : vector<8x512xf32> to vector<8x128xf32>
    %159 = arith.negf %158 : vector<8x128xf32>
    %160 = math.exp %159 : vector<8x128xf32>
    %cst_44 = arith.constant 1.000000e+00 : f32
    %161 = vector.broadcast %cst_44 : f32 to vector<8x128xf32>
    %162 = arith.addf %161, %160 : vector<8x128xf32>
    %163 = arith.divf %161, %162 : vector<8x128xf32>
    %164 = arith.mulf %155, %134 : vector<8x128xf32>
    %165 = arith.mulf %149, %157 : vector<8x128xf32>
    %166 = arith.addf %164, %165 : vector<8x128xf32>
    %167 = math.tanh %166 : vector<8x128xf32>
    %168 = arith.mulf %163, %167 : vector<8x128xf32>
    %169 = arith.truncf %168 : vector<8x128xf32> to vector<8x128xbf16>
    %c32_45 = arith.constant 32 : index
    %c0_46 = arith.constant 0 : index
    %170 = vector.load %arg12[%c32_45, %c0_46] : memref<64x128xbf16, #tpu.memory_space<vmem>>, vector<8x128xbf16>
    tpu.vector_store %arg12[%c32_45, %c0_46], %169 {strides = array<i32>} : memref<64x128xbf16, #tpu.memory_space<vmem>>, vector<8x128xbf16>,
    %c40 = arith.constant 40 : index
    %c0_47 = arith.constant 0 : index
    %171 = vector.load %arg13[%c40, %c0_47] : memref<64x512xbf16, #tpu.memory_space<vmem>>, vector<8x512xbf16>
    %172 = arith.extf %171 : vector<8x512xbf16> to vector<8x512xf32>
    %173 = arith.truncf %168 : vector<8x128xf32> to vector<8x128xbf16>
    %cst_48 = arith.constant dense<0.000000e+00> : vector<8x512xf32>
    %174 = tpu.matmul %173, %8, %cst_48 {dimension_numbers = #tpu.dot_dimension_numbers<[1], [0], [0], [1], [0, 0, 1, 1], [], []>} : vector<8x128xbf16>, vector<128x512xbf16>, vector<8x512xf32> -> vector<8x512xf32>
    %175 = arith.addf %172, %174 : vector<8x512xf32>
    %176 = vector.extract_strided_slice %175 {offsets = [0, 0], sizes = [8, 128], strides = [1, 1]} : vector<8x512xf32> to vector<8x128xf32>
    %177 = arith.negf %176 : vector<8x128xf32>
    %178 = math.exp %177 : vector<8x128xf32>
    %cst_49 = arith.constant 1.000000e+00 : f32
    %179 = vector.broadcast %cst_49 : f32 to vector<8x128xf32>
    %180 = arith.addf %179, %178 : vector<8x128xf32>
    %181 = arith.divf %179, %180 : vector<8x128xf32>
    %182 = vector.extract_strided_slice %175 {offsets = [0, 128], sizes = [8, 128], strides = [1, 1]} : vector<8x512xf32> to vector<8x128xf32>
    %183 = arith.negf %182 : vector<8x128xf32>
    %184 = math.exp %183 : vector<8x128xf32>
    %cst_50 = arith.constant 1.000000e+00 : f32
    %185 = vector.broadcast %cst_50 : f32 to vector<8x128xf32>
    %186 = arith.addf %185, %184 : vector<8x128xf32>
    %187 = arith.divf %185, %186 : vector<8x128xf32>
    %188 = vector.extract_strided_slice %175 {offsets = [0, 256], sizes = [8, 128], strides = [1, 1]} : vector<8x512xf32> to vector<8x128xf32>
    %189 = math.tanh %188 : vector<8x128xf32>
    %190 = vector.extract_strided_slice %175 {offsets = [0, 384], sizes = [8, 128], strides = [1, 1]} : vector<8x512xf32> to vector<8x128xf32>
    %191 = arith.negf %190 : vector<8x128xf32>
    %192 = math.exp %191 : vector<8x128xf32>
    %cst_51 = arith.constant 1.000000e+00 : f32
    %193 = vector.broadcast %cst_51 : f32 to vector<8x128xf32>
    %194 = arith.addf %193, %192 : vector<8x128xf32>
    %195 = arith.divf %193, %194 : vector<8x128xf32>
    %196 = arith.mulf %187, %166 : vector<8x128xf32>
    %197 = arith.mulf %181, %189 : vector<8x128xf32>
    %198 = arith.addf %196, %197 : vector<8x128xf32>
    %199 = math.tanh %198 : vector<8x128xf32>
    %200 = arith.mulf %195, %199 : vector<8x128xf32>
    %201 = arith.truncf %200 : vector<8x128xf32> to vector<8x128xbf16>
    %c40_52 = arith.constant 40 : index
    %c0_53 = arith.constant 0 : index
    %202 = vector.load %arg12[%c40_52, %c0_53] : memref<64x128xbf16, #tpu.memory_space<vmem>>, vector<8x128xbf16>
    tpu.vector_store %arg12[%c40_52, %c0_53], %201 {strides = array<i32>} : memref<64x128xbf16, #tpu.memory_space<vmem>>, vector<8x128xbf16>,
    %c48 = arith.constant 48 : index
    %c0_54 = arith.constant 0 : index
    %203 = vector.load %arg13[%c48, %c0_54] : memref<64x512xbf16, #tpu.memory_space<vmem>>, vector<8x512xbf16>
    %204 = arith.extf %203 : vector<8x512xbf16> to vector<8x512xf32>
    %205 = arith.truncf %200 : vector<8x128xf32> to vector<8x128xbf16>
    %cst_55 = arith.constant dense<0.000000e+00> : vector<8x512xf32>
    %206 = tpu.matmul %205, %8, %cst_55 {dimension_numbers = #tpu.dot_dimension_numbers<[1], [0], [0], [1], [0, 0, 1, 1], [], []>} : vector<8x128xbf16>, vector<128x512xbf16>, vector<8x512xf32> -> vector<8x512xf32>
    %207 = arith.addf %204, %206 : vector<8x512xf32>
    %208 = vector.extract_strided_slice %207 {offsets = [0, 0], sizes = [8, 128], strides = [1, 1]} : vector<8x512xf32> to vector<8x128xf32>
    %209 = arith.negf %208 : vector<8x128xf32>
    %210 = math.exp %209 : vector<8x128xf32>
    %cst_56 = arith.constant 1.000000e+00 : f32
    %211 = vector.broadcast %cst_56 : f32 to vector<8x128xf32>
    %212 = arith.addf %211, %210 : vector<8x128xf32>
    %213 = arith.divf %211, %212 : vector<8x128xf32>
    %214 = vector.extract_strided_slice %207 {offsets = [0, 128], sizes = [8, 128], strides = [1, 1]} : vector<8x512xf32> to vector<8x128xf32>
    %215 = arith.negf %214 : vector<8x128xf32>
    %216 = math.exp %215 : vector<8x128xf32>
    %cst_57 = arith.constant 1.000000e+00 : f32
    %217 = vector.broadcast %cst_57 : f32 to vector<8x128xf32>
    %218 = arith.addf %217, %216 : vector<8x128xf32>
    %219 = arith.divf %217, %218 : vector<8x128xf32>
    %220 = vector.extract_strided_slice %207 {offsets = [0, 256], sizes = [8, 128], strides = [1, 1]} : vector<8x512xf32> to vector<8x128xf32>
    %221 = math.tanh %220 : vector<8x128xf32>
    %222 = vector.extract_strided_slice %207 {offsets = [0, 384], sizes = [8, 128], strides = [1, 1]} : vector<8x512xf32> to vector<8x128xf32>
    %223 = arith.negf %222 : vector<8x128xf32>
    %224 = math.exp %223 : vector<8x128xf32>
    %cst_58 = arith.constant 1.000000e+00 : f32
    %225 = vector.broadcast %cst_58 : f32 to vector<8x128xf32>
    %226 = arith.addf %225, %224 : vector<8x128xf32>
    %227 = arith.divf %225, %226 : vector<8x128xf32>
    %228 = arith.mulf %219, %198 : vector<8x128xf32>
    %229 = arith.mulf %213, %221 : vector<8x128xf32>
    %230 = arith.addf %228, %229 : vector<8x128xf32>
    %231 = math.tanh %230 : vector<8x128xf32>
    %232 = arith.mulf %227, %231 : vector<8x128xf32>
    %233 = arith.truncf %232 : vector<8x128xf32> to vector<8x128xbf16>
    %c48_59 = arith.constant 48 : index
    %c0_60 = arith.constant 0 : index
    %234 = vector.load %arg12[%c48_59, %c0_60] : memref<64x128xbf16, #tpu.memory_space<vmem>>, vector<8x128xbf16>
    tpu.vector_store %arg12[%c48_59, %c0_60], %233 {strides = array<i32>} : memref<64x128xbf16, #tpu.memory_space<vmem>>, vector<8x128xbf16>,
    %c56 = arith.constant 56 : index
    %c0_61 = arith.constant 0 : index
    %235 = vector.load %arg13[%c56, %c0_61] : memref<64x512xbf16, #tpu.memory_space<vmem>>, vector<8x512xbf16>
    %236 = arith.extf %235 : vector<8x512xbf16> to vector<8x512xf32>
    %237 = arith.truncf %232 : vector<8x128xf32> to vector<8x128xbf16>
    %cst_62 = arith.constant dense<0.000000e+00> : vector<8x512xf32>
    %238 = tpu.matmul %237, %8, %cst_62 {dimension_numbers = #tpu.dot_dimension_numbers<[1], [0], [0], [1], [0, 0, 1, 1], [], []>} : vector<8x128xbf16>, vector<128x512xbf16>, vector<8x512xf32> -> vector<8x512xf32>
    %239 = arith.addf %236, %238 : vector<8x512xf32>
    %240 = vector.extract_strided_slice %239 {offsets = [0, 0], sizes = [8, 128], strides = [1, 1]} : vector<8x512xf32> to vector<8x128xf32>
    %241 = arith.negf %240 : vector<8x128xf32>
    %242 = math.exp %241 : vector<8x128xf32>
    %cst_63 = arith.constant 1.000000e+00 : f32
    %243 = vector.broadcast %cst_63 : f32 to vector<8x128xf32>
    %244 = arith.addf %243, %242 : vector<8x128xf32>
    %245 = arith.divf %243, %244 : vector<8x128xf32>
    %246 = vector.extract_strided_slice %239 {offsets = [0, 128], sizes = [8, 128], strides = [1, 1]} : vector<8x512xf32> to vector<8x128xf32>
    %247 = arith.negf %246 : vector<8x128xf32>
    %248 = math.exp %247 : vector<8x128xf32>
    %cst_64 = arith.constant 1.000000e+00 : f32
    %249 = vector.broadcast %cst_64 : f32 to vector<8x128xf32>
    %250 = arith.addf %249, %248 : vector<8x128xf32>
    %251 = arith.divf %249, %250 : vector<8x128xf32>
    %252 = vector.extract_strided_slice %239 {offsets = [0, 256], sizes = [8, 128], strides = [1, 1]} : vector<8x512xf32> to vector<8x128xf32>
    %253 = math.tanh %252 : vector<8x128xf32>
    %254 = vector.extract_strided_slice %239 {offsets = [0, 384], sizes = [8, 128], strides = [1, 1]} : vector<8x512xf32> to vector<8x128xf32>
    %255 = arith.negf %254 : vector<8x128xf32>
    %256 = math.exp %255 : vector<8x128xf32>
    %cst_65 = arith.constant 1.000000e+00 : f32
    %257 = vector.broadcast %cst_65 : f32 to vector<8x128xf32>
    %258 = arith.addf %257, %256 : vector<8x128xf32>
    %259 = arith.divf %257, %258 : vector<8x128xf32>
    %260 = arith.mulf %251, %230 : vector<8x128xf32>
    %261 = arith.mulf %245, %253 : vector<8x128xf32>
    %262 = arith.addf %260, %261 : vector<8x128xf32>
    %263 = math.tanh %262 : vector<8x128xf32>
    %264 = arith.mulf %259, %263 : vector<8x128xf32>
    %265 = arith.truncf %264 : vector<8x128xf32> to vector<8x128xbf16>
    %c56_66 = arith.constant 56 : index
    %c0_67 = arith.constant 0 : index
    %266 = vector.load %arg12[%c56_66, %c0_67] : memref<64x128xbf16, #tpu.memory_space<vmem>>, vector<8x128xbf16>
    tpu.vector_store %arg12[%c56_66, %c0_67], %265 {strides = array<i32>} : memref<64x128xbf16, #tpu.memory_space<vmem>>, vector<8x128xbf16>,
    %c0_68 = arith.constant 0 : index
    %c0_69 = arith.constant 0 : index
    %267 = vector.load %arg12[%c0_68, %c0_69] : memref<64x128xbf16, #tpu.memory_space<vmem>>, vector<64x128xbf16>
    %c0_70 = arith.constant 0 : index
    %c0_71 = arith.constant 0 : index
    %268 = vector.load %arg4[%c0_70, %c0_71] : memref<128x512xbf16, #tpu.memory_space<vmem>>, vector<128x512xbf16>
    %cst_72 = arith.constant dense<0.000000e+00> : vector<64x512xf32>
    %269 = tpu.matmul %267, %268, %cst_72 {dimension_numbers = #tpu.dot_dimension_numbers<[1], [0], [0], [1], [0, 0, 1, 1], [], []>} : vector<64x128xbf16>, vector<128x512xbf16>, vector<64x512xf32> -> vector<64x512xf32>
    %c0_73 = arith.constant 0 : index
    %c0_74 = arith.constant 0 : index
    %270 = vector.load %arg6[%c0_73, %c0_74] : memref<1x512xf32, #tpu.memory_space<vmem>>, vector<1x512xf32>
    %271 = vector.broadcast %270 : vector<1x512xf32> to vector<64x512xf32>
    %272 = arith.addf %269, %271 : vector<64x512xf32>
    %273 = arith.truncf %272 : vector<64x512xf32> to vector<64x512xbf16>
    %c0_75 = arith.constant 0 : index
    %c0_76 = arith.constant 0 : index
    %274 = vector.load %arg13[%c0_75, %c0_76] : memref<64x512xbf16, #tpu.memory_space<vmem>>, vector<64x512xbf16>
    tpu.vector_store %arg13[%c0_75, %c0_76], %273 {strides = array<i32>} : memref<64x512xbf16, #tpu.memory_space<vmem>>, vector<64x512xbf16>,
    %c0_77 = arith.constant 0 : index
    %c0_78 = arith.constant 0 : index
    %275 = vector.load %arg5[%c0_77, %c0_78] : memref<128x512xbf16, #tpu.memory_space<vmem>>, vector<128x512xbf16>
    %cst_79 = arith.constant 0.000000e+00 : f32
    %276 = vector.broadcast %cst_79 : f32 to vector<8x128xf32>
    %cst_80 = arith.constant 0.000000e+00 : f32
    %277 = vector.broadcast %cst_80 : f32 to vector<8x128xf32>
    %c0_81 = arith.constant 0 : index
    %c0_82 = arith.constant 0 : index
    %278 = vector.load %arg13[%c0_81, %c0_82] : memref<64x512xbf16, #tpu.memory_space<vmem>>, vector<8x512xbf16>
    %279 = arith.extf %278 : vector<8x512xbf16> to vector<8x512xf32>
    %280 = arith.truncf %276 : vector<8x128xf32> to vector<8x128xbf16>
    %cst_83 = arith.constant dense<0.000000e+00> : vector<8x512xf32>
    %281 = tpu.matmul %280, %275, %cst_83 {dimension_numbers = #tpu.dot_dimension_numbers<[1], [0], [0], [1], [0, 0, 1, 1], [], []>} : vector<8x128xbf16>, vector<128x512xbf16>, vector<8x512xf32> -> vector<8x512xf32>
    %282 = arith.addf %279, %281 : vector<8x512xf32>
    %283 = vector.extract_strided_slice %282 {offsets = [0, 0], sizes = [8, 128], strides = [1, 1]} : vector<8x512xf32> to vector<8x128xf32>
    %284 = arith.negf %283 : vector<8x128xf32>
    %285 = math.exp %284 : vector<8x128xf32>
    %cst_84 = arith.constant 1.000000e+00 : f32
    %286 = vector.broadcast %cst_84 : f32 to vector<8x128xf32>
    %287 = arith.addf %286, %285 : vector<8x128xf32>
    %288 = arith.divf %286, %287 : vector<8x128xf32>
    %289 = vector.extract_strided_slice %282 {offsets = [0, 128], sizes = [8, 128], strides = [1, 1]} : vector<8x512xf32> to vector<8x128xf32>
    %290 = arith.negf %289 : vector<8x128xf32>
    %291 = math.exp %290 : vector<8x128xf32>
    %cst_85 = arith.constant 1.000000e+00 : f32
    %292 = vector.broadcast %cst_85 : f32 to vector<8x128xf32>
    %293 = arith.addf %292, %291 : vector<8x128xf32>
    %294 = arith.divf %292, %293 : vector<8x128xf32>
    %295 = vector.extract_strided_slice %282 {offsets = [0, 256], sizes = [8, 128], strides = [1, 1]} : vector<8x512xf32> to vector<8x128xf32>
    %296 = math.tanh %295 : vector<8x128xf32>
    %297 = vector.extract_strided_slice %282 {offsets = [0, 384], sizes = [8, 128], strides = [1, 1]} : vector<8x512xf32> to vector<8x128xf32>
    %298 = arith.negf %297 : vector<8x128xf32>
    %299 = math.exp %298 : vector<8x128xf32>
    %cst_86 = arith.constant 1.000000e+00 : f32
    %300 = vector.broadcast %cst_86 : f32 to vector<8x128xf32>
    %301 = arith.addf %300, %299 : vector<8x128xf32>
    %302 = arith.divf %300, %301 : vector<8x128xf32>
    %303 = arith.mulf %294, %277 : vector<8x128xf32>
    %304 = arith.mulf %288, %296 : vector<8x128xf32>
    %305 = arith.addf %303, %304 : vector<8x128xf32>
    %306 = math.tanh %305 : vector<8x128xf32>
    %307 = arith.mulf %302, %306 : vector<8x128xf32>
    %c8_87 = arith.constant 8 : index
    %c0_88 = arith.constant 0 : index
    %308 = vector.load %arg13[%c8_87, %c0_88] : memref<64x512xbf16, #tpu.memory_space<vmem>>, vector<8x512xbf16>
    %309 = arith.extf %308 : vector<8x512xbf16> to vector<8x512xf32>
    %310 = arith.truncf %307 : vector<8x128xf32> to vector<8x128xbf16>
    %cst_89 = arith.constant dense<0.000000e+00> : vector<8x512xf32>
    %311 = tpu.matmul %310, %275, %cst_89 {dimension_numbers = #tpu.dot_dimension_numbers<[1], [0], [0], [1], [0, 0, 1, 1], [], []>} : vector<8x128xbf16>, vector<128x512xbf16>, vector<8x512xf32> -> vector<8x512xf32>
    %312 = arith.addf %309, %311 : vector<8x512xf32>
    %313 = vector.extract_strided_slice %312 {offsets = [0, 0], sizes = [8, 128], strides = [1, 1]} : vector<8x512xf32> to vector<8x128xf32>
    %314 = arith.negf %313 : vector<8x128xf32>
    %315 = math.exp %314 : vector<8x128xf32>
    %cst_90 = arith.constant 1.000000e+00 : f32
    %316 = vector.broadcast %cst_90 : f32 to vector<8x128xf32>
    %317 = arith.addf %316, %315 : vector<8x128xf32>
    %318 = arith.divf %316, %317 : vector<8x128xf32>
    %319 = vector.extract_strided_slice %312 {offsets = [0, 128], sizes = [8, 128], strides = [1, 1]} : vector<8x512xf32> to vector<8x128xf32>
    %320 = arith.negf %319 : vector<8x128xf32>
    %321 = math.exp %320 : vector<8x128xf32>
    %cst_91 = arith.constant 1.000000e+00 : f32
    %322 = vector.broadcast %cst_91 : f32 to vector<8x128xf32>
    %323 = arith.addf %322, %321 : vector<8x128xf32>
    %324 = arith.divf %322, %323 : vector<8x128xf32>
    %325 = vector.extract_strided_slice %312 {offsets = [0, 256], sizes = [8, 128], strides = [1, 1]} : vector<8x512xf32> to vector<8x128xf32>
    %326 = math.tanh %325 : vector<8x128xf32>
    %327 = vector.extract_strided_slice %312 {offsets = [0, 384], sizes = [8, 128], strides = [1, 1]} : vector<8x512xf32> to vector<8x128xf32>
    %328 = arith.negf %327 : vector<8x128xf32>
    %329 = math.exp %328 : vector<8x128xf32>
    %cst_92 = arith.constant 1.000000e+00 : f32
    %330 = vector.broadcast %cst_92 : f32 to vector<8x128xf32>
    %331 = arith.addf %330, %329 : vector<8x128xf32>
    %332 = arith.divf %330, %331 : vector<8x128xf32>
    %333 = arith.mulf %324, %305 : vector<8x128xf32>
    %334 = arith.mulf %318, %326 : vector<8x128xf32>
    %335 = arith.addf %333, %334 : vector<8x128xf32>
    %336 = math.tanh %335 : vector<8x128xf32>
    %337 = arith.mulf %332, %336 : vector<8x128xf32>
    %c16_93 = arith.constant 16 : index
    %c0_94 = arith.constant 0 : index
    %338 = vector.load %arg13[%c16_93, %c0_94] : memref<64x512xbf16, #tpu.memory_space<vmem>>, vector<8x512xbf16>
    %339 = arith.extf %338 : vector<8x512xbf16> to vector<8x512xf32>
    %340 = arith.truncf %337 : vector<8x128xf32> to vector<8x128xbf16>
    %cst_95 = arith.constant dense<0.000000e+00> : vector<8x512xf32>
    %341 = tpu.matmul %340, %275, %cst_95 {dimension_numbers = #tpu.dot_dimension_numbers<[1], [0], [0], [1], [0, 0, 1, 1], [], []>} : vector<8x128xbf16>, vector<128x512xbf16>, vector<8x512xf32> -> vector<8x512xf32>
    %342 = arith.addf %339, %341 : vector<8x512xf32>
    %343 = vector.extract_strided_slice %342 {offsets = [0, 0], sizes = [8, 128], strides = [1, 1]} : vector<8x512xf32> to vector<8x128xf32>
    %344 = arith.negf %343 : vector<8x128xf32>
    %345 = math.exp %344 : vector<8x128xf32>
    %cst_96 = arith.constant 1.000000e+00 : f32
    %346 = vector.broadcast %cst_96 : f32 to vector<8x128xf32>
    %347 = arith.addf %346, %345 : vector<8x128xf32>
    %348 = arith.divf %346, %347 : vector<8x128xf32>
    %349 = vector.extract_strided_slice %342 {offsets = [0, 128], sizes = [8, 128], strides = [1, 1]} : vector<8x512xf32> to vector<8x128xf32>
    %350 = arith.negf %349 : vector<8x128xf32>
    %351 = math.exp %350 : vector<8x128xf32>
    %cst_97 = arith.constant 1.000000e+00 : f32
    %352 = vector.broadcast %cst_97 : f32 to vector<8x128xf32>
    %353 = arith.addf %352, %351 : vector<8x128xf32>
    %354 = arith.divf %352, %353 : vector<8x128xf32>
    %355 = vector.extract_strided_slice %342 {offsets = [0, 256], sizes = [8, 128], strides = [1, 1]} : vector<8x512xf32> to vector<8x128xf32>
    %356 = math.tanh %355 : vector<8x128xf32>
    %357 = vector.extract_strided_slice %342 {offsets = [0, 384], sizes = [8, 128], strides = [1, 1]} : vector<8x512xf32> to vector<8x128xf32>
    %358 = arith.negf %357 : vector<8x128xf32>
    %359 = math.exp %358 : vector<8x128xf32>
    %cst_98 = arith.constant 1.000000e+00 : f32
    %360 = vector.broadcast %cst_98 : f32 to vector<8x128xf32>
    %361 = arith.addf %360, %359 : vector<8x128xf32>
    %362 = arith.divf %360, %361 : vector<8x128xf32>
    %363 = arith.mulf %354, %335 : vector<8x128xf32>
    %364 = arith.mulf %348, %356 : vector<8x128xf32>
    %365 = arith.addf %363, %364 : vector<8x128xf32>
    %366 = math.tanh %365 : vector<8x128xf32>
    %367 = arith.mulf %362, %366 : vector<8x128xf32>
    %c24_99 = arith.constant 24 : index
    %c0_100 = arith.constant 0 : index
    %368 = vector.load %arg13[%c24_99, %c0_100] : memref<64x512xbf16, #tpu.memory_space<vmem>>, vector<8x512xbf16>
    %369 = arith.extf %368 : vector<8x512xbf16> to vector<8x512xf32>
    %370 = arith.truncf %367 : vector<8x128xf32> to vector<8x128xbf16>
    %cst_101 = arith.constant dense<0.000000e+00> : vector<8x512xf32>
    %371 = tpu.matmul %370, %275, %cst_101 {dimension_numbers = #tpu.dot_dimension_numbers<[1], [0], [0], [1], [0, 0, 1, 1], [], []>} : vector<8x128xbf16>, vector<128x512xbf16>, vector<8x512xf32> -> vector<8x512xf32>
    %372 = arith.addf %369, %371 : vector<8x512xf32>
    %373 = vector.extract_strided_slice %372 {offsets = [0, 0], sizes = [8, 128], strides = [1, 1]} : vector<8x512xf32> to vector<8x128xf32>
    %374 = arith.negf %373 : vector<8x128xf32>
    %375 = math.exp %374 : vector<8x128xf32>
    %cst_102 = arith.constant 1.000000e+00 : f32
    %376 = vector.broadcast %cst_102 : f32 to vector<8x128xf32>
    %377 = arith.addf %376, %375 : vector<8x128xf32>
    %378 = arith.divf %376, %377 : vector<8x128xf32>
    %379 = vector.extract_strided_slice %372 {offsets = [0, 128], sizes = [8, 128], strides = [1, 1]} : vector<8x512xf32> to vector<8x128xf32>
    %380 = arith.negf %379 : vector<8x128xf32>
    %381 = math.exp %380 : vector<8x128xf32>
    %cst_103 = arith.constant 1.000000e+00 : f32
    %382 = vector.broadcast %cst_103 : f32 to vector<8x128xf32>
    %383 = arith.addf %382, %381 : vector<8x128xf32>
    %384 = arith.divf %382, %383 : vector<8x128xf32>
    %385 = vector.extract_strided_slice %372 {offsets = [0, 256], sizes = [8, 128], strides = [1, 1]} : vector<8x512xf32> to vector<8x128xf32>
    %386 = math.tanh %385 : vector<8x128xf32>
    %387 = vector.extract_strided_slice %372 {offsets = [0, 384], sizes = [8, 128], strides = [1, 1]} : vector<8x512xf32> to vector<8x128xf32>
    %388 = arith.negf %387 : vector<8x128xf32>
    %389 = math.exp %388 : vector<8x128xf32>
    %cst_104 = arith.constant 1.000000e+00 : f32
    %390 = vector.broadcast %cst_104 : f32 to vector<8x128xf32>
    %391 = arith.addf %390, %389 : vector<8x128xf32>
    %392 = arith.divf %390, %391 : vector<8x128xf32>
    %393 = arith.mulf %384, %365 : vector<8x128xf32>
    %394 = arith.mulf %378, %386 : vector<8x128xf32>
    %395 = arith.addf %393, %394 : vector<8x128xf32>
    %396 = math.tanh %395 : vector<8x128xf32>
    %397 = arith.mulf %392, %396 : vector<8x128xf32>
    %c32_105 = arith.constant 32 : index
    %c0_106 = arith.constant 0 : index
    %398 = vector.load %arg13[%c32_105, %c0_106] : memref<64x512xbf16, #tpu.memory_space<vmem>>, vector<8x512xbf16>
    %399 = arith.extf %398 : vector<8x512xbf16> to vector<8x512xf32>
    %400 = arith.truncf %397 : vector<8x128xf32> to vector<8x128xbf16>
    %cst_107 = arith.constant dense<0.000000e+00> : vector<8x512xf32>
    %401 = tpu.matmul %400, %275, %cst_107 {dimension_numbers = #tpu.dot_dimension_numbers<[1], [0], [0], [1], [0, 0, 1, 1], [], []>} : vector<8x128xbf16>, vector<128x512xbf16>, vector<8x512xf32> -> vector<8x512xf32>
    %402 = arith.addf %399, %401 : vector<8x512xf32>
    %403 = vector.extract_strided_slice %402 {offsets = [0, 0], sizes = [8, 128], strides = [1, 1]} : vector<8x512xf32> to vector<8x128xf32>
    %404 = arith.negf %403 : vector<8x128xf32>
    %405 = math.exp %404 : vector<8x128xf32>
    %cst_108 = arith.constant 1.000000e+00 : f32
    %406 = vector.broadcast %cst_108 : f32 to vector<8x128xf32>
    %407 = arith.addf %406, %405 : vector<8x128xf32>
    %408 = arith.divf %406, %407 : vector<8x128xf32>
    %409 = vector.extract_strided_slice %402 {offsets = [0, 128], sizes = [8, 128], strides = [1, 1]} : vector<8x512xf32> to vector<8x128xf32>
    %410 = arith.negf %409 : vector<8x128xf32>
    %411 = math.exp %410 : vector<8x128xf32>
    %cst_109 = arith.constant 1.000000e+00 : f32
    %412 = vector.broadcast %cst_109 : f32 to vector<8x128xf32>
    %413 = arith.addf %412, %411 : vector<8x128xf32>
    %414 = arith.divf %412, %413 : vector<8x128xf32>
    %415 = vector.extract_strided_slice %402 {offsets = [0, 256], sizes = [8, 128], strides = [1, 1]} : vector<8x512xf32> to vector<8x128xf32>
    %416 = math.tanh %415 : vector<8x128xf32>
    %417 = vector.extract_strided_slice %402 {offsets = [0, 384], sizes = [8, 128], strides = [1, 1]} : vector<8x512xf32> to vector<8x128xf32>
    %418 = arith.negf %417 : vector<8x128xf32>
    %419 = math.exp %418 : vector<8x128xf32>
    %cst_110 = arith.constant 1.000000e+00 : f32
    %420 = vector.broadcast %cst_110 : f32 to vector<8x128xf32>
    %421 = arith.addf %420, %419 : vector<8x128xf32>
    %422 = arith.divf %420, %421 : vector<8x128xf32>
    %423 = arith.mulf %414, %395 : vector<8x128xf32>
    %424 = arith.mulf %408, %416 : vector<8x128xf32>
    %425 = arith.addf %423, %424 : vector<8x128xf32>
    %426 = math.tanh %425 : vector<8x128xf32>
    %427 = arith.mulf %422, %426 : vector<8x128xf32>
    %c40_111 = arith.constant 40 : index
    %c0_112 = arith.constant 0 : index
    %428 = vector.load %arg13[%c40_111, %c0_112] : memref<64x512xbf16, #tpu.memory_space<vmem>>, vector<8x512xbf16>
    %429 = arith.extf %428 : vector<8x512xbf16> to vector<8x512xf32>
    %430 = arith.truncf %427 : vector<8x128xf32> to vector<8x128xbf16>
    %cst_113 = arith.constant dense<0.000000e+00> : vector<8x512xf32>
    %431 = tpu.matmul %430, %275, %cst_113 {dimension_numbers = #tpu.dot_dimension_numbers<[1], [0], [0], [1], [0, 0, 1, 1], [], []>} : vector<8x128xbf16>, vector<128x512xbf16>, vector<8x512xf32> -> vector<8x512xf32>
    %432 = arith.addf %429, %431 : vector<8x512xf32>
    %433 = vector.extract_strided_slice %432 {offsets = [0, 0], sizes = [8, 128], strides = [1, 1]} : vector<8x512xf32> to vector<8x128xf32>
    %434 = arith.negf %433 : vector<8x128xf32>
    %435 = math.exp %434 : vector<8x128xf32>
    %cst_114 = arith.constant 1.000000e+00 : f32
    %436 = vector.broadcast %cst_114 : f32 to vector<8x128xf32>
    %437 = arith.addf %436, %435 : vector<8x128xf32>
    %438 = arith.divf %436, %437 : vector<8x128xf32>
    %439 = vector.extract_strided_slice %432 {offsets = [0, 128], sizes = [8, 128], strides = [1, 1]} : vector<8x512xf32> to vector<8x128xf32>
    %440 = arith.negf %439 : vector<8x128xf32>
    %441 = math.exp %440 : vector<8x128xf32>
    %cst_115 = arith.constant 1.000000e+00 : f32
    %442 = vector.broadcast %cst_115 : f32 to vector<8x128xf32>
    %443 = arith.addf %442, %441 : vector<8x128xf32>
    %444 = arith.divf %442, %443 : vector<8x128xf32>
    %445 = vector.extract_strided_slice %432 {offsets = [0, 256], sizes = [8, 128], strides = [1, 1]} : vector<8x512xf32> to vector<8x128xf32>
    %446 = math.tanh %445 : vector<8x128xf32>
    %447 = vector.extract_strided_slice %432 {offsets = [0, 384], sizes = [8, 128], strides = [1, 1]} : vector<8x512xf32> to vector<8x128xf32>
    %448 = arith.negf %447 : vector<8x128xf32>
    %449 = math.exp %448 : vector<8x128xf32>
    %cst_116 = arith.constant 1.000000e+00 : f32
    %450 = vector.broadcast %cst_116 : f32 to vector<8x128xf32>
    %451 = arith.addf %450, %449 : vector<8x128xf32>
    %452 = arith.divf %450, %451 : vector<8x128xf32>
    %453 = arith.mulf %444, %425 : vector<8x128xf32>
    %454 = arith.mulf %438, %446 : vector<8x128xf32>
    %455 = arith.addf %453, %454 : vector<8x128xf32>
    %456 = math.tanh %455 : vector<8x128xf32>
    %457 = arith.mulf %452, %456 : vector<8x128xf32>
    %c48_117 = arith.constant 48 : index
    %c0_118 = arith.constant 0 : index
    %458 = vector.load %arg13[%c48_117, %c0_118] : memref<64x512xbf16, #tpu.memory_space<vmem>>, vector<8x512xbf16>
    %459 = arith.extf %458 : vector<8x512xbf16> to vector<8x512xf32>
    %460 = arith.truncf %457 : vector<8x128xf32> to vector<8x128xbf16>
    %cst_119 = arith.constant dense<0.000000e+00> : vector<8x512xf32>
    %461 = tpu.matmul %460, %275, %cst_119 {dimension_numbers = #tpu.dot_dimension_numbers<[1], [0], [0], [1], [0, 0, 1, 1], [], []>} : vector<8x128xbf16>, vector<128x512xbf16>, vector<8x512xf32> -> vector<8x512xf32>
    %462 = arith.addf %459, %461 : vector<8x512xf32>
    %463 = vector.extract_strided_slice %462 {offsets = [0, 0], sizes = [8, 128], strides = [1, 1]} : vector<8x512xf32> to vector<8x128xf32>
    %464 = arith.negf %463 : vector<8x128xf32>
    %465 = math.exp %464 : vector<8x128xf32>
    %cst_120 = arith.constant 1.000000e+00 : f32
    %466 = vector.broadcast %cst_120 : f32 to vector<8x128xf32>
    %467 = arith.addf %466, %465 : vector<8x128xf32>
    %468 = arith.divf %466, %467 : vector<8x128xf32>
    %469 = vector.extract_strided_slice %462 {offsets = [0, 128], sizes = [8, 128], strides = [1, 1]} : vector<8x512xf32> to vector<8x128xf32>
    %470 = arith.negf %469 : vector<8x128xf32>
    %471 = math.exp %470 : vector<8x128xf32>
    %cst_121 = arith.constant 1.000000e+00 : f32
    %472 = vector.broadcast %cst_121 : f32 to vector<8x128xf32>
    %473 = arith.addf %472, %471 : vector<8x128xf32>
    %474 = arith.divf %472, %473 : vector<8x128xf32>
    %475 = vector.extract_strided_slice %462 {offsets = [0, 256], sizes = [8, 128], strides = [1, 1]} : vector<8x512xf32> to vector<8x128xf32>
    %476 = math.tanh %475 : vector<8x128xf32>
    %477 = vector.extract_strided_slice %462 {offsets = [0, 384], sizes = [8, 128], strides = [1, 1]} : vector<8x512xf32> to vector<8x128xf32>
    %478 = arith.negf %477 : vector<8x128xf32>
    %479 = math.exp %478 : vector<8x128xf32>
    %cst_122 = arith.constant 1.000000e+00 : f32
    %480 = vector.broadcast %cst_122 : f32 to vector<8x128xf32>
    %481 = arith.addf %480, %479 : vector<8x128xf32>
    %482 = arith.divf %480, %481 : vector<8x128xf32>
    %483 = arith.mulf %474, %455 : vector<8x128xf32>
    %484 = arith.mulf %468, %476 : vector<8x128xf32>
    %485 = arith.addf %483, %484 : vector<8x128xf32>
    %486 = math.tanh %485 : vector<8x128xf32>
    %487 = arith.mulf %482, %486 : vector<8x128xf32>
    %c56_123 = arith.constant 56 : index
    %c0_124 = arith.constant 0 : index
    %488 = vector.load %arg13[%c56_123, %c0_124] : memref<64x512xbf16, #tpu.memory_space<vmem>>, vector<8x512xbf16>
    %489 = arith.extf %488 : vector<8x512xbf16> to vector<8x512xf32>
    %490 = arith.truncf %487 : vector<8x128xf32> to vector<8x128xbf16>
    %cst_125 = arith.constant dense<0.000000e+00> : vector<8x512xf32>
    %491 = tpu.matmul %490, %275, %cst_125 {dimension_numbers = #tpu.dot_dimension_numbers<[1], [0], [0], [1], [0, 0, 1, 1], [], []>} : vector<8x128xbf16>, vector<128x512xbf16>, vector<8x512xf32> -> vector<8x512xf32>
    %492 = arith.addf %489, %491 : vector<8x512xf32>
    %493 = vector.extract_strided_slice %492 {offsets = [0, 0], sizes = [8, 128], strides = [1, 1]} : vector<8x512xf32> to vector<8x128xf32>
    %494 = arith.negf %493 : vector<8x128xf32>
    %495 = math.exp %494 : vector<8x128xf32>
    %cst_126 = arith.constant 1.000000e+00 : f32
    %496 = vector.broadcast %cst_126 : f32 to vector<8x128xf32>
    %497 = arith.addf %496, %495 : vector<8x128xf32>
    %498 = arith.divf %496, %497 : vector<8x128xf32>
    %499 = vector.extract_strided_slice %492 {offsets = [0, 128], sizes = [8, 128], strides = [1, 1]} : vector<8x512xf32> to vector<8x128xf32>
    %500 = arith.negf %499 : vector<8x128xf32>
    %501 = math.exp %500 : vector<8x128xf32>
    %cst_127 = arith.constant 1.000000e+00 : f32
    %502 = vector.broadcast %cst_127 : f32 to vector<8x128xf32>
    %503 = arith.addf %502, %501 : vector<8x128xf32>
    %504 = arith.divf %502, %503 : vector<8x128xf32>
    %505 = vector.extract_strided_slice %492 {offsets = [0, 256], sizes = [8, 128], strides = [1, 1]} : vector<8x512xf32> to vector<8x128xf32>
    %506 = math.tanh %505 : vector<8x128xf32>
    %507 = vector.extract_strided_slice %492 {offsets = [0, 384], sizes = [8, 128], strides = [1, 1]} : vector<8x512xf32> to vector<8x128xf32>
    %508 = arith.negf %507 : vector<8x128xf32>
    %509 = math.exp %508 : vector<8x128xf32>
    %cst_128 = arith.constant 1.000000e+00 : f32
    %510 = vector.broadcast %cst_128 : f32 to vector<8x128xf32>
    %511 = arith.addf %510, %509 : vector<8x128xf32>
    %512 = arith.divf %510, %511 : vector<8x128xf32>
    %513 = arith.mulf %504, %485 : vector<8x128xf32>
    %514 = arith.mulf %498, %506 : vector<8x128xf32>
    %515 = arith.addf %513, %514 : vector<8x128xf32>
    %516 = math.tanh %515 : vector<8x128xf32>
    %517 = arith.mulf %512, %516 : vector<8x128xf32>
    %c0_129 = arith.constant 0 : index
    %c0_130 = arith.constant 0 : index
    %518 = vector.load %arg7[%c0_129, %c0_130] : memref<128x128xbf16, #tpu.memory_space<vmem>>, vector<128x128xbf16>
    %519 = arith.truncf %517 : vector<8x128xf32> to vector<8x128xbf16>
    %cst_131 = arith.constant dense<0.000000e+00> : vector<8x128xf32>
    %520 = tpu.matmul %519, %518, %cst_131 {dimension_numbers = #tpu.dot_dimension_numbers<[1], [0], [0], [1], [0, 0, 1, 1], [], []>} : vector<8x128xbf16>, vector<128x128xbf16>, vector<8x128xf32> -> vector<8x128xf32>
    %c0_132 = arith.constant 0 : index
    %c0_133 = arith.constant 0 : index
    %521 = vector.load %arg8[%c0_132, %c0_133] : memref<1x128xf32, #tpu.memory_space<vmem>>, vector<1x128xf32>
    %522 = vector.broadcast %521 : vector<1x128xf32> to vector<8x128xf32>
    %523 = arith.addf %520, %522 : vector<8x128xf32>
    %c0_134 = arith.constant 0 : index
    %c0_135 = arith.constant 0 : index
    %524 = vector.load %arg9[%c0_134, %c0_135] : memref<128x4xbf16, #tpu.memory_space<vmem>>, vector<128x4xbf16>
    %525 = arith.truncf %523 : vector<8x128xf32> to vector<8x128xbf16>
    %cst_136 = arith.constant dense<0.000000e+00> : vector<8x4xf32>
    %526 = tpu.matmul %525, %524, %cst_136 {dimension_numbers = #tpu.dot_dimension_numbers<[1], [0], [0], [1], [0, 0, 1, 1], [], []>} : vector<8x128xbf16>, vector<128x4xbf16>, vector<8x4xf32> -> vector<8x4xf32>
    %c0_137 = arith.constant 0 : index
    %c0_138 = arith.constant 0 : index
    %527 = vector.load %arg10[%c0_137, %c0_138] : memref<1x4xf32, #tpu.memory_space<vmem>>, vector<1x4xf32>
    %528 = vector.broadcast %527 : vector<1x4xf32> to vector<8x4xf32>
    %529 = arith.addf %526, %528 : vector<8x4xf32>
    %c0_139 = arith.constant 0 : index
    %c0_140 = arith.constant 0 : index
    %530 = vector.load %arg11[%c0_139, %c0_140] : memref<8x4xf32, #tpu.memory_space<vmem>>, vector<8x4xf32>
    tpu.vector_store %arg11[%c0_139, %c0_140], %529 {strides = array<i32>} : memref<8x4xf32, #tpu.memory_space<vmem>>, vector<8x4xf32>,
    return
  }
}

</mosaic_0001>

<bundles_post_ra>
// kernel: tpu_custom_call.1
= control target key start
LH: loop header
LB: loop body
LE: loop exit
PB: predicated region body
PF: predicated region fallthrough
CT: control target
= control target key end

     0   :  { %16 = vsyncpa [#allocation5], 0  ;;  %s5368_s0 = inlined_call_operand.vmem [shape: bf16[64,8], index: 0, kind: input, shape index: {}]   ;;  %s5369_s1 = inlined_call_operand.vmem [shape: bf16[8,512], index: 1, kind: input, shape index: {}]   ;;  %s5370_s2 = inlined_call_operand.hbm [shape: bf16[128,512], index: 2, kind: input, shape index: {}]   ;;  %s5371_s3 = inlined_call_operand.vmem [shape: f32[1,512], index: 3, kind: input, shape index: {}]   ;;  %s5372_s4 = inlined_call_operand.hbm [shape: bf16[128,512], index: 4, kind: input, shape index: {}]   ;;  %s5373_s5 = inlined_call_operand.hbm [shape: bf16[128,512], index: 5, kind: input, shape index: {}]   ;;  %s5374_s6 = inlined_call_operand.vmem [shape: f32[1,512], index: 6, kind: input, shape index: {}]   ;;  %s5375_s7 = inlined_call_operand.vmem [shape: bf16[128,128], index: 7, kind: input, shape index: {}]   ;;  %s5376_s8 = inlined_call_operand.vmem [shape: f32[1,128], index: 8, kind: input, shape index: {}]   ;;  %s5377_s9 = inlined_call_operand.vmem [shape: bf16[128,4], index: 9, kind: input, shape index: {}]   ;;  %s5378_s10 = inlined_call_operand.vmem [shape: f32[1,4], index: 10, kind: input, shape index: {}]   ;;  %s5379_s11 = inlined_call_operand.vmem [shape: f32[8,4], index: 11, kind: output, shape index: {}]  }
   0x1   :  { %17 = vsyncpa [#allocation7], 0  ;;  %s4181_s17 = smov [#allocation6]   ;;  %s4182_s19 = smov [#allocation4]  }
   0x2   :  { %s41_s18 = sshll.u32 %s4181_s17, 4  ;;  %s27_s20 = sshll.u32 %s4182_s19, 4  ;;  %s42_s18 = int_to_ptr.vmem [resolvable:$true] %s41_s18  ;;  %s4249_s20 = int_to_ptr.vmem [resolvable:$true] %s27_s20 }
   0x3   :  { %s4111_s23 = scalar_lea.hbm %s5372_s4, 4096 }
   0x4   :  { %p4112_p0 = scmp.ne.s32.totalorder %s5372_s4, %s4111_s23  ;;  %p4115_p1 = scmp.lt.u32.totalorder %s4111_s23, %s5372_s4 }
   0x6   :  { %p4117_p2 = pnand %p4115_p1, %p4112_p0 }
   0x8   :  { %4120 = shalt.err (!%p4117_p2)
}
   0x9   :  { %s4121_s28 = scalar_lea.vmem %s42_s18, 4096  ;;  %p4126_p4 = scmp.lt.s32.totalorder %s42_s18, %s42_s18 }
   0xa   :  { %p4122_p3 = scmp.ne.s32.totalorder %s42_s18, %s4121_s28  ;;  %p4127_p5 = scmp.lt.s32.totalorder %s4121_s28, %s4121_s28 }
   0xc   :  { %p4128_p6 = por %p4127_p5, %p4126_p4 }
   0xe   :  { %p4129_p7 = pnand %p4128_p6, %p4122_p3 }
  0x10   :  { %4132 = shalt.err (!%p4129_p7)
}
  0x11   :  { %s4183_s29 = smov 256   ;;  %s4184_s30 = smov 16  }
  0x12   :  { %47 = dma.hbm_to_vmem [thread:$0]  %s5372_s4, 4096, %s42_s18, [#allocation7], %s4183_s29, %s4183_s29, %s4184_s30  }
  0x13   :  { %s4133_s16 = scalar_lea.hbm %s5370_s2, 4096 }
  0x14   :  { %p4134_p8 = scmp.ne.s32.totalorder %s5370_s2, %s4133_s16  ;;  %p4137_p9 = scmp.lt.u32.totalorder %s4133_s16, %s5370_s2 }
  0x16   :  { %p4139_p10 = pnand %p4137_p9, %p4134_p8 }
  0x18   :  { %4142 = shalt.err (!%p4139_p10)
}
  0x19   :  { %s4143_s23 = scalar_lea.vmem %s4249_s20, 4096  ;;  %p4148_p12 = scmp.lt.s32.totalorder %s4249_s20, %s4249_s20 }
  0x1a   :  { %p4144_p11 = scmp.ne.s32.totalorder %s4249_s20, %s4143_s23  ;;  %p4149_p13 = scmp.lt.s32.totalorder %s4143_s23, %s4143_s23 }
  0x1c   :  { %p4150_p0 = por %p4149_p13, %p4148_p12 }
  0x1e   :  { %p4151_p1 = pnand %p4150_p0, %p4144_p11 }
  0x20   :  { %4154 = shalt.err (!%p4151_p1)
}
  0x21   :  { %33 = dma.hbm_to_vmem [thread:$0]  %s5370_s2, 4096, %s4249_s20, [#allocation5], %s4183_s29, %s4183_s29, %s4184_s30  }
  0x22   :  { %s4185_s24 = smov [#allocation8]   ;;  %s4155_s28 = scalar_lea.hbm %s5373_s5, 4096 }
  0x23   :  { %s53_s25 = sshll.u32 %s4185_s24, 4  ;;  %p4156_p2 = scmp.ne.s32.totalorder %s5373_s5, %s4155_s28  ;;  %s54_s25 = int_to_ptr.vmem [resolvable:$true] %s53_s25 }
  0x24   :  { %p4159_p3 = scmp.lt.u32.totalorder %s4155_s28, %s5373_s5 }
  0x26   :  { %p4161_p4 = pnand %p4159_p3, %p4156_p2 }
  0x28   :  { %4164 = shalt.err (!%p4161_p4)
}
  0x29   :  { %s4165_s16 = scalar_lea.vmem %s54_s25, 4096  ;;  %p4170_p6 = scmp.lt.s32.totalorder %s54_s25, %s54_s25 }
  0x2a   :  { %p4166_p5 = scmp.ne.s32.totalorder %s54_s25, %s4165_s16  ;;  %p4171_p7 = scmp.lt.s32.totalorder %s4165_s16, %s4165_s16 }
  0x2c   :  { %p4172_p8 = por %p4171_p7, %p4170_p6 }
  0x2e   :  { %p4173_p9 = pnand %p4172_p8, %p4166_p5 }
  0x30   :  { %4176 = shalt.err (!%p4173_p9)
}
  0x31   :  { %59 = dma.hbm_to_vmem [thread:$0]  %s5373_s5, 4096, %s54_s25, [#allocation7], %s4183_s29, %s4183_s29, %s4184_s30  }
  0x32   :  { %4177 = dma.done.wait [#allocation5], 4096  }
  0x33   :  { %4178 = vsyncadd [#allocation5], 4294963200 }
  0x34   :  { %4179 = dma.done.wait [#allocation7], 8192  }
  0x35   :  { %4180 = vsyncadd [#allocation7], 4294959104  ;;  %v4186_v0 = vmov 0   ;;  %v88_v1 = vld [vmem:[%s5369_s1] sm:$0xff]  ;;  %vm155_vm0 = vcmask 1043456   ;;  %v89_v2 = vld [vmem:[%s5369_s1 + $0x8] sm:$0xff]  ;;  %v92_v45 = vlaneseq }
  0x36   :  { %200 = vmatprep.mubr.bf16.mxu0 %v4186_v0  ;;  %273 = vmatprep.mubr.bf16.mxu1 %v4186_v0  ;;  %v3382_v3 = vcombine.high %v88_v1, %v88_v1  ;;  %v3384_v4 = vcombine.high %v89_v2, %v89_v2  ;;  %v3381_v5 = vcombine.low %v88_v1, %v88_v1  ;;  %v3627_v7 = vld [vmem:[%s5368_s0] sm:$0xff]   ;;  %v4314_v11 = vld [vmem:[#allocation4 + $0xc] ss:$16 sps:$4 sm:$0xff]   ;;  %vm142_vm1 = vcmask 64512   ;;  %v4318_v13 = vld [vmem:[#allocation4 + $0x8] ss:$16 sps:$4 sm:$0xff]  }
  0x37   :  { %v3383_v6 = vcombine.low %v89_v2, %v89_v2  ;;  %v4312_v8 = vld [vmem:[#allocation4 + $0x4] ss:$16 sps:$4 sm:$0xff]   ;;  %v4316_v12 = vld [vmem:[#allocation4] ss:$16 sps:$4 sm:$0xff]   ;;  %v4324_v15 = vld [vmem:[#allocation4 + $0x2c] ss:$16 sps:$4 sm:$0xff]  }
  0x38   :  { %3385 = vmatprep.subr.msk.bf16.mxu0 %vm155_vm0, %v3382_v3  ;;  %3390 = vmatprep.subr.msk.bf16.mxu1 %vm155_vm0, %v3384_v4  ;;  %v157_v9 = vsel %vm155_vm0, %v3381_v5, 0  ;;  %v4322_v14 = vld [vmem:[#allocation4 + $0x24] ss:$16 sps:$4 sm:$0xff]   ;;  %v4326_v16 = vld [vmem:[#allocation4 + $0x20] ss:$16 sps:$4 sm:$0xff]   ;;  %v3640_v20 = vld [vmem:[%s5368_s0 + $0x8] sm:$0xff]  }
  0x39   :  { %v163_v10 = vsel %vm155_vm0, %v3383_v6, 0  ;;  %169 = vmatpush1.bf16.msra.mxu0 %v157_v9  ;;  %v4330_v17 = vld [vmem:[#allocation4 + $0x28] ss:$16 sps:$4 sm:$0xff]   ;;  %v4334_v18 = vld [vmem:[#allocation4 + $0x44] ss:$16 sps:$4 sm:$0xff]   ;;  %v4471_v46 = vshrl.u32 %v92_v45, 7 }
  0x3a   :  { %242 = vmatpush1.bf16.msra.mxu1 %v163_v10  ;;  %546 = vmatprep.subr.bf16.mxu0 %v4312_v8  ;;  %v4338_v19 = vld [vmem:[#allocation4 + $0x4c] ss:$16 sps:$4 sm:$0xff]   ;;  %v4345_v21 = vld [vmem:[#allocation4 + $0x40] ss:$16 sps:$4 sm:$0xff]   ;;  %v4349_v22 = vld [vmem:[#allocation4 + $0x48] ss:$16 sps:$4 sm:$0xff]  }
  0x3b   :  { %587 = vmatprep.subr.bf16.mxu1 %v4314_v11  ;;  %v4351_v23 = vld [vmem:[#allocation4 + $0x64] ss:$16 sps:$4 sm:$0xff]   ;;  %v4355_v24 = vld [vmem:[#allocation4 + $0x6c] ss:$16 sps:$4 sm:$0xff]   ;;  %v4361_v25 = vld [vmem:[#allocation4 + $0x60] ss:$16 sps:$4 sm:$0xff]  }
  0x3c   :  { %3386 = vmatmul.mubr.msk.bf16.vlgmr.msra.gmra.mrb[0].mxu0 %vm142_vm1, %v3627_v7  ;;  %v4363_v26 = vld [vmem:[#allocation4 + $0x68] ss:$16 sps:$4 sm:$0xff]   ;;  %v4365_v27 = vld [vmem:[#allocation4 + $0x84] ss:$16 sps:$4 sm:$0xff]   ;;  %v4369_v28 = vld [vmem:[#allocation4 + $0x8c] ss:$16 sps:$4 sm:$0xff]  }
  0x3d   :  { %3391 = vmatmul.mubr.msk.bf16.vlgmr.msra.gmra.mrb[0].mxu1 %vm142_vm1, %v3627_v7  ;;  %547 = vmatpush1.bf16.msra.mxu0 %v4316_v12  ;;  %v3653_v29 = vld [vmem:[%s5368_s0 + $0x10] sm:$0xff]   ;;  %v4378_v31 = vld [vmem:[#allocation4 + $0x88] ss:$16 sps:$4 sm:$0xff]   ;;  %v4386_v33 = vld [vmem:[#allocation4 + $0xac] ss:$16 sps:$4 sm:$0xff]   ;;  %v102_v47 = vsub.s32 2, %v4471_v46 }
  0x3e   :  { %588 = vmatpush1.bf16.msra.mxu1 %v4318_v13  ;;  %548 = vmatprep.subr.bf16.mxu0 %v4322_v14  ;;  %v4376_v30 = vld [vmem:[#allocation4 + $0x80] ss:$16 sps:$4 sm:$0xff]   ;;  %v4382_v32 = vld [vmem:[#allocation4 + $0xa4] ss:$16 sps:$4 sm:$0xff]   ;;  %v4394_v35 = vld [vmem:[#allocation4 + $0xa8] ss:$16 sps:$4 sm:$0xff]  }
  0x3f   :  { %589 = vmatprep.subr.bf16.mxu1 %v4324_v15  ;;  %210 = vmatprep.mubr.bf16.mxu0 %v4186_v0  ;;  %v4390_v34 = vld [vmem:[#allocation4 + $0xa0] ss:$16 sps:$4 sm:$0xff]   ;;  %v3666_v36 = vld [vmem:[%s5368_s0 + $0x18] sm:$0xff]   ;;  %v4401_v37 = vld [vmem:[#allocation4 + $0xc4] ss:$16 sps:$4 sm:$0xff]   ;;  %v106_v48 = vsub.s32 3, %v4471_v46 }
  0x40   :  { %283 = vmatprep.mubr.bf16.mxu1 %v4186_v0  ;;  %v4403_v38 = vld [vmem:[#allocation4 + $0xcc] ss:$16 sps:$4 sm:$0xff]   ;;  %v4407_v39 = vld [vmem:[#allocation4 + $0xc0] ss:$16 sps:$4 sm:$0xff]   ;;  %v4409_v40 = vld [vmem:[#allocation4 + $0xc8] ss:$16 sps:$4 sm:$0xff]  }
  0x41   :  { %549 = vmatpush1.bf16.msra.mxu0 %v4326_v16  ;;  %v4411_v41 = vld [vmem:[#allocation4 + $0xe4] ss:$16 sps:$4 sm:$0xff]   ;;  %v4413_v42 = vld [vmem:[#allocation4 + $0xec] ss:$16 sps:$4 sm:$0xff]   ;;  %v4419_v43 = vld [vmem:[#allocation4 + $0xe0] ss:$16 sps:$4 sm:$0xff]  }
  0x42   :  { %590 = vmatpush1.bf16.msra.mxu1 %v4330_v17  ;;  %550 = vmatprep.subr.bf16.mxu0 %v4334_v18  ;;  %v4421_v44 = vld [vmem:[#allocation4 + $0xe8] ss:$16 sps:$4 sm:$0xff]   ;;  %v94_v49 = vsub.s32 0, %v4471_v46  ;;  %v90_v50 = vld [vmem:[%s5371_s3] sm:$0xf]  ;;  %v98_v51 = vsub.s32 1, %v4471_v46 }
  0x43   :  { %591 = vmatprep.subr.bf16.mxu1 %v4338_v19  ;;  %v4482_v52 = vrot.slane %v90_v50, %v102_v47  ;;  %v4486_v53 = vrot.slane %v90_v50, %v106_v48  ;;  %vm4188_vm2 = vmmov 0   ;;  %vm3369_vm3 = vcmask 31744  }
  0x44   :  { %3387 = vmatmul.mubr.msk.bf16.gmra.mrb[4].mxu0 %vm142_vm1, %v3640_v20  ;;  %v4490_v54 = vrot.slane %v90_v50, %v94_v49  ;;  %v4494_v56 = vrot.slane %v90_v50, %v98_v51 }
  0x45   :  { %3392 = vmatmul.mubr.msk.bf16.gmra.mrb[4].mxu1 %vm142_vm1, %v3640_v20  ;;  %551 = vmatpush1.bf16.msra.mxu0 %v4345_v21 }
  0x46   :  { %592 = vmatpush1.bf16.msra.mxu1 %v4349_v22  ;;  %552 = vmatprep.subr.bf16.mxu0 %v4351_v23 }
  0x47   :  { %593 = vmatprep.subr.bf16.mxu1 %v4355_v24  ;;  %220 = vmatprep.mubr.bf16.mxu0 %v4186_v0 }
  0x48   :  { %293 = vmatprep.mubr.bf16.mxu1 %v4186_v0 }
  0x49   :  { %553 = vmatpush1.bf16.msra.mxu0 %v4361_v25 }
  0x4a   :  { %594 = vmatpush1.bf16.msra.mxu1 %v4363_v26  ;;  %554 = vmatprep.subr.bf16.mxu0 %v4365_v27 }
  0x4b   :  { %595 = vmatprep.subr.bf16.mxu1 %v4369_v28 }
  0x4c   :  { %3388 = vmatmul.mubr.msk.bf16.gmra.mrb[8].mxu0 %vm142_vm1, %v3653_v29 }
  0x4d   :  { %3393 = vmatmul.mubr.msk.bf16.gmra.mrb[8].mxu1 %vm142_vm1, %v3653_v29  ;;  %555 = vmatpush1.bf16.msra.mxu0 %v4376_v30 }
  0x4e   :  { %596 = vmatpush1.bf16.msra.mxu1 %v4378_v31  ;;  %556 = vmatprep.subr.bf16.mxu0 %v4382_v32 }
  0x4f   :  { %597 = vmatprep.subr.bf16.mxu1 %v4386_v33  ;;  %230 = vmatprep.mubr.bf16.mxu0 %v4186_v0 }
  0x50   :  { %303 = vmatprep.mubr.bf16.mxu1 %v4186_v0 }
  0x51   :  { %557 = vmatpush1.bf16.msra.mxu0 %v4390_v34 }
  0x52   :  { %598 = vmatpush1.bf16.msra.mxu1 %v4394_v35  ;;  %558 = vmatprep.subr.bf16.mxu0 %v4401_v37 }
  0x53   :  { %599 = vmatprep.subr.bf16.mxu1 %v4403_v38 }
  0x54   :  { %3389 = vmatmul.mubr.msk.bf16.gmra.mrb[12].mxu0 %vm142_vm1, %v3666_v36 }
  0x55   :  { %3394 = vmatmul.mubr.msk.bf16.gmra.mrb[12].mxu1 %vm142_vm1, %v3666_v36  ;;  %559 = vmatpush1.bf16.msra.mxu0 %v4407_v39 }
  0x56   :  { %600 = vmatpush1.bf16.msra.mxu1 %v4409_v40  ;;  %560 = vmatprep.subr.bf16.mxu0 %v4411_v41 }
  0x57   :  { %601 = vmatprep.subr.bf16.mxu1 %v4413_v42  ;;  %578 = vmatprep.mubr.bf16.mxu0 %v4186_v0 }
  0x58   :  { %619 = vmatprep.mubr.bf16.mxu1 %v4186_v0 }
  0x59   :  { %561 = vmatpush1.bf16.msra.mxu0 %v4419_v43 }
  0x5a   :  { %602 = vmatpush1.bf16.msra.mxu1 %v4421_v44  ;;  %678 = vmatprep.subr.bf16.mxu0 %v4312_v8 }
  0x5b   :  { %719 = vmatprep.subr.bf16.mxu1 %v4314_v11 }
  0x5c   :  { %579 = vmatmul.mubr.bf16.vlgmr.msra.gmra.mrb[16].mxu0 %v4186_v0 }
  0x5d   :  { %620 = vmatmul.mubr.bf16.vlgmr.msra.gmra.mrb[16].mxu1 %v4186_v0  ;;  %679 = vmatpush1.bf16.msra.mxu0 %v4316_v12 }
  0x5e   :  { %720 = vmatpush1.bf16.msra.mxu1 %v4318_v13  ;;  %680 = vmatprep.subr.bf16.mxu0 %v4322_v14 }
  0x5f   :  { %721 = vmatprep.subr.bf16.mxu1 %v4324_v15  ;;  %710 = vmatprep.mubr.bf16.mxu0 %v4186_v0 }
  0x60   :  { %751 = vmatprep.mubr.bf16.mxu1 %v4186_v0 }
  0x61   :  { %681 = vmatpush1.bf16.msra.mxu0 %v4326_v16 }
  0x62   :  { %722 = vmatpush1.bf16.msra.mxu1 %v4330_v17  ;;  %682 = vmatprep.subr.bf16.mxu0 %v4334_v18 }
  0x63   :  { %723 = vmatprep.subr.bf16.mxu1 %v4338_v19 }
  0x65   :  { %683 = vmatpush1.bf16.msra.mxu0 %v4345_v21 }
  0x66   :  { %724 = vmatpush1.bf16.msra.mxu1 %v4349_v22  ;;  %684 = vmatprep.subr.bf16.mxu0 %v4351_v23 }
  0x67   :  { %725 = vmatprep.subr.bf16.mxu1 %v4355_v24 }
  0x69   :  { %685 = vmatpush1.bf16.msra.mxu0 %v4361_v25 }
  0x6a   :  { %726 = vmatpush1.bf16.msra.mxu1 %v4363_v26  ;;  %686 = vmatprep.subr.bf16.mxu0 %v4365_v27 }
  0x6b   :  { %727 = vmatprep.subr.bf16.mxu1 %v4369_v28 }
  0x6d   :  { %687 = vmatpush1.bf16.msra.mxu0 %v4376_v30 }
  0x6e   :  { %728 = vmatpush1.bf16.msra.mxu1 %v4378_v31  ;;  %688 = vmatprep.subr.bf16.mxu0 %v4382_v32 }
  0x6f   :  { %729 = vmatprep.subr.bf16.mxu1 %v4386_v33 }
  0x71   :  { %689 = vmatpush1.bf16.msra.mxu0 %v4390_v34 }
  0x72   :  { %730 = vmatpush1.bf16.msra.mxu1 %v4394_v35  ;;  %690 = vmatprep.subr.bf16.mxu0 %v4401_v37 }
  0x73   :  { %731 = vmatprep.subr.bf16.mxu1 %v4403_v38 }
  0x75   :  { %691 = vmatpush1.bf16.msra.mxu0 %v4407_v39 }
  0x76   :  { %732 = vmatpush1.bf16.msra.mxu1 %v4409_v40  ;;  %692 = vmatprep.subr.bf16.mxu0 %v4411_v41 }
  0x77   :  { %733 = vmatprep.subr.bf16.mxu1 %v4413_v42 }
  0x79   :  { %693 = vmatpush1.bf16.msra.mxu0 %v4419_v43 }
  0x7a   :  { %734 = vmatpush1.bf16.msra.mxu1 %v4421_v44  ;;  %801 = vmatprep.subr.bf16.mxu0 %v4312_v8 }
  0x7b   :  { %842 = vmatprep.subr.bf16.mxu1 %v4314_v11 }
 0x10f   :  { %v202_v55 = vpop.f32.mrb[0].mxu0 }
 0x110   :  { %v275_v57 = vpop.f32.mrb[0].mxu1  ;;  %v204_v58 = vpop.f32.mrb[1].mxu0  ;;  %v203_v1 = vadd.f32 %v202_v55, %v4490_v54 }
 0x111   :  { %v276_v59 = vadd.f32 %v275_v57, %v4482_v52  ;;  %v277_v60 = vpop.f32.mrb[1].mxu1  ;;  %v206_v61 = vpop.f32.mrb[2].mxu0  ;;  %v205_v6 = vadd.f32 %v204_v58, %v4494_v56 }
 0x112   :  { %v278_v62 = vadd.f32 %v277_v60, %v4486_v53  ;;  %v279_v63 = vpop.f32.mrb[2].mxu1  ;;  %v207_v2 = vadd.f32 %v206_v61, %v4490_v54  ;;  %v208_v3 = vpop.f32.mrb[3].mxu0 }
 0x113   :  { %v280_v4 = vadd.f32 %v279_v63, %v4482_v52  ;;  %v281_v5 = vpop.f32.mrb[3].mxu1  ;;  %v209_v7 = vadd.f32 %v208_v3, %v4494_v56 }
 0x114   :  { %v282_v9 = vadd.f32 %v281_v5, %v4486_v53  ;;  %v314_v10 = vpack.c.bf16 %v207_v2, %v203_v1 }
 0x115   :  { %v316_v20 = vpack.c.bf16 %v280_v4, %v276_v59  ;;  %v315_v29 = vpack.c.bf16 %v209_v7, %v205_v6 }
 0x116   :  { %v317_v36 = vpack.c.bf16 %v282_v9, %v278_v62  ;;  %330 = vst [vmem:[#allocation3] sm:$0xff] %v314_v10 }
 0x117   :  { %332 = vst [vmem:[#allocation3 + $0x10] sm:$0xff] %v316_v20  ;;  %331 = vst [vmem:[#allocation3 + $0x8] sm:$0xff] %v315_v29  ;;  %v212_v45 = vpop.f32.mrb[4].mxu0 }
 0x118   :  { %333 = vst [vmem:[#allocation3 + $0x18] sm:$0xff] %v317_v36  ;;  %v285_v50 = vpop.f32.mrb[4].mxu1  ;;  %v214_v55 = vpop.f32.mrb[5].mxu0  ;;  %v213_v3 = vadd.f32 %v212_v45, %v4490_v54 }
 0x119   :  { %v286_v57 = vadd.f32 %v285_v50, %v4482_v52  ;;  %v287_v60 = vpop.f32.mrb[5].mxu1  ;;  %v216_v61 = vpop.f32.mrb[6].mxu0  ;;  %v215_v4 = vadd.f32 %v214_v55, %v4494_v56 }
 0x11a   :  { %v288_v58 = vadd.f32 %v287_v60, %v4486_v53  ;;  %v289_v63 = vpop.f32.mrb[6].mxu1  ;;  %v217_v59 = vadd.f32 %v216_v61, %v4490_v54  ;;  %v218_v1 = vpop.f32.mrb[7].mxu0 }
 0x11b   :  { %v290_v62 = vadd.f32 %v289_v63, %v4482_v52  ;;  %v291_v2 = vpop.f32.mrb[7].mxu1  ;;  %v219_v5 = vadd.f32 %v218_v1, %v4494_v56 }
 0x11c   :  { %v292_v6 = vadd.f32 %v291_v2, %v4486_v53  ;;  %v318_v7 = vpack.c.bf16 %v217_v59, %v213_v3 }
 0x11d   :  { %v320_v9 = vpack.c.bf16 %v290_v62, %v286_v57  ;;  %v319_v10 = vpack.c.bf16 %v219_v5, %v215_v4 }
 0x11e   :  { %v321_v20 = vpack.c.bf16 %v292_v6, %v288_v58  ;;  %334 = vst [vmem:[#allocation3 + $0x20] sm:$0xff] %v318_v7 }
 0x11f   :  { %336 = vst [vmem:[#allocation3 + $0x30] sm:$0xff] %v320_v9  ;;  %335 = vst [vmem:[#allocation3 + $0x28] sm:$0xff] %v319_v10  ;;  %v222_v29 = vpop.f32.mrb[8].mxu0 }
 0x120   :  { %337 = vst [vmem:[#allocation3 + $0x38] sm:$0xff] %v321_v20  ;;  %v295_v36 = vpop.f32.mrb[8].mxu1  ;;  %v224_v45 = vpop.f32.mrb[9].mxu0  ;;  %v223_v1 = vadd.f32 %v222_v29, %v4490_v54 }
 0x121   :  { %v296_v50 = vadd.f32 %v295_v36, %v4482_v52  ;;  %v297_v60 = vpop.f32.mrb[9].mxu1  ;;  %v226_v61 = vpop.f32.mrb[10].mxu0  ;;  %v225_v62 = vadd.f32 %v224_v45, %v4494_v56 }
 0x122   :  { %v298_v55 = vadd.f32 %v297_v60, %v4486_v53  ;;  %v299_v63 = vpop.f32.mrb[10].mxu1  ;;  %v227_v57 = vadd.f32 %v226_v61, %v4490_v54  ;;  %v228_v3 = vpop.f32.mrb[11].mxu0 }
 0x123   :  { %v300_v58 = vadd.f32 %v299_v63, %v4482_v52  ;;  %v301_v59 = vpop.f32.mrb[11].mxu1  ;;  %v229_v2 = vadd.f32 %v228_v3, %v4494_v56 }
 0x124   :  { %v302_v4 = vadd.f32 %v301_v59, %v4486_v53  ;;  %v322_v5 = vpack.c.bf16 %v227_v57, %v223_v1 }
 0x125   :  { %v324_v6 = vpack.c.bf16 %v300_v58, %v296_v50  ;;  %v323_v7 = vpack.c.bf16 %v229_v2, %v225_v62  ;;  %v378_v2 = vld [vmem:[#allocation3] ss:$16 sps:$4 sm:$0xff]  }
 0x126   :  { %v325_v9 = vpack.c.bf16 %v302_v4, %v298_v55  ;;  %338 = vst [vmem:[#allocation3 + $0x40] sm:$0xff] %v322_v5 }
 0x127   :  { %340 = vst [vmem:[#allocation3 + $0x50] sm:$0xff] %v324_v6  ;;  %339 = vst [vmem:[#allocation3 + $0x48] sm:$0xff] %v323_v7  ;;  %v232_v10 = vpop.f32.mrb[12].mxu0  ;;  %v379_v6 = vld [vmem:[#allocation3 + $0x8] ss:$16 sps:$4 sm:$0xff]  }
 0x128   :  { %341 = vst [vmem:[#allocation3 + $0x58] sm:$0xff] %v325_v9  ;;  %v305_v20 = vpop.f32.mrb[12].mxu1  ;;  %v234_v29 = vpop.f32.mrb[13].mxu0  ;;  %v233_v3 = vadd.f32 %v232_v10, %v4490_v54  ;;  %v382_v10 = vunpack.c.l.bf16 %v378_v2 }
 0x129   :  { %v306_v36 = vadd.f32 %v305_v20, %v4482_v52  ;;  %v307_v60 = vpop.f32.mrb[13].mxu1  ;;  %v236_v61 = vpop.f32.mrb[14].mxu0  ;;  %v235_v58 = vadd.f32 %v234_v29, %v4494_v56  ;;  %v383_v20 = vunpack.c.l.bf16 %v379_v6 }
 0x12a   :  { %v308_v45 = vadd.f32 %v307_v60, %v4486_v53  ;;  %v309_v63 = vpop.f32.mrb[14].mxu1  ;;  %v237_v50 = vadd.f32 %v236_v61, %v4490_v54  ;;  %v238_v1 = vpop.f32.mrb[15].mxu0 }
 0x12b   :  { %v310_v55 = vadd.f32 %v309_v63, %v4482_v52  ;;  %v311_v57 = vpop.f32.mrb[15].mxu1  ;;  %v239_v59 = vadd.f32 %v238_v1, %v4494_v56 }
 0x12c   :  { %v312_v62 = vadd.f32 %v311_v57, %v4486_v53  ;;  %v326_v4 = vpack.c.bf16 %v237_v50, %v233_v3  ;;  %v384_v57 = vunpack.c.h.bf16 %v378_v2 }
 0x12d   :  { %v328_v5 = vpack.c.bf16 %v310_v55, %v306_v36  ;;  %v327_v7 = vpack.c.bf16 %v239_v59, %v235_v58 }
 0x12e   :  { %v329_v9 = vpack.c.bf16 %v312_v62, %v308_v45  ;;  %342 = vst [vmem:[#allocation3 + $0x60] sm:$0xff] %v326_v4  ;;  %v385_v45 = vunpack.c.h.bf16 %v379_v6 }
 0x12f   :  { %344 = vst [vmem:[#allocation3 + $0x70] sm:$0xff] %v328_v5  ;;  %343 = vst [vmem:[#allocation3 + $0x68] sm:$0xff] %v327_v7  ;;  %v580_v54 = vpop.f32.mrb[16].mxu0 }
 0x130   :  { %345 = vst [vmem:[#allocation3 + $0x78] sm:$0xff] %v329_v9  ;;  %v621_v52 = vpop.f32.mrb[16].mxu1  ;;  %v628_v60 = vadd.f32 %v580_v54, %v382_v10  ;;  %v582_v29 = vpop.f32.mrb[17].mxu0 }
 0x131   :  { %v623_v61 = vpop.f32.mrb[17].mxu1  ;;  %v629_v56 = vadd.f32 %v582_v29, %v383_v20  ;;  %v584_v63 = vpop.f32.mrb[18].mxu0  ;;  %v630_v59 = vadd.f32 %v621_v52, %v384_v57 }
 0x132   :  { %v625_v53 = vpop.f32.mrb[18].mxu1  ;;  %v3427_v1 = vmul.f32 -1.442695, %v628_v60  ;;  %v585_v3 = vpop.f32.mrb[19].mxu0  ;;  %v631_v55 = vadd.f32 %v623_v61, %v385_v45  ;;  %v661_v45 = vld [vmem:[#allocation3 + $0x18] sm:$0xf0] }
 0x133   :  { %v626_v36 = vpop.f32.mrb[19].mxu1  ;;  %v3428_v50 = vmul.f32 -1.442695, %v629_v56  ;;  %v658_v53 = vld [vmem:[#allocation3] sm:$0xf0] }
 0x134   :  { %3791 = vpow2.f32 %v3427_v1  ;;  %v3429_v58 = vmul.f32 -1.442695, %v631_v55  ;;  %v659_v1 = vld [vmem:[#allocation3 + $0x8] sm:$0xf0]  ;;  %v666_v3 = vrot.slane %v658_v53, 4 }
 0x135   :  { %3793 = vpow2.f32 %v3428_v50  ;;  %v667_v36 = vrot.slane %v659_v1, 4 }
 0x136   :  { %3795 = vpow2.f32 %v3429_v58  ;;  %v674_v50 = vunpack.c.l.bf16 %v666_v3 }
 0x137   :  { %3797 = vtanh.f32 %v630_v59  ;;  %v675_v58 = vunpack.c.l.bf16 %v667_v36 }
 0x13e   :  { %v3792_v62 = vpop.eup %3791 }
 0x13f   :  { %v3794_v4 = vpop.eup %3793  ;;  %v635_v5 = vadd.f32 1.0, %v3792_v62 }
 0x140   :  { %v641_v7 = vadd.f32 1.0, %v3794_v4  ;;  %v3796_v9 = vpop.eup %3795 }
 0x141   :  { %3799 = vrcp.f32 %v635_v5  ;;  %v3798_v10 = vpop.eup %3797  ;;  %v648_v29 = vadd.f32 1.0, %v3796_v9 }
 0x142   :  { %3801 = vrcp.f32 %v641_v7  ;;  %v669_v7 = vrot.slane %v661_v45, 4 }
 0x143   :  { %3803 = vrcp.f32 %v648_v29 }
 0x144   :  { %v677_v29 = vunpack.c.l.bf16 %v669_v7 }
 0x14b   :  { %v3800_v54 = vpop.eup %3799 }
 0x14c   :  { %v3802_v20 = vpop.eup %3801  ;;  %v652_v60 = vmul.f32 %v3800_v54, %v3798_v10 }
 0x14d   :  { %v651_v56 = vmul.f32 0.0, %v3802_v20  ;;  %v3804_v2 = vpop.eup %3803 }
 0x14f   :  { %v4528_v6 = vadd.f32 %v652_v60, %v651_v56 }
 0x151   :  { %3805 = vtanh.f32 %v4528_v6 }
 0x15b   :  { %v3806_v52 = vpop.eup %3805 }
 0x15c   :  { %v655_v61 = vmul.f32 %v3806_v52, %v3804_v2 }
 0x15e   :  { %v656_v63 = vpack.c.bf16 %v655_v61, %v655_v61 }
 0x160   :  { %657 = vst [vmem:[#allocation2] sm:$0xf] %v656_v63  ;;  %711 = vmatmul.mubr.bf16.vlgmr.msra.gmra.mrb[20].mxu0 %v656_v63  ;;  %752 = vmatmul.mubr.bf16.vlgmr.msra.gmra.mrb[20].mxu1 %v656_v63 }
 0x161   :  { %802 = vmatpush1.bf16.msra.mxu0 %v4316_v12  ;;  %843 = vmatpush1.bf16.msra.mxu1 %v4318_v13 }
 0x162   :  { %803 = vmatprep.subr.bf16.mxu0 %v4322_v14  ;;  %844 = vmatprep.subr.bf16.mxu1 %v4324_v15 }
 0x163   :  { %833 = vmatprep.mubr.bf16.mxu0 %v4186_v0  ;;  %874 = vmatprep.mubr.bf16.mxu1 %v4186_v0 }
 0x165   :  { %804 = vmatpush1.bf16.msra.mxu0 %v4326_v16  ;;  %845 = vmatpush1.bf16.msra.mxu1 %v4330_v17 }
 0x166   :  { %805 = vmatprep.subr.bf16.mxu0 %v4334_v18  ;;  %846 = vmatprep.subr.bf16.mxu1 %v4338_v19 }
 0x169   :  { %806 = vmatpush1.bf16.msra.mxu0 %v4345_v21  ;;  %847 = vmatpush1.bf16.msra.mxu1 %v4349_v22 }
 0x16a   :  { %807 = vmatprep.subr.bf16.mxu0 %v4351_v23  ;;  %848 = vmatprep.subr.bf16.mxu1 %v4355_v24 }
 0x16d   :  { %808 = vmatpush1.bf16.msra.mxu0 %v4361_v25  ;;  %849 = vmatpush1.bf16.msra.mxu1 %v4363_v26 }
 0x16e   :  { %809 = vmatprep.subr.bf16.mxu0 %v4365_v27  ;;  %850 = vmatprep.subr.bf16.mxu1 %v4369_v28 }
 0x171   :  { %810 = vmatpush1.bf16.msra.mxu0 %v4376_v30  ;;  %851 = vmatpush1.bf16.msra.mxu1 %v4378_v31 }
 0x172   :  { %811 = vmatprep.subr.bf16.mxu0 %v4382_v32  ;;  %852 = vmatprep.subr.bf16.mxu1 %v4386_v33 }
 0x175   :  { %812 = vmatpush1.bf16.msra.mxu0 %v4390_v34  ;;  %853 = vmatpush1.bf16.msra.mxu1 %v4394_v35 }
 0x176   :  { %813 = vmatprep.subr.bf16.mxu0 %v4401_v37  ;;  %854 = vmatprep.subr.bf16.mxu1 %v4403_v38 }
 0x179   :  { %814 = vmatpush1.bf16.msra.mxu0 %v4407_v39  ;;  %855 = vmatpush1.bf16.msra.mxu1 %v4409_v40 }
 0x17a   :  { %815 = vmatprep.subr.bf16.mxu0 %v4411_v41  ;;  %856 = vmatprep.subr.bf16.mxu1 %v4413_v42 }
 0x17d   :  { %816 = vmatpush1.bf16.msra.mxu0 %v4419_v43  ;;  %857 = vmatpush1.bf16.msra.mxu1 %v4421_v44 }
 0x17e   :  { %933 = vmatprep.subr.bf16.mxu0 %v4312_v8  ;;  %974 = vmatprep.subr.bf16.mxu1 %v4314_v11  ;;  %v660_v11 = vld [vmem:[#allocation3 + $0x10] sm:$0xf0] }
 0x17f   :  { %v668_v56 = vrot.slane %v660_v11, 4 }
 0x181   :  { %v676_v52 = vunpack.c.l.bf16 %v668_v56 }
 0x233   :  { %v712_v55 = vpop.f32.mrb[20].mxu0  ;;  %v753_v57 = vpop.f32.mrb[20].mxu1 }
 0x234   :  { %v760_v59 = vadd.f32 %v712_v55, %v674_v50  ;;  %v714_v62 = vpop.f32.mrb[21].mxu0  ;;  %v755_v4 = vpop.f32.mrb[21].mxu1  ;;  %v762_v63 = vadd.f32 %v753_v57, %v676_v52 }
 0x235   :  { %v761_v5 = vadd.f32 %v714_v62, %v675_v58  ;;  %v716_v9 = vpop.f32.mrb[22].mxu0  ;;  %v757_v10 = vpop.f32.mrb[22].mxu1  ;;  %v763_v2 = vadd.f32 %v755_v4, %v677_v29 }
 0x236   :  { %v3430_v54 = vmul.f32 -1.442695, %v760_v59  ;;  %v717_v8 = vpop.f32.mrb[23].mxu0  ;;  %v758_v20 = vpop.f32.mrb[23].mxu1 }
 0x237   :  { %v3431_v60 = vmul.f32 -1.442695, %v761_v5  ;;  %v3432_v61 = vmul.f32 -1.442695, %v763_v2 }
 0x238   :  { %3807 = vpow2.f32 %v3430_v54 }
 0x239   :  { %3809 = vpow2.f32 %v3431_v60 }
 0x23a   :  { %3811 = vpow2.f32 %v3432_v61 }
 0x23b   :  { %3813 = vtanh.f32 %v762_v63 }
 0x242   :  { %v3808_v53 = vpop.eup %3807 }
 0x243   :  { %v3810_v1 = vpop.eup %3809  ;;  %v767_v3 = vadd.f32 1.0, %v3808_v53 }
 0x244   :  { %v773_v36 = vadd.f32 1.0, %v3810_v1  ;;  %v3812_v50 = vpop.eup %3811 }
 0x245   :  { %3815 = vrcp.f32 %v767_v3  ;;  %v3814_v45 = vpop.eup %3813  ;;  %v780_v62 = vadd.f32 1.0, %v3812_v50 }
 0x246   :  { %3817 = vrcp.f32 %v773_v36 }
 0x247   :  { %3819 = vrcp.f32 %v780_v62  ;;  %v4620_v62 = vld [vmem:[#allocation4 + $0x2c] ss:$16 sps:$4 sm:$0xff]  }
 0x24f   :  { %v3816_v55 = vpop.eup %3815 }
 0x250   :  { %v3818_v58 = vpop.eup %3817  ;;  %v784_v59 = vmul.f32 %v3816_v55, %v3814_v45  ;;  %v4611_v55 = vld [vmem:[#allocation4] ss:$16 sps:$4 sm:$0xff]  }
 0x251   :  { %v783_v5 = vmul.f32 %v3818_v58, %v4528_v6  ;;  %v3820_v57 = vpop.eup %3819  ;;  %v4614_v58 = vld [vmem:[#allocation4 + $0x8] ss:$16 sps:$4 sm:$0xff]  }
 0x253   :  { %v4566_v4 = vadd.f32 %v784_v59, %v783_v5  ;;  %v4617_v59 = vld [vmem:[#allocation4 + $0x24] ss:$16 sps:$4 sm:$0xff]   ;;  %v4625_v5 = vld [vmem:[#allocation4 + $0x20] ss:$16 sps:$4 sm:$0xff]  }
 0x255   :  { %3821 = vtanh.f32 %v4566_v4 }
 0x25f   :  { %v3822_v7 = vpop.eup %3821 }
 0x260   :  { %v787_v9 = vmul.f32 %v3822_v7, %v3820_v57  ;;  %v4631_v57 = vld [vmem:[#allocation4 + $0x44] ss:$16 sps:$4 sm:$0xff]   ;;  %v4634_v7 = vld [vmem:[#allocation4 + $0x4c] ss:$16 sps:$4 sm:$0xff]  }
 0x262   :  { %v788_v10 = vpack.c.bf16 %v787_v9, %v787_v9  ;;  %v4637_v9 = vld [vmem:[#allocation4 + $0x40] ss:$16 sps:$4 sm:$0xff]  }
 0x264   :  { %v790_v54 = vrot.slane %v788_v10, 4  ;;  %834 = vmatmul.mubr.bf16.vlgmr.msra.gmra.mrb[24].mxu0 %v788_v10  ;;  %875 = vmatmul.mubr.bf16.vlgmr.msra.gmra.mrb[24].mxu1 %v788_v10  ;;  %v4640_v10 = vld [vmem:[#allocation4 + $0x48] ss:$16 sps:$4 sm:$0xff]  }
 0x265   :  { %934 = vmatpush1.bf16.msra.mxu0 %v4316_v12  ;;  %975 = vmatpush1.bf16.msra.mxu1 %v4318_v13  ;;  %v4601_v12 = vld [vmem:[#allocation4 + $0x4] ss:$16 sps:$4 sm:$0xff]   ;;  %v4604_v13 = vld [vmem:[#allocation4 + $0xc] ss:$16 sps:$4 sm:$0xff]  }
 0x266   :  { %792 = vst [vmem:[#allocation2] sm:$0xf0] %v790_v54  ;;  %935 = vmatprep.subr.bf16.mxu0 %v4322_v14  ;;  %976 = vmatprep.subr.bf16.mxu1 %v4324_v15  ;;  %v793_v14 = vld [vmem:[#allocation3 + $0x20] ss:$16 sps:$4 sm:$0xff]   ;;  %v794_v15 = vld [vmem:[#allocation3 + $0x28] ss:$16 sps:$4 sm:$0xff]  }
 0x267   :  { %965 = vmatprep.mubr.bf16.mxu0 %v4186_v0  ;;  %1006 = vmatprep.mubr.bf16.mxu1 %v4186_v0  ;;  %v4643_v54 = vld [vmem:[#allocation4 + $0x64] ss:$16 sps:$4 sm:$0xff]  }
 0x269   :  { %936 = vmatpush1.bf16.msra.mxu0 %v4326_v16  ;;  %977 = vmatpush1.bf16.msra.mxu1 %v4330_v17  ;;  %v797_v16 = vunpack.c.l.bf16 %v793_v14 }
 0x26a   :  { %937 = vmatprep.subr.bf16.mxu0 %v4334_v18  ;;  %978 = vmatprep.subr.bf16.mxu1 %v4338_v19  ;;  %v798_v19 = vunpack.c.l.bf16 %v794_v15 }
 0x26d   :  { %938 = vmatpush1.bf16.msra.mxu0 %v4345_v21  ;;  %979 = vmatpush1.bf16.msra.mxu1 %v4349_v22 }
 0x26e   :  { %939 = vmatprep.subr.bf16.mxu0 %v4351_v23  ;;  %980 = vmatprep.subr.bf16.mxu1 %v4355_v24 }
 0x271   :  { %940 = vmatpush1.bf16.msra.mxu0 %v4361_v25  ;;  %981 = vmatpush1.bf16.msra.mxu1 %v4363_v26 }
 0x272   :  { %941 = vmatprep.subr.bf16.mxu0 %v4365_v27  ;;  %982 = vmatprep.subr.bf16.mxu1 %v4369_v28 }
 0x275   :  { %942 = vmatpush1.bf16.msra.mxu0 %v4376_v30  ;;  %983 = vmatpush1.bf16.msra.mxu1 %v4378_v31 }
 0x276   :  { %943 = vmatprep.subr.bf16.mxu0 %v4382_v32  ;;  %984 = vmatprep.subr.bf16.mxu1 %v4386_v33  ;;  %v800_v32 = vunpack.c.h.bf16 %v794_v15  ;;  %v4649_v15 = vld [vmem:[#allocation4 + $0x60] ss:$16 sps:$4 sm:$0xff]  }
 0x279   :  { %944 = vmatpush1.bf16.msra.mxu0 %v4390_v34  ;;  %985 = vmatpush1.bf16.msra.mxu1 %v4394_v35  ;;  %v799_v34 = vunpack.c.h.bf16 %v793_v14  ;;  %v4646_v14 = vld [vmem:[#allocation4 + $0x6c] ss:$16 sps:$4 sm:$0xff]  }
 0x27a   :  { %945 = vmatprep.subr.bf16.mxu0 %v4401_v37  ;;  %986 = vmatprep.subr.bf16.mxu1 %v4403_v38 }
 0x27d   :  { %946 = vmatpush1.bf16.msra.mxu0 %v4407_v39  ;;  %987 = vmatpush1.bf16.msra.mxu1 %v4409_v40 }
 0x27e   :  { %947 = vmatprep.subr.bf16.mxu0 %v4411_v41  ;;  %988 = vmatprep.subr.bf16.mxu1 %v4413_v42 }
 0x281   :  { %948 = vmatpush1.bf16.msra.mxu0 %v4419_v43  ;;  %989 = vmatpush1.bf16.msra.mxu1 %v4421_v44 }
 0x282   :  { %1056 = vmatprep.subr.bf16.mxu0 %v4601_v12  ;;  %1097 = vmatprep.subr.bf16.mxu1 %v4604_v13 }
 0x337   :  { %v835_v17 = vpop.f32.mrb[24].mxu0  ;;  %v876_v18 = vpop.f32.mrb[24].mxu1 }
 0x338   :  { %v883_v21 = vadd.f32 %v835_v17, %v797_v16  ;;  %v837_v22 = vpop.f32.mrb[25].mxu0  ;;  %v878_v23 = vpop.f32.mrb[25].mxu1  ;;  %v885_v6 = vadd.f32 %v876_v18, %v799_v34  ;;  %v4652_v16 = vld [vmem:[#allocation4 + $0x68] ss:$16 sps:$4 sm:$0xff]   ;;  %v4655_v17 = vld [vmem:[#allocation4 + $0x84] ss:$16 sps:$4 sm:$0xff]  }
 0x339   :  { %v884_v24 = vadd.f32 %v837_v22, %v798_v19  ;;  %v839_v25 = vpop.f32.mrb[26].mxu0  ;;  %v880_v26 = vpop.f32.mrb[26].mxu1  ;;  %v886_v33 = vadd.f32 %v878_v23, %v800_v32  ;;  %v4658_v18 = vld [vmem:[#allocation4 + $0x8c] ss:$16 sps:$4 sm:$0xff]   ;;  %v4661_v19 = vld [vmem:[#allocation4 + $0x80] ss:$16 sps:$4 sm:$0xff]  }
 0x33a   :  { %v3433_v27 = vmul.f32 -1.442695, %v883_v21  ;;  %v840_v28 = vpop.f32.mrb[27].mxu0  ;;  %v881_v30 = vpop.f32.mrb[27].mxu1  ;;  %v4664_v21 = vld [vmem:[#allocation4 + $0x88] ss:$16 sps:$4 sm:$0xff]  }
 0x33b   :  { %v3434_v31 = vmul.f32 -1.442695, %v884_v24  ;;  %v3435_v35 = vmul.f32 -1.442695, %v886_v33  ;;  %v4667_v22 = vld [vmem:[#allocation4 + $0xa4] ss:$16 sps:$4 sm:$0xff]  }
 0x33c   :  { %3823 = vpow2.f32 %v3433_v27  ;;  %v4670_v23 = vld [vmem:[#allocation4 + $0xac] ss:$16 sps:$4 sm:$0xff]   ;;  %v4673_v24 = vld [vmem:[#allocation4 + $0xa0] ss:$16 sps:$4 sm:$0xff]   ;;  %v4676_v25 = vld [vmem:[#allocation4 + $0xa8] ss:$16 sps:$4 sm:$0xff]  }
 0x33d   :  { %3825 = vpow2.f32 %v3434_v31  ;;  %v913_v26 = vld [vmem:[#allocation3 + $0x20] sm:$0xf0] }
 0x33e   :  { %3827 = vpow2.f32 %v3435_v35  ;;  %v921_v27 = vrot.slane %v913_v26, 4 }
 0x33f   :  { %3829 = vtanh.f32 %v885_v6 }
 0x340   :  { %v929_v28 = vunpack.c.l.bf16 %v921_v27 }
 0x346   :  { %v3824_v8 = vpop.eup %3823 }
 0x347   :  { %v3826_v20 = vpop.eup %3825  ;;  %v890_v11 = vadd.f32 1.0, %v3824_v8 }
 0x348   :  { %v896_v60 = vadd.f32 1.0, %v3826_v20  ;;  %v3828_v29 = vpop.eup %3827  ;;  %v915_v20 = vld [vmem:[#allocation3 + $0x30] sm:$0xf0] }
 0x349   :  { %3831 = vrcp.f32 %v890_v11  ;;  %v3830_v56 = vpop.eup %3829  ;;  %v903_v63 = vadd.f32 1.0, %v3828_v29  ;;  %v923_v29 = vrot.slane %v915_v20, 4  ;;  %v1049_v20 = vld [vmem:[#allocation3 + $0x48] ss:$16 sps:$4 sm:$0xff]  }
 0x34a   :  { %3833 = vrcp.f32 %v896_v60 }
 0x34b   :  { %3835 = vrcp.f32 %v903_v63 }
 0x353   :  { %v3832_v2 = vpop.eup %3831 }
 0x354   :  { %v3834_v52 = vpop.eup %3833  ;;  %v907_v61 = vmul.f32 %v3832_v2, %v3830_v56  ;;  %v931_v2 = vunpack.c.l.bf16 %v923_v29 }
 0x355   :  { %v906_v53 = vmul.f32 %v3834_v52, %v4566_v4  ;;  %v3836_v3 = vpop.eup %3835  ;;  %v4628_v4 = vld [vmem:[#allocation4 + $0x28] ss:$16 sps:$4 sm:$0xff]  }
 0x357   :  { %v4608_v1 = vadd.f32 %v907_v61, %v906_v53 }
 0x359   :  { %3837 = vtanh.f32 %v4608_v1 }
 0x363   :  { %v3838_v36 = vpop.eup %3837 }
 0x364   :  { %v910_v50 = vmul.f32 %v3838_v36, %v3836_v3 }
 0x366   :  { %v911_v45 = vpack.c.bf16 %v910_v50, %v910_v50 }
 0x368   :  { %912 = vst [vmem:[#allocation2 + $0x8] sm:$0xf] %v911_v45  ;;  %966 = vmatmul.mubr.bf16.vlgmr.msra.gmra.mrb[28].mxu0 %v911_v45  ;;  %1007 = vmatmul.mubr.bf16.vlgmr.msra.gmra.mrb[28].mxu1 %v911_v45 }
 0x369   :  { %1057 = vmatpush1.bf16.msra.mxu0 %v4611_v55  ;;  %1098 = vmatpush1.bf16.msra.mxu1 %v4614_v58 }
 0x36a   :  { %1058 = vmatprep.subr.bf16.mxu0 %v4617_v59  ;;  %1099 = vmatprep.subr.bf16.mxu1 %v4620_v62 }
 0x36b   :  { %1088 = vmatprep.mubr.bf16.mxu0 %v4186_v0  ;;  %1129 = vmatprep.mubr.bf16.mxu1 %v4186_v0 }
 0x36d   :  { %1059 = vmatpush1.bf16.msra.mxu0 %v4625_v5  ;;  %1100 = vmatpush1.bf16.msra.mxu1 %v4628_v4 }
 0x36e   :  { %1060 = vmatprep.subr.bf16.mxu0 %v4631_v57  ;;  %1101 = vmatprep.subr.bf16.mxu1 %v4634_v7 }
 0x371   :  { %1061 = vmatpush1.bf16.msra.mxu0 %v4637_v9  ;;  %1102 = vmatpush1.bf16.msra.mxu1 %v4640_v10 }
 0x372   :  { %1062 = vmatprep.subr.bf16.mxu0 %v4643_v54  ;;  %1103 = vmatprep.subr.bf16.mxu1 %v4646_v14 }
 0x375   :  { %1063 = vmatpush1.bf16.msra.mxu0 %v4649_v15  ;;  %1104 = vmatpush1.bf16.msra.mxu1 %v4652_v16 }
 0x376   :  { %1064 = vmatprep.subr.bf16.mxu0 %v4655_v17  ;;  %1105 = vmatprep.subr.bf16.mxu1 %v4658_v18 }
 0x379   :  { %1065 = vmatpush1.bf16.msra.mxu0 %v4661_v19  ;;  %1106 = vmatpush1.bf16.msra.mxu1 %v4664_v21 }
 0x37a   :  { %1066 = vmatprep.subr.bf16.mxu0 %v4667_v22  ;;  %1107 = vmatprep.subr.bf16.mxu1 %v4670_v23 }
 0x37d   :  { %1067 = vmatpush1.bf16.msra.mxu0 %v4673_v24  ;;  %1108 = vmatpush1.bf16.msra.mxu1 %v4676_v25 }
 0x37e   :  { %1068 = vmatprep.subr.bf16.mxu0 %v4401_v37  ;;  %1109 = vmatprep.subr.bf16.mxu1 %v4403_v38  ;;  %v914_v37 = vld [vmem:[#allocation3 + $0x28] sm:$0xf0] }
 0x37f   :  { %v922_v38 = vrot.slane %v914_v37, 4 }
 0x381   :  { %1069 = vmatpush1.bf16.msra.mxu0 %v4407_v39  ;;  %1110 = vmatpush1.bf16.msra.mxu1 %v4409_v40  ;;  %v916_v39 = vld [vmem:[#allocation3 + $0x38] sm:$0xf0]  ;;  %v930_v31 = vunpack.c.l.bf16 %v922_v38 }
 0x382   :  { %1070 = vmatprep.subr.bf16.mxu0 %v4411_v41  ;;  %1111 = vmatprep.subr.bf16.mxu1 %v4413_v42 }
 0x385   :  { %1071 = vmatpush1.bf16.msra.mxu0 %v4419_v43  ;;  %1112 = vmatpush1.bf16.msra.mxu1 %v4421_v44  ;;  %v924_v43 = vrot.slane %v916_v39, 4 }
 0x386   :  { %1188 = vmatprep.subr.bf16.mxu0 %v4601_v12  ;;  %1229 = vmatprep.subr.bf16.mxu1 %v4604_v13 }
 0x387   :  { %v932_v60 = vunpack.c.l.bf16 %v924_v43  ;;  %v4726_v43 = vld [vmem:[#allocation4 + $0xc8] ss:$16 sps:$4 sm:$0xff]  }
 0x43b   :  { %v967_v30 = vpop.f32.mrb[28].mxu0  ;;  %v1008_v40 = vpop.f32.mrb[28].mxu1 }
 0x43c   :  { %v1015_v41 = vadd.f32 %v967_v30, %v929_v28  ;;  %v969_v32 = vpop.f32.mrb[29].mxu0  ;;  %v1010_v42 = vpop.f32.mrb[29].mxu1  ;;  %v1017_v61 = vadd.f32 %v1008_v40, %v931_v2 }
 0x43d   :  { %v1016_v33 = vadd.f32 %v969_v32, %v930_v31  ;;  %v971_v34 = vpop.f32.mrb[30].mxu0  ;;  %v1012_v44 = vpop.f32.mrb[30].mxu1  ;;  %v1018_v56 = vadd.f32 %v1010_v42, %v932_v60  ;;  %v4720_v42 = vld [vmem:[#allocation4 + $0xcc] ss:$16 sps:$4 sm:$0xff]  }
 0x43e   :  { %v3436_v35 = vmul.f32 -1.442695, %v1015_v41  ;;  %v972_v6 = vpop.f32.mrb[31].mxu0  ;;  %v1013_v8 = vpop.f32.mrb[31].mxu1  ;;  %v4729_v34 = vld [vmem:[#allocation4 + $0xe4] ss:$16 sps:$4 sm:$0xff]  }
 0x43f   :  { %v3437_v11 = vmul.f32 -1.442695, %v1016_v33  ;;  %v3438_v52 = vmul.f32 -1.442695, %v1018_v56  ;;  %v4723_v33 = vld [vmem:[#allocation4 + $0xc0] ss:$16 sps:$4 sm:$0xff]   ;;  %v1053_v56 = vunpack.c.l.bf16 %v1049_v20 }
 0x440   :  { %3839 = vpow2.f32 %v3436_v35  ;;  %v4732_v44 = vld [vmem:[#allocation4 + $0xec] ss:$16 sps:$4 sm:$0xff]   ;;  %v4735_v35 = vld [vmem:[#allocation4 + $0xe0] ss:$16 sps:$4 sm:$0xff]   ;;  %v4738_v6 = vld [vmem:[#allocation4 + $0xe8] ss:$16 sps:$4 sm:$0xff]  }
 0x441   :  { %3841 = vpow2.f32 %v3437_v11  ;;  %v1048_v8 = vld [vmem:[#allocation3 + $0x40] ss:$16 sps:$4 sm:$0xff]  }
 0x442   :  { %3843 = vpow2.f32 %v3438_v52  ;;  %v1052_v11 = vunpack.c.l.bf16 %v1048_v8 }
 0x443   :  { %3845 = vtanh.f32 %v1017_v61 }
 0x44a   :  { %v3840_v63 = vpop.eup %3839 }
 0x44b   :  { %v3842_v53 = vpop.eup %3841  ;;  %v1022_v3 = vadd.f32 1.0, %v3840_v63 }
 0x44c   :  { %v1028_v36 = vadd.f32 1.0, %v3842_v53  ;;  %v3844_v50 = vpop.eup %3843 }
 0x44d   :  { %3847 = vrcp.f32 %v1022_v3  ;;  %v3846_v45 = vpop.eup %3845  ;;  %v1035_v38 = vadd.f32 1.0, %v3844_v50 }
 0x44e   :  { %3849 = vrcp.f32 %v1028_v36 }
 0x44f   :  { %3851 = vrcp.f32 %v1035_v38  ;;  %v1054_v38 = vunpack.c.h.bf16 %v1048_v8 }
 0x457   :  { %v3848_v26 = vpop.eup %3847 }
 0x458   :  { %v3850_v37 = vpop.eup %3849  ;;  %v1039_v27 = vmul.f32 %v3848_v26, %v3846_v45 }
 0x459   :  { %v1038_v28 = vmul.f32 %v3850_v37, %v4608_v1  ;;  %v3852_v30 = vpop.eup %3851  ;;  %v4717_v1 = vld [vmem:[#allocation4 + $0xc4] ss:$16 sps:$4 sm:$0xff]   ;;  %v1055_v37 = vunpack.c.h.bf16 %v1049_v20 }
 0x45b   :  { %v4690_v39 = vadd.f32 %v1039_v27, %v1038_v28 }
 0x45d   :  { %3853 = vtanh.f32 %v4690_v39 }
 0x467   :  { %v3854_v40 = vpop.eup %3853 }
 0x468   :  { %v1042_v31 = vmul.f32 %v3854_v40, %v3852_v30 }
 0x46a   :  { %v1043_v41 = vpack.c.bf16 %v1042_v31, %v1042_v31 }
 0x46c   :  { %v1045_v32 = vrot.slane %v1043_v41, 4  ;;  %1089 = vmatmul.mubr.bf16.vlgmr.msra.gmra.mrb[32].mxu0 %v1043_v41  ;;  %1130 = vmatmul.mubr.bf16.vlgmr.msra.gmra.mrb[32].mxu1 %v1043_v41 }
 0x46d   :  { %1189 = vmatpush1.bf16.msra.mxu0 %v4611_v55  ;;  %1230 = vmatpush1.bf16.msra.mxu1 %v4614_v58 }
 0x46e   :  { %1047 = vst [vmem:[#allocation2 + $0x8] sm:$0xf0] %v1045_v32  ;;  %1190 = vmatprep.subr.bf16.mxu0 %v4617_v59  ;;  %1231 = vmatprep.subr.bf16.mxu1 %v4620_v62 }
 0x46f   :  { %1220 = vmatprep.mubr.bf16.mxu0 %v4186_v0  ;;  %1261 = vmatprep.mubr.bf16.mxu1 %v4186_v0 }
 0x471   :  { %1191 = vmatpush1.bf16.msra.mxu0 %v4625_v5  ;;  %1232 = vmatpush1.bf16.msra.mxu1 %v4628_v4 }
 0x472   :  { %1192 = vmatprep.subr.bf16.mxu0 %v4631_v57  ;;  %1233 = vmatprep.subr.bf16.mxu1 %v4634_v7 }
 0x475   :  { %1193 = vmatpush1.bf16.msra.mxu0 %v4637_v9  ;;  %1234 = vmatpush1.bf16.msra.mxu1 %v4640_v10 }
 0x476   :  { %1194 = vmatprep.subr.bf16.mxu0 %v4643_v54  ;;  %1235 = vmatprep.subr.bf16.mxu1 %v4646_v14 }
 0x479   :  { %1195 = vmatpush1.bf16.msra.mxu0 %v4649_v15  ;;  %1236 = vmatpush1.bf16.msra.mxu1 %v4652_v16 }
 0x47a   :  { %1196 = vmatprep.subr.bf16.mxu0 %v4655_v17  ;;  %1237 = vmatprep.subr.bf16.mxu1 %v4658_v18 }
 0x47d   :  { %1197 = vmatpush1.bf16.msra.mxu0 %v4661_v19  ;;  %1238 = vmatpush1.bf16.msra.mxu1 %v4664_v21 }
 0x47e   :  { %1198 = vmatprep.subr.bf16.mxu0 %v4667_v22  ;;  %1239 = vmatprep.subr.bf16.mxu1 %v4670_v23 }
 0x481   :  { %1199 = vmatpush1.bf16.msra.mxu0 %v4673_v24  ;;  %1240 = vmatpush1.bf16.msra.mxu1 %v4676_v25 }
 0x482   :  { %1200 = vmatprep.subr.bf16.mxu0 %v4717_v1  ;;  %1241 = vmatprep.subr.bf16.mxu1 %v4720_v42 }
 0x485   :  { %1201 = vmatpush1.bf16.msra.mxu0 %v4723_v33  ;;  %1242 = vmatpush1.bf16.msra.mxu1 %v4726_v43 }
 0x486   :  { %1202 = vmatprep.subr.bf16.mxu0 %v4729_v34  ;;  %1243 = vmatprep.subr.bf16.mxu1 %v4732_v44 }
 0x489   :  { %1203 = vmatpush1.bf16.msra.mxu0 %v4735_v35  ;;  %1244 = vmatpush1.bf16.msra.mxu1 %v4738_v6 }
 0x48a   :  { %1311 = vmatprep.subr.bf16.mxu0 %v4601_v12  ;;  %1352 = vmatprep.subr.bf16.mxu1 %v4604_v13 }
 0x53f   :  { %v1090_v60 = vpop.f32.mrb[32].mxu0  ;;  %v1131_v29 = vpop.f32.mrb[32].mxu1 }
 0x540   :  { %v1138_v2 = vadd.f32 %v1090_v60, %v1052_v11  ;;  %v1092_v52 = vpop.f32.mrb[33].mxu0  ;;  %v1133_v61 = vpop.f32.mrb[33].mxu1  ;;  %v1140_v30 = vadd.f32 %v1131_v29, %v1054_v38 }
 0x541   :  { %v1139_v63 = vadd.f32 %v1092_v52, %v1053_v56  ;;  %v1094_v53 = vpop.f32.mrb[34].mxu0  ;;  %v1135_v3 = vpop.f32.mrb[34].mxu1  ;;  %v1141_v27 = vadd.f32 %v1133_v61, %v1055_v37  ;;  %v1171_v37 = vld [vmem:[#allocation3 + $0x58] sm:$0xf0] }
 0x542   :  { %v3439_v36 = vmul.f32 -1.442695, %v1138_v2  ;;  %v1095_v50 = vpop.f32.mrb[35].mxu0  ;;  %v1136_v45 = vpop.f32.mrb[35].mxu1 }
 0x543   :  { %v3440_v26 = vmul.f32 -1.442695, %v1139_v63  ;;  %v3441_v28 = vmul.f32 -1.442695, %v1141_v27 }
 0x544   :  { %3855 = vpow2.f32 %v3439_v36  ;;  %v1169_v36 = vld [vmem:[#allocation3 + $0x48] sm:$0xf0] }
 0x545   :  { %3857 = vpow2.f32 %v3440_v26  ;;  %v1177_v45 = vrot.slane %v1169_v36, 4 }
 0x546   :  { %3859 = vpow2.f32 %v3441_v28 }
 0x547   :  { %3861 = vtanh.f32 %v1140_v30  ;;  %v1185_v28 = vunpack.c.l.bf16 %v1177_v45 }
 0x54e   :  { %v3856_v40 = vpop.eup %3855 }
 0x54f   :  { %v3858_v31 = vpop.eup %3857  ;;  %v1145_v41 = vadd.f32 1.0, %v3856_v40 }
 0x550   :  { %v1151_v32 = vadd.f32 1.0, %v3858_v31  ;;  %v3860_v11 = vpop.eup %3859 }
 0x551   :  { %3863 = vrcp.f32 %v1145_v41  ;;  %v3862_v60 = vpop.eup %3861  ;;  %v1158_v63 = vadd.f32 1.0, %v3860_v11 }
 0x552   :  { %3865 = vrcp.f32 %v1151_v32  ;;  %v1179_v32 = vrot.slane %v1171_v37, 4 }
 0x553   :  { %3867 = vrcp.f32 %v1158_v63 }
 0x554   :  { %v1187_v63 = vunpack.c.l.bf16 %v1179_v32 }
 0x55b   :  { %v3864_v56 = vpop.eup %3863 }
 0x55c   :  { %v3866_v2 = vpop.eup %3865  ;;  %v1162_v52 = vmul.f32 %v3864_v56, %v3862_v60 }
 0x55d   :  { %v1161_v20 = vmul.f32 %v3866_v2, %v4690_v39  ;;  %v3868_v8 = vpop.eup %3867  ;;  %v1168_v39 = vld [vmem:[#allocation3 + $0x40] sm:$0xf0] }
 0x55e   :  { %v1176_v50 = vrot.slane %v1168_v39, 4 }
 0x55f   :  { %v4744_v61 = vadd.f32 %v1162_v52, %v1161_v20 }
 0x560   :  { %v1184_v26 = vunpack.c.l.bf16 %v1176_v50 }
 0x561   :  { %3869 = vtanh.f32 %v4744_v61 }
 0x56b   :  { %v3870_v29 = vpop.eup %3869 }
 0x56c   :  { %v1165_v53 = vmul.f32 %v3870_v29, %v3868_v8 }
 0x56e   :  { %v1166_v3 = vpack.c.bf16 %v1165_v53, %v1165_v53 }
 0x570   :  { %1167 = vst [vmem:[#allocation2 + $0x10] sm:$0xf] %v1166_v3  ;;  %1221 = vmatmul.mubr.bf16.vlgmr.msra.gmra.mrb[36].mxu0 %v1166_v3  ;;  %1262 = vmatmul.mubr.bf16.vlgmr.msra.gmra.mrb[36].mxu1 %v1166_v3 }
 0x571   :  { %1312 = vmatpush1.bf16.msra.mxu0 %v4611_v55  ;;  %1353 = vmatpush1.bf16.msra.mxu1 %v4614_v58 }
 0x572   :  { %1313 = vmatprep.subr.bf16.mxu0 %v4617_v59  ;;  %1354 = vmatprep.subr.bf16.mxu1 %v4620_v62 }
 0x573   :  { %1343 = vmatprep.mubr.bf16.mxu0 %v4186_v0  ;;  %1384 = vmatprep.mubr.bf16.mxu1 %v4186_v0 }
 0x575   :  { %1314 = vmatpush1.bf16.msra.mxu0 %v4625_v5  ;;  %1355 = vmatpush1.bf16.msra.mxu1 %v4628_v4 }
 0x576   :  { %1315 = vmatprep.subr.bf16.mxu0 %v4631_v57  ;;  %1356 = vmatprep.subr.bf16.mxu1 %v4634_v7 }
 0x579   :  { %1316 = vmatpush1.bf16.msra.mxu0 %v4637_v9  ;;  %1357 = vmatpush1.bf16.msra.mxu1 %v4640_v10 }
 0x57a   :  { %1317 = vmatprep.subr.bf16.mxu0 %v4643_v54  ;;  %1358 = vmatprep.subr.bf16.mxu1 %v4646_v14 }
 0x57d   :  { %1318 = vmatpush1.bf16.msra.mxu0 %v4649_v15  ;;  %1359 = vmatpush1.bf16.msra.mxu1 %v4652_v16 }
 0x57e   :  { %1319 = vmatprep.subr.bf16.mxu0 %v4655_v17  ;;  %1360 = vmatprep.subr.bf16.mxu1 %v4658_v18 }
 0x581   :  { %1320 = vmatpush1.bf16.msra.mxu0 %v4661_v19  ;;  %1361 = vmatpush1.bf16.msra.mxu1 %v4664_v21 }
 0x582   :  { %1321 = vmatprep.subr.bf16.mxu0 %v4667_v22  ;;  %1362 = vmatprep.subr.bf16.mxu1 %v4670_v23 }
 0x585   :  { %1322 = vmatpush1.bf16.msra.mxu0 %v4673_v24  ;;  %1363 = vmatpush1.bf16.msra.mxu1 %v4676_v25 }
 0x586   :  { %1323 = vmatprep.subr.bf16.mxu0 %v4717_v1  ;;  %1364 = vmatprep.subr.bf16.mxu1 %v4720_v42 }
 0x589   :  { %1324 = vmatpush1.bf16.msra.mxu0 %v4723_v33  ;;  %1365 = vmatpush1.bf16.msra.mxu1 %v4726_v43 }
 0x58a   :  { %1325 = vmatprep.subr.bf16.mxu0 %v4729_v34  ;;  %1366 = vmatprep.subr.bf16.mxu1 %v4732_v44 }
 0x58d   :  { %1326 = vmatpush1.bf16.msra.mxu0 %v4735_v35  ;;  %1367 = vmatpush1.bf16.msra.mxu1 %v4738_v6 }
 0x58e   :  { %1443 = vmatprep.subr.bf16.mxu0 %v4601_v12  ;;  %1484 = vmatprep.subr.bf16.mxu1 %v4604_v13  ;;  %v1170_v13 = vld [vmem:[#allocation3 + $0x50] sm:$0xf0] }
 0x58f   :  { %v1178_v20 = vrot.slane %v1170_v13, 4 }
 0x591   :  { %v1186_v29 = vunpack.c.l.bf16 %v1178_v20 }
 0x643   :  { %v1222_v27 = vpop.f32.mrb[36].mxu0  ;;  %v1263_v38 = vpop.f32.mrb[36].mxu1 }
 0x644   :  { %v1270_v30 = vadd.f32 %v1222_v27, %v1184_v26  ;;  %v1224_v40 = vpop.f32.mrb[37].mxu0  ;;  %v1265_v31 = vpop.f32.mrb[37].mxu1  ;;  %v1272_v3 = vadd.f32 %v1263_v38, %v1186_v29  ;;  %v3679_v29 = vld [vmem:[#allocation6] ss:$16 sps:$4 sm:$0xff]  }
 0x645   :  { %v1271_v41 = vadd.f32 %v1224_v40, %v1185_v28  ;;  %v1226_v11 = vpop.f32.mrb[38].mxu0  ;;  %v1267_v60 = vpop.f32.mrb[38].mxu1  ;;  %v1273_v8 = vadd.f32 %v1265_v31, %v1187_v63 }
 0x646   :  { %v3442_v56 = vmul.f32 -1.442695, %v1270_v30  ;;  %v1227_v12 = vpop.f32.mrb[39].mxu0  ;;  %v1268_v2 = vpop.f32.mrb[39].mxu1 }
 0x647   :  { %v3443_v52 = vmul.f32 -1.442695, %v1271_v41  ;;  %v3444_v53 = vmul.f32 -1.442695, %v1273_v8 }
 0x648   :  { %3871 = vpow2.f32 %v3442_v56 }
 0x649   :  { %3873 = vpow2.f32 %v3443_v52 }
 0x64a   :  { %3875 = vpow2.f32 %v3444_v53  ;;  %v3682_v53 = vld [vmem:[#allocation6 + $0x8] ss:$16 sps:$4 sm:$0xff]  }
 0x64b   :  { %3877 = vtanh.f32 %v1272_v3 }
 0x652   :  { %v3872_v39 = vpop.eup %3871 }
 0x653   :  { %v3874_v36 = vpop.eup %3873  ;;  %v1277_v50 = vadd.f32 1.0, %v3872_v39  ;;  %v3687_v39 = vld [vmem:[#allocation6 + $0x24] ss:$16 sps:$4 sm:$0xff]  }
 0x654   :  { %v1283_v45 = vadd.f32 1.0, %v3874_v36  ;;  %v3876_v26 = vpop.eup %3875  ;;  %v3690_v36 = vld [vmem:[#allocation6 + $0x2c] ss:$16 sps:$4 sm:$0xff]  }
 0x655   :  { %3879 = vrcp.f32 %v1277_v50  ;;  %v3878_v37 = vpop.eup %3877  ;;  %v1290_v40 = vadd.f32 1.0, %v3876_v26  ;;  %v3685_v50 = vld [vmem:[#allocation6 + $0x20] ss:$16 sps:$4 sm:$0xff]   ;;  %v3693_v26 = vld [vmem:[#allocation6 + $0x44] ss:$16 sps:$4 sm:$0xff]  }
 0x656   :  { %3881 = vrcp.f32 %v1283_v45  ;;  %v3688_v45 = vld [vmem:[#allocation6 + $0x28] ss:$16 sps:$4 sm:$0xff]  }
 0x657   :  { %3883 = vrcp.f32 %v1290_v40  ;;  %v3702_v40 = vld [vmem:[#allocation6 + $0x6c] ss:$16 sps:$4 sm:$0xff]  }
 0x65f   :  { %v3880_v27 = vpop.eup %3879 }
 0x660   :  { %v3882_v28 = vpop.eup %3881  ;;  %v1294_v30 = vmul.f32 %v3880_v27, %v3878_v37  ;;  %v3696_v37 = vld [vmem:[#allocation6 + $0x4c] ss:$16 sps:$4 sm:$0xff]   ;;  %v3691_v27 = vld [vmem:[#allocation6 + $0x40] ss:$16 sps:$4 sm:$0xff]  }
 0x661   :  { %v1293_v41 = vmul.f32 %v3882_v28, %v4744_v61  ;;  %v3884_v38 = vpop.eup %3883  ;;  %v3694_v28 = vld [vmem:[#allocation6 + $0x48] ss:$16 sps:$4 sm:$0xff]  }
 0x663   :  { %v4782_v31 = vadd.f32 %v1294_v30, %v1293_v41  ;;  %v3699_v30 = vld [vmem:[#allocation6 + $0x64] ss:$16 sps:$4 sm:$0xff]   ;;  %v3697_v41 = vld [vmem:[#allocation6 + $0x60] ss:$16 sps:$4 sm:$0xff]  }
 0x665   :  { %3885 = vtanh.f32 %v4782_v31 }
 0x66f   :  { %v3886_v32 = vpop.eup %3885 }
 0x670   :  { %v1297_v11 = vmul.f32 %v3886_v32, %v3884_v38  ;;  %v3705_v38 = vld [vmem:[#allocation6 + $0x84] ss:$16 sps:$4 sm:$0xff]   ;;  %v3708_v32 = vld [vmem:[#allocation6 + $0x8c] ss:$16 sps:$4 sm:$0xff]  }
 0x672   :  { %v1298_v60 = vpack.c.bf16 %v1297_v11, %v1297_v11  ;;  %v3703_v11 = vld [vmem:[#allocation6 + $0x80] ss:$16 sps:$4 sm:$0xff]  }
 0x674   :  { %v1300_v56 = vrot.slane %v1298_v60, 4  ;;  %1344 = vmatmul.mubr.bf16.vlgmr.msra.gmra.mrb[40].mxu0 %v1298_v60  ;;  %1385 = vmatmul.mubr.bf16.vlgmr.msra.gmra.mrb[40].mxu1 %v1298_v60  ;;  %v3706_v60 = vld [vmem:[#allocation6 + $0x88] ss:$16 sps:$4 sm:$0xff]  }
 0x675   :  { %1444 = vmatpush1.bf16.msra.mxu0 %v4611_v55  ;;  %1485 = vmatpush1.bf16.msra.mxu1 %v4614_v58  ;;  %v3681_v55 = vld [vmem:[#allocation6 + $0x4] ss:$16 sps:$4 sm:$0xff]   ;;  %v3684_v58 = vld [vmem:[#allocation6 + $0xc] ss:$16 sps:$4 sm:$0xff]  }
 0x676   :  { %1302 = vst [vmem:[#allocation2 + $0x10] sm:$0xf0] %v1300_v56  ;;  %1445 = vmatprep.subr.bf16.mxu0 %v4617_v59  ;;  %1486 = vmatprep.subr.bf16.mxu1 %v4620_v62  ;;  %v1303_v59 = vld [vmem:[#allocation3 + $0x60] ss:$16 sps:$4 sm:$0xff]   ;;  %v1304_v62 = vld [vmem:[#allocation3 + $0x68] ss:$16 sps:$4 sm:$0xff]  }
 0x677   :  { %1475 = vmatprep.mubr.bf16.mxu0 %v4186_v0  ;;  %1516 = vmatprep.mubr.bf16.mxu1 %v4186_v0  ;;  %v3711_v56 = vld [vmem:[#allocation6 + $0xa4] ss:$16 sps:$4 sm:$0xff]  }
 0x679   :  { %1446 = vmatpush1.bf16.msra.mxu0 %v4625_v5  ;;  %1487 = vmatpush1.bf16.msra.mxu1 %v4628_v4  ;;  %v1307_v5 = vunpack.c.l.bf16 %v1303_v59 }
 0x67a   :  { %1447 = vmatprep.subr.bf16.mxu0 %v4631_v57  ;;  %1488 = vmatprep.subr.bf16.mxu1 %v4634_v7  ;;  %v1308_v7 = vunpack.c.l.bf16 %v1304_v62 }
 0x67d   :  { %1448 = vmatpush1.bf16.msra.mxu0 %v4637_v9  ;;  %1489 = vmatpush1.bf16.msra.mxu1 %v4640_v10 }
 0x67e   :  { %1449 = vmatprep.subr.bf16.mxu0 %v4643_v54  ;;  %1490 = vmatprep.subr.bf16.mxu1 %v4646_v14 }
 0x681   :  { %1450 = vmatpush1.bf16.msra.mxu0 %v4649_v15  ;;  %1491 = vmatpush1.bf16.msra.mxu1 %v4652_v16 }
 0x682   :  { %1451 = vmatprep.subr.bf16.mxu0 %v4655_v17  ;;  %1492 = vmatprep.subr.bf16.mxu1 %v4658_v18 }
 0x685   :  { %1452 = vmatpush1.bf16.msra.mxu0 %v4661_v19  ;;  %1493 = vmatpush1.bf16.msra.mxu1 %v4664_v21 }
 0x686   :  { %1453 = vmatprep.subr.bf16.mxu0 %v4667_v22  ;;  %1494 = vmatprep.subr.bf16.mxu1 %v4670_v23  ;;  %v1310_v22 = vunpack.c.h.bf16 %v1304_v62  ;;  %v3717_v62 = vld [vmem:[#allocation6 + $0xc4] ss:$16 sps:$4 sm:$0xff]  }
 0x689   :  { %1454 = vmatpush1.bf16.msra.mxu0 %v4673_v24  ;;  %1495 = vmatpush1.bf16.msra.mxu1 %v4676_v25  ;;  %v1309_v24 = vunpack.c.h.bf16 %v1303_v59  ;;  %v3712_v59 = vld [vmem:[#allocation6 + $0xa8] ss:$16 sps:$4 sm:$0xff]  }
 0x68a   :  { %1455 = vmatprep.subr.bf16.mxu0 %v4717_v1  ;;  %1496 = vmatprep.subr.bf16.mxu1 %v4720_v42 }
 0x68d   :  { %1456 = vmatpush1.bf16.msra.mxu0 %v4723_v33  ;;  %1497 = vmatpush1.bf16.msra.mxu1 %v4726_v43 }
 0x68e   :  { %1457 = vmatprep.subr.bf16.mxu0 %v4729_v34  ;;  %1498 = vmatprep.subr.bf16.mxu1 %v4732_v44 }
 0x691   :  { %1458 = vmatpush1.bf16.msra.mxu0 %v4735_v35  ;;  %1499 = vmatpush1.bf16.msra.mxu1 %v4738_v6 }
 0x692   :  { %1776 = vmatprep.subr.bf16.mxu0 %v3681_v55  ;;  %1849 = vmatprep.subr.bf16.mxu1 %v3684_v58  ;;  %v3714_v55 = vld [vmem:[#allocation6 + $0xac] ss:$16 sps:$4 sm:$0xff]   ;;  %v3709_v58 = vld [vmem:[#allocation6 + $0xa0] ss:$16 sps:$4 sm:$0xff]  }
 0x747   :  { %v1345_v4 = vpop.f32.mrb[40].mxu0  ;;  %v1386_v57 = vpop.f32.mrb[40].mxu1 }
 0x748   :  { %v1393_v9 = vadd.f32 %v1345_v4, %v1307_v5  ;;  %v1347_v10 = vpop.f32.mrb[41].mxu0  ;;  %v1388_v54 = vpop.f32.mrb[41].mxu1  ;;  %v1395_v1 = vadd.f32 %v1386_v57, %v1309_v24  ;;  %v3720_v5 = vld [vmem:[#allocation6 + $0xcc] ss:$16 sps:$4 sm:$0xff]   ;;  %v3715_v4 = vld [vmem:[#allocation6 + $0xc0] ss:$16 sps:$4 sm:$0xff]  }
 0x749   :  { %v1394_v14 = vadd.f32 %v1347_v10, %v1308_v7  ;;  %v1349_v15 = vpop.f32.mrb[42].mxu0  ;;  %v1390_v16 = vpop.f32.mrb[42].mxu1  ;;  %v1396_v23 = vadd.f32 %v1388_v54, %v1310_v22  ;;  %v3718_v57 = vld [vmem:[#allocation6 + $0xc8] ss:$16 sps:$4 sm:$0xff]   ;;  %v3723_v7 = vld [vmem:[#allocation6 + $0xe4] ss:$16 sps:$4 sm:$0xff]  }
 0x74a   :  { %v3445_v17 = vmul.f32 -1.442695, %v1393_v9  ;;  %v1350_v18 = vpop.f32.mrb[43].mxu0  ;;  %v1391_v19 = vpop.f32.mrb[43].mxu1  ;;  %v3726_v9 = vld [vmem:[#allocation6 + $0xec] ss:$16 sps:$4 sm:$0xff]  }
 0x74b   :  { %v3446_v21 = vmul.f32 -1.442695, %v1394_v14  ;;  %v3447_v25 = vmul.f32 -1.442695, %v1396_v23  ;;  %v3721_v10 = vld [vmem:[#allocation6 + $0xe0] ss:$16 sps:$4 sm:$0xff]  }
 0x74c   :  { %3887 = vpow2.f32 %v3445_v17  ;;  %v3724_v54 = vld [vmem:[#allocation6 + $0xe8] ss:$16 sps:$4 sm:$0xff]   ;;  %v1558_v14 = vld [vmem:[#allocation2] sm:$0xff]  ;;  %v1560_v16 = vld [vmem:[#allocation2 + $0x10] sm:$0xff] }
 0x74d   :  { %3889 = vpow2.f32 %v3446_v21  ;;  %v1559_v15 = vld [vmem:[#allocation2 + $0x8] sm:$0xff]  ;;  %v4829_v17 = vld [vmem:[#allocation8 + $0x4] ss:$16 sps:$4 sm:$0xff]   ;;  %v4833_v19 = vld [vmem:[#allocation8] ss:$16 sps:$4 sm:$0xff]  }
 0x74e   :  { %3891 = vpow2.f32 %v3447_v25  ;;  %v4831_v18 = vld [vmem:[#allocation8 + $0xc] ss:$16 sps:$4 sm:$0xff]   ;;  %v4835_v21 = vld [vmem:[#allocation8 + $0x8] ss:$16 sps:$4 sm:$0xff]   ;;  %v4841_v22 = vld [vmem:[#allocation8 + $0x24] ss:$16 sps:$4 sm:$0xff]  }
 0x74f   :  { %3893 = vtanh.f32 %v1395_v1  ;;  %v4843_v23 = vld [vmem:[#allocation8 + $0x2c] ss:$16 sps:$4 sm:$0xff]   ;;  %v4845_v24 = vld [vmem:[#allocation8 + $0x20] ss:$16 sps:$4 sm:$0xff]   ;;  %v4847_v25 = vld [vmem:[#allocation8 + $0x28] ss:$16 sps:$4 sm:$0xff]  }
 0x750   :  { %v4853_v1 = vld [vmem:[#allocation8 + $0x44] ss:$16 sps:$4 sm:$0xff]  }
 0x756   :  { %v3888_v42 = vpop.eup %3887 }
 0x757   :  { %v3890_v33 = vpop.eup %3889  ;;  %v1400_v43 = vadd.f32 1.0, %v3888_v42  ;;  %v4855_v42 = vld [vmem:[#allocation8 + $0x4c] ss:$16 sps:$4 sm:$0xff]  }
 0x758   :  { %v1406_v34 = vadd.f32 1.0, %v3890_v33  ;;  %v3892_v44 = vpop.eup %3891  ;;  %v4857_v33 = vld [vmem:[#allocation8 + $0x40] ss:$16 sps:$4 sm:$0xff]  }
 0x759   :  { %3895 = vrcp.f32 %v1400_v43  ;;  %v3894_v35 = vpop.eup %3893  ;;  %v1413_v2 = vadd.f32 1.0, %v3892_v44  ;;  %v4859_v43 = vld [vmem:[#allocation8 + $0x48] ss:$16 sps:$4 sm:$0xff]   ;;  %v4867_v44 = vld [vmem:[#allocation8 + $0x6c] ss:$16 sps:$4 sm:$0xff]  }
 0x75a   :  { %3897 = vrcp.f32 %v1406_v34  ;;  %v4865_v34 = vld [vmem:[#allocation8 + $0x64] ss:$16 sps:$4 sm:$0xff]  }
 0x75b   :  { %3899 = vrcp.f32 %v1413_v2  ;;  %v4881_v2 = vld [vmem:[#allocation8 + $0x80] ss:$16 sps:$4 sm:$0xff]  }
 0x763   :  { %v3896_v6 = vpop.eup %3895 }
 0x764   :  { %v3898_v61 = vpop.eup %3897  ;;  %v1417_v12 = vmul.f32 %v3896_v6, %v3894_v35  ;;  %v4869_v35 = vld [vmem:[#allocation8 + $0x60] ss:$16 sps:$4 sm:$0xff]   ;;  %v4871_v6 = vld [vmem:[#allocation8 + $0x68] ss:$16 sps:$4 sm:$0xff]  }
 0x765   :  { %v1416_v13 = vmul.f32 %v3898_v61, %v4782_v31  ;;  %v3900_v63 = vpop.eup %3899  ;;  %v3700_v31 = vld [vmem:[#allocation6 + $0x68] ss:$16 sps:$4 sm:$0xff]   ;;  %v4877_v61 = vld [vmem:[#allocation8 + $0x84] ss:$16 sps:$4 sm:$0xff]  }
 0x767   :  { %v4818_v52 = vadd.f32 %v1417_v12, %v1416_v13  ;;  %v4879_v12 = vld [vmem:[#allocation8 + $0x8c] ss:$16 sps:$4 sm:$0xff]   ;;  %v4883_v13 = vld [vmem:[#allocation8 + $0x88] ss:$16 sps:$4 sm:$0xff]  }
 0x769   :  { %3901 = vtanh.f32 %v4818_v52 }
 0x773   :  { %v3902_v20 = vpop.eup %3901 }
 0x774   :  { %v1420_v8 = vmul.f32 %v3902_v20, %v3900_v63  ;;  %v4889_v63 = vld [vmem:[#allocation8 + $0xa4] ss:$16 sps:$4 sm:$0xff]   ;;  %v4891_v20 = vld [vmem:[#allocation8 + $0xac] ss:$16 sps:$4 sm:$0xff]  }
 0x776   :  { %v1421_v3 = vpack.c.bf16 %v1420_v8, %v1420_v8  ;;  %v4893_v8 = vld [vmem:[#allocation8 + $0xa0] ss:$16 sps:$4 sm:$0xff]  }
 0x778   :  { %1422 = vst [vmem:[#allocation2 + $0x18] sm:$0xf] %v1421_v3  ;;  %1476 = vmatmul.mubr.bf16.vlgmr.msra.gmra.mrb[44].mxu0 %v1421_v3  ;;  %1517 = vmatmul.mubr.bf16.vlgmr.msra.gmra.mrb[44].mxu1 %v1421_v3  ;;  %v4903_v3 = vld [vmem:[#allocation8 + $0xcc] ss:$16 sps:$4 sm:$0xff]  }
 0x779   :  { %1777 = vmatpush1.bf16.msra.mxu0 %v3679_v29  ;;  %1850 = vmatpush1.bf16.msra.mxu1 %v3682_v53  ;;  %v4895_v29 = vld [vmem:[#allocation8 + $0xa8] ss:$16 sps:$4 sm:$0xff]   ;;  %v4901_v53 = vld [vmem:[#allocation8 + $0xc4] ss:$16 sps:$4 sm:$0xff]  }
 0x77a   :  { %1778 = vmatprep.subr.bf16.mxu0 %v3687_v39  ;;  %1851 = vmatprep.subr.bf16.mxu1 %v3690_v36  ;;  %v4905_v39 = vld [vmem:[#allocation8 + $0xc0] ss:$16 sps:$4 sm:$0xff]   ;;  %v4907_v36 = vld [vmem:[#allocation8 + $0xc8] ss:$16 sps:$4 sm:$0xff]  }
 0x77b   :  { %1808 = vmatprep.mubr.bf16.mxu0 %v4186_v0  ;;  %1881 = vmatprep.mubr.bf16.mxu1 %v4186_v0 }
 0x77d   :  { %1779 = vmatpush1.bf16.msra.mxu0 %v3685_v50  ;;  %1852 = vmatpush1.bf16.msra.mxu1 %v3688_v45  ;;  %v4909_v50 = vld [vmem:[#allocation8 + $0xe4] ss:$16 sps:$4 sm:$0xff]   ;;  %v4913_v45 = vld [vmem:[#allocation8 + $0xec] ss:$16 sps:$4 sm:$0xff]  }
 0x77e   :  { %1780 = vmatprep.subr.bf16.mxu0 %v3693_v26  ;;  %1853 = vmatprep.subr.bf16.mxu1 %v3696_v37  ;;  %v4917_v26 = vld [vmem:[#allocation8 + $0xe0] ss:$16 sps:$4 sm:$0xff]   ;;  %v4919_v37 = vld [vmem:[#allocation8 + $0xe8] ss:$16 sps:$4 sm:$0xff]  }
 0x781   :  { %1781 = vmatpush1.bf16.msra.mxu0 %v3691_v27  ;;  %1854 = vmatpush1.bf16.msra.mxu1 %v3694_v28  ;;  %v1423_v27 = vld [vmem:[#allocation3 + $0x60] sm:$0xf0]  ;;  %v1424_v28 = vld [vmem:[#allocation3 + $0x68] sm:$0xf0] }
 0x782   :  { %1782 = vmatprep.subr.bf16.mxu0 %v3699_v30  ;;  %1855 = vmatprep.subr.bf16.mxu1 %v3702_v40  ;;  %v1431_v30 = vrot.slane %v1423_v27, 4  ;;  %v1432_v40 = vrot.slane %v1424_v28, 4 }
 0x785   :  { %1783 = vmatpush1.bf16.msra.mxu0 %v3697_v41  ;;  %1856 = vmatpush1.bf16.msra.mxu1 %v3700_v31  ;;  %v1439_v41 = vunpack.c.l.bf16 %v1431_v30  ;;  %v1426_v31 = vld [vmem:[#allocation3 + $0x78] sm:$0xf0] }
 0x786   :  { %1784 = vmatprep.subr.bf16.mxu0 %v3705_v38  ;;  %1857 = vmatprep.subr.bf16.mxu1 %v3708_v32 }
 0x789   :  { %1785 = vmatpush1.bf16.msra.mxu0 %v3703_v11  ;;  %1858 = vmatpush1.bf16.msra.mxu1 %v3706_v60  ;;  %v1440_v11 = vunpack.c.l.bf16 %v1432_v40 }
 0x78a   :  { %1786 = vmatprep.subr.bf16.mxu0 %v3711_v56  ;;  %1859 = vmatprep.subr.bf16.mxu1 %v3714_v55 }
 0x78d   :  { %1787 = vmatpush1.bf16.msra.mxu0 %v3709_v58  ;;  %1860 = vmatpush1.bf16.msra.mxu1 %v3712_v59  ;;  %v1434_v59 = vrot.slane %v1426_v31, 4 }
 0x78e   :  { %1788 = vmatprep.subr.bf16.mxu0 %v3717_v62  ;;  %1861 = vmatprep.subr.bf16.mxu1 %v3720_v5 }
 0x791   :  { %1789 = vmatpush1.bf16.msra.mxu0 %v3715_v4  ;;  %1862 = vmatpush1.bf16.msra.mxu1 %v3718_v57 }
 0x792   :  { %1790 = vmatprep.subr.bf16.mxu0 %v3723_v7  ;;  %1863 = vmatprep.subr.bf16.mxu1 %v3726_v9  ;;  %v1425_v9 = vld [vmem:[#allocation3 + $0x70] sm:$0xf0] }
 0x795   :  { %1791 = vmatpush1.bf16.msra.mxu0 %v3721_v10  ;;  %1864 = vmatpush1.bf16.msra.mxu1 %v3724_v54  ;;  %v1442_v54 = vunpack.c.l.bf16 %v1434_v59 }
 0x796   :  { %2154 = vmatprep.subr.bf16.mxu0 %v4829_v17  ;;  %2195 = vmatprep.subr.bf16.mxu1 %v4831_v18 }
 0x798   :  { %1809 = vmatmul.mubr.bf16.vlgmr.msra.gmra.mrb[48].mxu0 %v1558_v14  ;;  %1882 = vmatmul.mubr.bf16.vlgmr.msra.gmra.mrb[48].mxu1 %v1558_v14  ;;  %v1433_v14 = vrot.slane %v1425_v9, 4 }
 0x799   :  { %1818 = vmatprep.mubr.bf16.mxu0 %v4186_v0  ;;  %1891 = vmatprep.mubr.bf16.mxu1 %v4186_v0 }
 0x79a   :  { %2155 = vmatpush1.bf16.msra.mxu0 %v4833_v19  ;;  %2196 = vmatpush1.bf16.msra.mxu1 %v4835_v21 }
 0x79b   :  { %2156 = vmatprep.subr.bf16.mxu0 %v4841_v22  ;;  %2197 = vmatprep.subr.bf16.mxu1 %v4843_v23 }
 0x79e   :  { %2157 = vmatpush1.bf16.msra.mxu0 %v4845_v24  ;;  %2198 = vmatpush1.bf16.msra.mxu1 %v4847_v25 }
 0x79f   :  { %2158 = vmatprep.subr.bf16.mxu0 %v4853_v1  ;;  %2199 = vmatprep.subr.bf16.mxu1 %v4855_v42 }
 0x7a0   :  { %1819 = vmatmul.mubr.bf16.gmra.mrb[52].mxu0 %v1559_v15  ;;  %1892 = vmatmul.mubr.bf16.gmra.mrb[52].mxu1 %v1559_v15 }
 0x7a1   :  { %1828 = vmatprep.mubr.bf16.mxu0 %v4186_v0  ;;  %1901 = vmatprep.mubr.bf16.mxu1 %v4186_v0 }
 0x7a2   :  { %2159 = vmatpush1.bf16.msra.mxu0 %v4857_v33  ;;  %2200 = vmatpush1.bf16.msra.mxu1 %v4859_v43 }
 0x7a3   :  { %2160 = vmatprep.subr.bf16.mxu0 %v4865_v34  ;;  %2201 = vmatprep.subr.bf16.mxu1 %v4867_v44 }
 0x7a6   :  { %2161 = vmatpush1.bf16.msra.mxu0 %v4869_v35  ;;  %2202 = vmatpush1.bf16.msra.mxu1 %v4871_v6 }
 0x7a7   :  { %2162 = vmatprep.subr.bf16.mxu0 %v4877_v61  ;;  %2203 = vmatprep.subr.bf16.mxu1 %v4879_v12 }
 0x7a8   :  { %1829 = vmatmul.mubr.bf16.gmra.mrb[56].mxu0 %v1560_v16  ;;  %1902 = vmatmul.mubr.bf16.gmra.mrb[56].mxu1 %v1560_v16  ;;  %v1441_v16 = vunpack.c.l.bf16 %v1433_v14 }
 0x7a9   :  { %1838 = vmatprep.mubr.bf16.mxu0 %v4186_v0  ;;  %1911 = vmatprep.mubr.bf16.mxu1 %v4186_v0 }
 0x7aa   :  { %2163 = vmatpush1.bf16.msra.mxu0 %v4881_v2  ;;  %2204 = vmatpush1.bf16.msra.mxu1 %v4883_v13 }
 0x7ab   :  { %2164 = vmatprep.subr.bf16.mxu0 %v4889_v63  ;;  %2205 = vmatprep.subr.bf16.mxu1 %v4891_v20 }
 0x7ae   :  { %2165 = vmatpush1.bf16.msra.mxu0 %v4893_v8  ;;  %2206 = vmatpush1.bf16.msra.mxu1 %v4895_v29 }
 0x7af   :  { %2166 = vmatprep.subr.bf16.mxu0 %v4901_v53  ;;  %2207 = vmatprep.subr.bf16.mxu1 %v4903_v3 }
 0x7b2   :  { %2167 = vmatpush1.bf16.msra.mxu0 %v4905_v39  ;;  %2208 = vmatpush1.bf16.msra.mxu1 %v4907_v36 }
 0x7b3   :  { %2168 = vmatprep.subr.bf16.mxu0 %v4909_v50  ;;  %2209 = vmatprep.subr.bf16.mxu1 %v4913_v45 }
 0x7b6   :  { %2169 = vmatpush1.bf16.msra.mxu0 %v4917_v26  ;;  %2210 = vmatpush1.bf16.msra.mxu1 %v4919_v37 }
 0x7b7   :  { %2285 = vmatprep.subr.bf16.mxu0 %v4829_v17  ;;  %2326 = vmatprep.subr.bf16.mxu1 %v4831_v18 }
 0x84b   :  { %v1477_v38 = vpop.f32.mrb[44].mxu0  ;;  %v1518_v32 = vpop.f32.mrb[44].mxu1 }
 0x84c   :  { %v1525_v60 = vadd.f32 %v1477_v38, %v1439_v41  ;;  %v1479_v56 = vpop.f32.mrb[45].mxu0  ;;  %v1520_v55 = vpop.f32.mrb[45].mxu1  ;;  %v1527_v28 = vadd.f32 %v1518_v32, %v1441_v16 }
 0x84d   :  { %v1526_v58 = vadd.f32 %v1479_v56, %v1440_v11  ;;  %v1481_v62 = vpop.f32.mrb[46].mxu0  ;;  %v1522_v5 = vpop.f32.mrb[46].mxu1  ;;  %v1528_v15 = vadd.f32 %v1520_v55, %v1442_v54  ;;  %v1594_v56 = vld [vmem:[%s5374_s6] sm:$0xf] }
 0x84e   :  { %v3448_v4 = vmul.f32 -1.442695, %v1525_v60  ;;  %v1482_v57 = vpop.f32.mrb[47].mxu0  ;;  %v1523_v7 = vpop.f32.mrb[47].mxu1  ;;  %v4933_v62 = vrot.slane %v1594_v56, %v94_v49  ;;  %v4937_v5 = vrot.slane %v1594_v56, %v102_v47  ;;  %v4941_v9 = vrot.slane %v1594_v56, %v98_v51 }
 0x84f   :  { %v3449_v10 = vmul.f32 -1.442695, %v1526_v58  ;;  %v3450_v27 = vmul.f32 -1.442695, %v1528_v15 }
 0x850   :  { %3903 = vpow2.f32 %v3448_v4 }
 0x851   :  { %3905 = vpow2.f32 %v3449_v10  ;;  %v4945_v10 = vrot.slane %v1594_v56, %v106_v48 }
 0x852   :  { %3907 = vpow2.f32 %v3450_v27 }
 0x853   :  { %3909 = vtanh.f32 %v1527_v28 }
 0x85a   :  { %v3904_v30 = vpop.eup %3903 }
 0x85b   :  { %v3906_v40 = vpop.eup %3905  ;;  %v1532_v41 = vadd.f32 1.0, %v3904_v30 }
 0x85c   :  { %v1538_v31 = vadd.f32 1.0, %v3906_v40  ;;  %v3908_v38 = vpop.eup %3907 }
 0x85d   :  { %3911 = vrcp.f32 %v1532_v41  ;;  %v3910_v11 = vpop.eup %3909  ;;  %v1545_v59 = vadd.f32 1.0, %v3908_v38 }
 0x85e   :  { %3913 = vrcp.f32 %v1538_v31 }
 0x85f   :  { %3915 = vrcp.f32 %v1545_v59 }
 0x867   :  { %v3912_v60 = vpop.eup %3911 }
 0x868   :  { %v3914_v58 = vpop.eup %3913  ;;  %v1549_v55 = vmul.f32 %v3912_v60, %v3910_v11 }
 0x869   :  { %v1548_v32 = vmul.f32 %v3914_v58, %v4818_v52 }
 0x86b   :  { %v1550_v4 = vadd.f32 %v1549_v55, %v1548_v32  ;;  %v1810_v57 = vpop.f32.mrb[48].mxu0  ;;  %v1883_v7 = vpop.f32.mrb[48].mxu1 }
 0x86c   :  { %v1812_v52 = vpop.f32.mrb[49].mxu0  ;;  %v1885_v54 = vpop.f32.mrb[49].mxu1  ;;  %v1811_v47 = vadd.f32 %v1810_v57, %v4933_v62  ;;  %v1884_v15 = vadd.f32 %v1883_v7, %v4937_v5 }
 0x86d   :  { %3917 = vtanh.f32 %v1550_v4  ;;  %v1814_v49 = vpop.f32.mrb[50].mxu0  ;;  %v1887_v14 = vpop.f32.mrb[50].mxu1  ;;  %v1813_v46 = vadd.f32 %v1812_v52, %v4941_v9  ;;  %v1886_v48 = vadd.f32 %v1885_v54, %v4945_v10 }
 0x86e   :  { %v1815_v16 = vadd.f32 %v1814_v49, %v4933_v62  ;;  %v1888_v27 = vadd.f32 %v1887_v14, %v4937_v5  ;;  %v1816_v51 = vpop.f32.mrb[51].mxu0  ;;  %v1889_v28 = vpop.f32.mrb[51].mxu1 }
 0x86f   :  { %v1817_v30 = vadd.f32 %v1816_v51, %v4941_v9  ;;  %v1890_v40 = vadd.f32 %v1889_v28, %v4945_v10  ;;  %v3916_v4 = vpop.eup %3915 }
 0x870   :  { %v1922_v41 = vpack.c.bf16 %v1815_v16, %v1811_v47  ;;  %v1924_v31 = vpack.c.bf16 %v1888_v27, %v1884_v15 }
 0x871   :  { %v1923_v38 = vpack.c.bf16 %v1817_v30, %v1813_v46  ;;  %v1925_v11 = vpack.c.bf16 %v1890_v40, %v1886_v48 }
 0x872   :  { %1938 = vst [vmem:[#allocation3] sm:$0xff] %v1922_v41  ;;  %1940 = vst [vmem:[#allocation3 + $0x10] sm:$0xff] %v1924_v31 }
 0x873   :  { %1939 = vst [vmem:[#allocation3 + $0x8] sm:$0xff] %v1923_v38  ;;  %1941 = vst [vmem:[#allocation3 + $0x18] sm:$0xff] %v1925_v11  ;;  %v1820_v60 = vpop.f32.mrb[52].mxu0  ;;  %v1893_v56 = vpop.f32.mrb[52].mxu1 }
 0x874   :  { %v1822_v58 = vpop.f32.mrb[53].mxu0  ;;  %v1895_v55 = vpop.f32.mrb[53].mxu1  ;;  %v1821_v57 = vadd.f32 %v1820_v60, %v4933_v62  ;;  %v1894_v7 = vadd.f32 %v1893_v56, %v4937_v5 }
 0x875   :  { %v1824_v59 = vpop.f32.mrb[54].mxu0  ;;  %v1897_v32 = vpop.f32.mrb[54].mxu1  ;;  %v1823_v15 = vadd.f32 %v1822_v58, %v4941_v9  ;;  %v1896_v16 = vadd.f32 %v1895_v55, %v4945_v10 }
 0x876   :  { %v1825_v52 = vadd.f32 %v1824_v59, %v4933_v62  ;;  %v1898_v54 = vadd.f32 %v1897_v32, %v4937_v5  ;;  %v1826_v49 = vpop.f32.mrb[55].mxu0  ;;  %v1899_v14 = vpop.f32.mrb[55].mxu1 }
 0x877   :  { %v3918_v47 = vpop.eup %3917  ;;  %v1827_v27 = vadd.f32 %v1826_v49, %v4941_v9  ;;  %v1900_v51 = vadd.f32 %v1899_v14, %v4945_v10 }
 0x878   :  { %v1552_v28 = vmul.f32 %v3918_v47, %v3916_v4  ;;  %v1926_v46 = vpack.c.bf16 %v1825_v52, %v1821_v57  ;;  %v1928_v48 = vpack.c.bf16 %v1898_v54, %v1894_v7 }
 0x879   :  { %v1927_v30 = vpack.c.bf16 %v1827_v27, %v1823_v15  ;;  %v1929_v40 = vpack.c.bf16 %v1900_v51, %v1896_v16 }
 0x87a   :  { %v1553_v41 = vpack.c.bf16 %v1552_v28, %v1552_v28  ;;  %1942 = vst [vmem:[#allocation3 + $0x20] sm:$0xff] %v1926_v46  ;;  %1944 = vst [vmem:[#allocation3 + $0x30] sm:$0xff] %v1928_v48 }
 0x87b   :  { %1943 = vst [vmem:[#allocation3 + $0x28] sm:$0xff] %v1927_v30  ;;  %1945 = vst [vmem:[#allocation3 + $0x38] sm:$0xff] %v1929_v40  ;;  %v1830_v31 = vpop.f32.mrb[56].mxu0  ;;  %v1903_v38 = vpop.f32.mrb[56].mxu1 }
 0x87c   :  { %v1555_v11 = vrot.slane %v1553_v41, 4  ;;  %v1832_v60 = vpop.f32.mrb[57].mxu0  ;;  %v1905_v56 = vpop.f32.mrb[57].mxu1  ;;  %v1831_v59 = vadd.f32 %v1830_v31, %v4933_v62  ;;  %v1904_v32 = vadd.f32 %v1903_v38, %v4937_v5 }
 0x87d   :  { %v1834_v58 = vpop.f32.mrb[58].mxu0  ;;  %v1907_v55 = vpop.f32.mrb[58].mxu1  ;;  %v1833_v54 = vadd.f32 %v1832_v60, %v4941_v9  ;;  %v1906_v49 = vadd.f32 %v1905_v56, %v4945_v10 }
 0x87e   :  { %1557 = vst [vmem:[#allocation2 + $0x18] sm:$0xf0] %v1555_v11  ;;  %v1835_v4 = vadd.f32 %v1834_v58, %v4933_v62  ;;  %v1908_v57 = vadd.f32 %v1907_v55, %v4937_v5  ;;  %v1836_v7 = vpop.f32.mrb[59].mxu0  ;;  %v1909_v52 = vpop.f32.mrb[59].mxu1 }
 0x87f   :  { %v1837_v14 = vadd.f32 %v1836_v7, %v4941_v9  ;;  %v1910_v47 = vadd.f32 %v1909_v52, %v4945_v10  ;;  %v1986_v7 = vld [vmem:[#allocation3] ss:$16 sps:$4 sm:$0xff]  }
 0x880   :  { %v1930_v15 = vpack.c.bf16 %v1835_v4, %v1831_v59  ;;  %v1932_v16 = vpack.c.bf16 %v1908_v57, %v1904_v32 }
 0x881   :  { %v1931_v27 = vpack.c.bf16 %v1837_v14, %v1833_v54  ;;  %v1933_v51 = vpack.c.bf16 %v1910_v47, %v1906_v49  ;;  %v1987_v49 = vld [vmem:[#allocation3 + $0x8] ss:$16 sps:$4 sm:$0xff]  }
 0x882   :  { %1946 = vst [vmem:[#allocation3 + $0x40] sm:$0xff] %v1930_v15  ;;  %1948 = vst [vmem:[#allocation3 + $0x50] sm:$0xff] %v1932_v16  ;;  %v1991_v16 = vunpack.c.l.bf16 %v1987_v49 }
 0x883   :  { %1947 = vst [vmem:[#allocation3 + $0x48] sm:$0xff] %v1931_v27  ;;  %1949 = vst [vmem:[#allocation3 + $0x58] sm:$0xff] %v1933_v51 }
 0x885   :  { %v1561_v28 = vld [vmem:[#allocation2 + $0x18] sm:$0xff] }
 0x886   :  { %1839 = vmatmul.mubr.bf16.gmra.mrb[60].mxu0 %v1561_v28  ;;  %1912 = vmatmul.mubr.bf16.gmra.mrb[60].mxu1 %v1561_v28 }
 0x887   :  { %2186 = vmatprep.mubr.bf16.mxu0 %v4186_v0  ;;  %2227 = vmatprep.mubr.bf16.mxu1 %v4186_v0 }
 0x88e   :  { %2187 = vmatmul.mubr.bf16.vlgmr.msra.gmra.mrb[64].mxu0 %v4186_v0  ;;  %2228 = vmatmul.mubr.bf16.vlgmr.msra.gmra.mrb[64].mxu1 %v4186_v0 }
 0x88f   :  { %2286 = vmatpush1.bf16.msra.mxu0 %v4833_v19  ;;  %2327 = vmatpush1.bf16.msra.mxu1 %v4835_v21 }
 0x890   :  { %2287 = vmatprep.subr.bf16.mxu0 %v4841_v22  ;;  %2328 = vmatprep.subr.bf16.mxu1 %v4843_v23 }
 0x891   :  { %2317 = vmatprep.mubr.bf16.mxu0 %v4186_v0  ;;  %2358 = vmatprep.mubr.bf16.mxu1 %v4186_v0 }
 0x893   :  { %2288 = vmatpush1.bf16.msra.mxu0 %v4845_v24  ;;  %2329 = vmatpush1.bf16.msra.mxu1 %v4847_v25 }
 0x894   :  { %2289 = vmatprep.subr.bf16.mxu0 %v4853_v1  ;;  %2330 = vmatprep.subr.bf16.mxu1 %v4855_v42 }
 0x897   :  { %2290 = vmatpush1.bf16.msra.mxu0 %v4857_v33  ;;  %2331 = vmatpush1.bf16.msra.mxu1 %v4859_v43 }
 0x898   :  { %2291 = vmatprep.subr.bf16.mxu0 %v4865_v34  ;;  %2332 = vmatprep.subr.bf16.mxu1 %v4867_v44 }
 0x89b   :  { %2292 = vmatpush1.bf16.msra.mxu0 %v4869_v35  ;;  %2333 = vmatpush1.bf16.msra.mxu1 %v4871_v6 }
 0x89c   :  { %2293 = vmatprep.subr.bf16.mxu0 %v4877_v61  ;;  %2334 = vmatprep.subr.bf16.mxu1 %v4879_v12 }
 0x89f   :  { %2294 = vmatpush1.bf16.msra.mxu0 %v4881_v2  ;;  %2335 = vmatpush1.bf16.msra.mxu1 %v4883_v13 }
 0x8a0   :  { %2295 = vmatprep.subr.bf16.mxu0 %v4889_v63  ;;  %2336 = vmatprep.subr.bf16.mxu1 %v4891_v20 }
 0x8a3   :  { %2296 = vmatpush1.bf16.msra.mxu0 %v4893_v8  ;;  %2337 = vmatpush1.bf16.msra.mxu1 %v4895_v29 }
 0x8a4   :  { %2297 = vmatprep.subr.bf16.mxu0 %v4901_v53  ;;  %2338 = vmatprep.subr.bf16.mxu1 %v4903_v3 }
 0x8a7   :  { %2298 = vmatpush1.bf16.msra.mxu0 %v4905_v39  ;;  %2339 = vmatpush1.bf16.msra.mxu1 %v4907_v36 }
 0x8a8   :  { %2299 = vmatprep.subr.bf16.mxu0 %v4909_v50  ;;  %2340 = vmatprep.subr.bf16.mxu1 %v4913_v45 }
 0x8ab   :  { %2300 = vmatpush1.bf16.msra.mxu0 %v4917_v26  ;;  %2341 = vmatpush1.bf16.msra.mxu1 %v4919_v37 }
 0x8ac   :  { %2404 = vmatprep.subr.bf16.mxu0 %v4829_v17  ;;  %2445 = vmatprep.subr.bf16.mxu1 %v4831_v18 }
 0x959   :  { %v1840_v46 = vpop.f32.mrb[60].mxu0  ;;  %v1913_v48 = vpop.f32.mrb[60].mxu1 }
 0x95a   :  { %v1842_v30 = vpop.f32.mrb[61].mxu0  ;;  %v1915_v40 = vpop.f32.mrb[61].mxu1  ;;  %v1841_v38 = vadd.f32 %v1840_v46, %v4933_v62  ;;  %v1914_v11 = vadd.f32 %v1913_v48, %v4937_v5 }
 0x95b   :  { %v1844_v41 = vpop.f32.mrb[62].mxu0  ;;  %v1917_v31 = vpop.f32.mrb[62].mxu1  ;;  %v1843_v59 = vadd.f32 %v1842_v30, %v4941_v9  ;;  %v1916_v32 = vadd.f32 %v1915_v40, %v4945_v10 }
 0x95c   :  { %v1845_v60 = vadd.f32 %v1844_v41, %v4933_v62  ;;  %v1918_v56 = vadd.f32 %v1917_v31, %v4937_v5  ;;  %v1846_v58 = vpop.f32.mrb[63].mxu0  ;;  %v1919_v55 = vpop.f32.mrb[63].mxu1  ;;  %v1990_v62 = vunpack.c.l.bf16 %v1986_v7  ;;  %v1993_v31 = vunpack.c.h.bf16 %v1987_v49 }
 0x95d   :  { %v1847_v4 = vadd.f32 %v1846_v58, %v4941_v9  ;;  %v1920_v57 = vadd.f32 %v1919_v55, %v4945_v10 }
 0x95e   :  { %v1934_v52 = vpack.c.bf16 %v1845_v60, %v1841_v38  ;;  %v1936_v54 = vpack.c.bf16 %v1918_v56, %v1914_v11  ;;  %v1992_v11 = vunpack.c.h.bf16 %v1986_v7 }
 0x95f   :  { %v1935_v14 = vpack.c.bf16 %v1847_v4, %v1843_v59  ;;  %v1937_v47 = vpack.c.bf16 %v1920_v57, %v1916_v32 }
 0x960   :  { %1950 = vst [vmem:[#allocation3 + $0x60] sm:$0xff] %v1934_v52  ;;  %1952 = vst [vmem:[#allocation3 + $0x70] sm:$0xff] %v1936_v54 }
 0x961   :  { %1951 = vst [vmem:[#allocation3 + $0x68] sm:$0xff] %v1935_v14  ;;  %1953 = vst [vmem:[#allocation3 + $0x78] sm:$0xff] %v1937_v47  ;;  %v2188_v5 = vpop.f32.mrb[64].mxu0  ;;  %v2229_v15 = vpop.f32.mrb[64].mxu1 }
 0x962   :  { %v2236_v27 = vadd.f32 %v2188_v5, %v1990_v62  ;;  %v2190_v51 = vpop.f32.mrb[65].mxu0  ;;  %v2231_v28 = vpop.f32.mrb[65].mxu1  ;;  %v2238_v56 = vadd.f32 %v2229_v15, %v1992_v11 }
 0x963   :  { %v2237_v9 = vadd.f32 %v2190_v51, %v1991_v16  ;;  %v2192_v46 = vpop.f32.mrb[66].mxu0  ;;  %v2233_v10 = vpop.f32.mrb[66].mxu1  ;;  %v2239_v38 = vadd.f32 %v2231_v28, %v1993_v31  ;;  %v2265_v51 = vld [vmem:[#allocation3 + $0x8] sm:$0xf0] }
 0x964   :  { %v3515_v48 = vmul.f32 -1.442695, %v2236_v27  ;;  %v2193_v30 = vpop.f32.mrb[67].mxu0  ;;  %v2234_v40 = vpop.f32.mrb[67].mxu1  ;;  %v2264_v27 = vld [vmem:[#allocation3] sm:$0xf0] }
 0x965   :  { %v3516_v41 = vmul.f32 -1.442695, %v2237_v9  ;;  %v3517_v60 = vmul.f32 -1.442695, %v2239_v38  ;;  %v2272_v28 = vrot.slane %v2264_v27, 4  ;;  %v2273_v9 = vrot.slane %v2265_v51, 4 }
 0x966   :  { %3919 = vpow2.f32 %v3515_v48  ;;  %v2267_v10 = vld [vmem:[#allocation3 + $0x18] sm:$0xf0] }
 0x967   :  { %3921 = vpow2.f32 %v3516_v41  ;;  %v2280_v46 = vunpack.c.l.bf16 %v2272_v28  ;;  %v2281_v40 = vunpack.c.l.bf16 %v2273_v9 }
 0x968   :  { %3923 = vpow2.f32 %v3517_v60  ;;  %v2275_v60 = vrot.slane %v2267_v10, 4 }
 0x969   :  { %3925 = vtanh.f32 %v2238_v56 }
 0x970   :  { %v3920_v58 = vpop.eup %3919 }
 0x971   :  { %v3922_v55 = vpop.eup %3921  ;;  %v2243_v59 = vadd.f32 1.0, %v3920_v58 }
 0x972   :  { %v2249_v32 = vadd.f32 1.0, %v3922_v55  ;;  %v3924_v4 = vpop.eup %3923 }
 0x973   :  { %3927 = vrcp.f32 %v2243_v59  ;;  %v3926_v57 = vpop.eup %3925  ;;  %v2256_v47 = vadd.f32 1.0, %v3924_v4  ;;  %v2266_v4 = vld [vmem:[#allocation3 + $0x10] sm:$0xf0] }
 0x974   :  { %3929 = vrcp.f32 %v2249_v32 }
 0x975   :  { %3931 = vrcp.f32 %v2256_v47 }
 0x97d   :  { %v3928_v52 = vpop.eup %3927 }
 0x97e   :  { %v3930_v54 = vpop.eup %3929  ;;  %v2260_v14 = vmul.f32 %v3928_v52, %v3926_v57  ;;  %v2283_v52 = vunpack.c.l.bf16 %v2275_v60  ;;  %v2396_v60 = vld [vmem:[#allocation3 + $0x28] ss:$16 sps:$4 sm:$0xff]  }
 0x97f   :  { %v2259_v62 = vmul.f32 0.0, %v3930_v54  ;;  %v3932_v7 = vpop.eup %3931  ;;  %v2274_v54 = vrot.slane %v2266_v4, 4 }
 0x981   :  { %v5017_v49 = vadd.f32 %v2260_v14, %v2259_v62  ;;  %v2282_v47 = vunpack.c.l.bf16 %v2274_v54 }
 0x983   :  { %3933 = vtanh.f32 %v5017_v49 }
 0x98d   :  { %v3934_v5 = vpop.eup %3933 }
 0x98e   :  { %v2263_v15 = vmul.f32 %v3934_v5, %v3932_v7 }
 0x990   :  { %v2284_v16 = vpack.c.bf16 %v2263_v15, %v2263_v15 }
 0x992   :  { %2318 = vmatmul.mubr.bf16.vlgmr.msra.gmra.mrb[68].mxu0 %v2284_v16  ;;  %2359 = vmatmul.mubr.bf16.vlgmr.msra.gmra.mrb[68].mxu1 %v2284_v16 }
 0x993   :  { %2405 = vmatpush1.bf16.msra.mxu0 %v4833_v19  ;;  %2446 = vmatpush1.bf16.msra.mxu1 %v4835_v21 }
 0x994   :  { %2406 = vmatprep.subr.bf16.mxu0 %v4841_v22  ;;  %2447 = vmatprep.subr.bf16.mxu1 %v4843_v23 }
 0x995   :  { %2436 = vmatprep.mubr.bf16.mxu0 %v4186_v0  ;;  %2477 = vmatprep.mubr.bf16.mxu1 %v4186_v0 }
 0x997   :  { %2407 = vmatpush1.bf16.msra.mxu0 %v4845_v24  ;;  %2448 = vmatpush1.bf16.msra.mxu1 %v4847_v25 }
 0x998   :  { %2408 = vmatprep.subr.bf16.mxu0 %v4853_v1  ;;  %2449 = vmatprep.subr.bf16.mxu1 %v4855_v42 }
 0x99b   :  { %2409 = vmatpush1.bf16.msra.mxu0 %v4857_v33  ;;  %2450 = vmatpush1.bf16.msra.mxu1 %v4859_v43 }
 0x99c   :  { %2410 = vmatprep.subr.bf16.mxu0 %v4865_v34  ;;  %2451 = vmatprep.subr.bf16.mxu1 %v4867_v44 }
 0x99f   :  { %2411 = vmatpush1.bf16.msra.mxu0 %v4869_v35  ;;  %2452 = vmatpush1.bf16.msra.mxu1 %v4871_v6 }
 0x9a0   :  { %2412 = vmatprep.subr.bf16.mxu0 %v4877_v61  ;;  %2453 = vmatprep.subr.bf16.mxu1 %v4879_v12 }
 0x9a3   :  { %2413 = vmatpush1.bf16.msra.mxu0 %v4881_v2  ;;  %2454 = vmatpush1.bf16.msra.mxu1 %v4883_v13 }
 0x9a4   :  { %2414 = vmatprep.subr.bf16.mxu0 %v4889_v63  ;;  %2455 = vmatprep.subr.bf16.mxu1 %v4891_v20 }
 0x9a7   :  { %2415 = vmatpush1.bf16.msra.mxu0 %v4893_v8  ;;  %2456 = vmatpush1.bf16.msra.mxu1 %v4895_v29 }
 0x9a8   :  { %2416 = vmatprep.subr.bf16.mxu0 %v4901_v53  ;;  %2457 = vmatprep.subr.bf16.mxu1 %v4903_v3 }
 0x9ab   :  { %2417 = vmatpush1.bf16.msra.mxu0 %v4905_v39  ;;  %2458 = vmatpush1.bf16.msra.mxu1 %v4907_v36 }
 0x9ac   :  { %2418 = vmatprep.subr.bf16.mxu0 %v4909_v50  ;;  %2459 = vmatprep.subr.bf16.mxu1 %v4913_v45 }
 0x9af   :  { %2419 = vmatpush1.bf16.msra.mxu0 %v4917_v26  ;;  %2460 = vmatpush1.bf16.msra.mxu1 %v4919_v37 }
 0x9b0   :  { %2535 = vmatprep.subr.bf16.mxu0 %v4829_v17  ;;  %2576 = vmatprep.subr.bf16.mxu1 %v4831_v18 }
 0xa65   :  { %v2319_v48 = vpop.f32.mrb[68].mxu0  ;;  %v2360_v30 = vpop.f32.mrb[68].mxu1 }
 0xa66   :  { %v2367_v41 = vadd.f32 %v2319_v48, %v2280_v46  ;;  %v2321_v31 = vpop.f32.mrb[69].mxu0  ;;  %v2362_v38 = vpop.f32.mrb[69].mxu1  ;;  %v2369_v7 = vadd.f32 %v2360_v30, %v2282_v47 }
 0xa67   :  { %v2368_v11 = vadd.f32 %v2321_v31, %v2281_v40  ;;  %v2323_v56 = vpop.f32.mrb[70].mxu0  ;;  %v2364_v58 = vpop.f32.mrb[70].mxu1  ;;  %v2370_v14 = vadd.f32 %v2362_v38, %v2283_v52 }
 0xa68   :  { %v3518_v55 = vmul.f32 -1.442695, %v2367_v41  ;;  %v2324_v59 = vpop.f32.mrb[71].mxu0  ;;  %v2365_v32 = vpop.f32.mrb[71].mxu1 }
 0xa69   :  { %v3519_v57 = vmul.f32 -1.442695, %v2368_v11  ;;  %v3520_v62 = vmul.f32 -1.442695, %v2370_v14  ;;  %v2400_v59 = vunpack.c.l.bf16 %v2396_v60 }
 0xa6a   :  { %3935 = vpow2.f32 %v3518_v55 }
 0xa6b   :  { %3937 = vpow2.f32 %v3519_v57 }
 0xa6c   :  { %3939 = vpow2.f32 %v3520_v62 }
 0xa6d   :  { %3941 = vtanh.f32 %v2369_v7 }
 0xa74   :  { %v3936_v5 = vpop.eup %3935 }
 0xa75   :  { %v3938_v15 = vpop.eup %3937  ;;  %v2374_v16 = vadd.f32 1.0, %v3936_v5 }
 0xa76   :  { %v2380_v27 = vadd.f32 1.0, %v3938_v15  ;;  %v3940_v51 = vpop.eup %3939  ;;  %v2402_v15 = vunpack.c.h.bf16 %v2396_v60 }
 0xa77   :  { %3943 = vrcp.f32 %v2374_v16  ;;  %v3942_v28 = vpop.eup %3941  ;;  %v2387_v48 = vadd.f32 1.0, %v3940_v51 }
 0xa78   :  { %3945 = vrcp.f32 %v2380_v27 }
 0xa79   :  { %3947 = vrcp.f32 %v2387_v48 }
 0xa81   :  { %v3944_v9 = vpop.eup %3943 }
 0xa82   :  { %v3946_v46 = vpop.eup %3945  ;;  %v2391_v10 = vmul.f32 %v3944_v9, %v3942_v28 }
 0xa83   :  { %v2390_v40 = vmul.f32 %v3946_v46, %v5017_v49  ;;  %v3948_v30 = vpop.eup %3947  ;;  %v2395_v49 = vld [vmem:[#allocation3 + $0x20] ss:$16 sps:$4 sm:$0xff]  }
 0xa84   :  { %v2399_v56 = vunpack.c.l.bf16 %v2395_v49  ;;  %v2401_v27 = vunpack.c.h.bf16 %v2395_v49 }
 0xa85   :  { %v5055_v41 = vadd.f32 %v2391_v10, %v2390_v40 }
 0xa87   :  { %3949 = vtanh.f32 %v5055_v41 }
 0xa91   :  { %v3950_v31 = vpop.eup %3949 }
 0xa92   :  { %v2394_v38 = vmul.f32 %v3950_v31, %v3948_v30 }
 0xa94   :  { %v2403_v11 = vpack.c.bf16 %v2394_v38, %v2394_v38 }
 0xa96   :  { %2437 = vmatmul.mubr.bf16.vlgmr.msra.gmra.mrb[72].mxu0 %v2403_v11  ;;  %2478 = vmatmul.mubr.bf16.vlgmr.msra.gmra.mrb[72].mxu1 %v2403_v11 }
 0xa97   :  { %2536 = vmatpush1.bf16.msra.mxu0 %v4833_v19  ;;  %2577 = vmatpush1.bf16.msra.mxu1 %v4835_v21 }
 0xa98   :  { %2537 = vmatprep.subr.bf16.mxu0 %v4841_v22  ;;  %2578 = vmatprep.subr.bf16.mxu1 %v4843_v23 }
 0xa99   :  { %2567 = vmatprep.mubr.bf16.mxu0 %v4186_v0  ;;  %2608 = vmatprep.mubr.bf16.mxu1 %v4186_v0 }
 0xa9b   :  { %2538 = vmatpush1.bf16.msra.mxu0 %v4845_v24  ;;  %2579 = vmatpush1.bf16.msra.mxu1 %v4847_v25 }
 0xa9c   :  { %2539 = vmatprep.subr.bf16.mxu0 %v4853_v1  ;;  %2580 = vmatprep.subr.bf16.mxu1 %v4855_v42 }
 0xa9f   :  { %2540 = vmatpush1.bf16.msra.mxu0 %v4857_v33  ;;  %2581 = vmatpush1.bf16.msra.mxu1 %v4859_v43 }
 0xaa0   :  { %2541 = vmatprep.subr.bf16.mxu0 %v4865_v34  ;;  %2582 = vmatprep.subr.bf16.mxu1 %v4867_v44 }
 0xaa3   :  { %2542 = vmatpush1.bf16.msra.mxu0 %v4869_v35  ;;  %2583 = vmatpush1.bf16.msra.mxu1 %v4871_v6 }
 0xaa4   :  { %2543 = vmatprep.subr.bf16.mxu0 %v4877_v61  ;;  %2584 = vmatprep.subr.bf16.mxu1 %v4879_v12 }
 0xaa7   :  { %2544 = vmatpush1.bf16.msra.mxu0 %v4881_v2  ;;  %2585 = vmatpush1.bf16.msra.mxu1 %v4883_v13 }
 0xaa8   :  { %2545 = vmatprep.subr.bf16.mxu0 %v4889_v63  ;;  %2586 = vmatprep.subr.bf16.mxu1 %v4891_v20 }
 0xaab   :  { %2546 = vmatpush1.bf16.msra.mxu0 %v4893_v8  ;;  %2587 = vmatpush1.bf16.msra.mxu1 %v4895_v29 }
 0xaac   :  { %2547 = vmatprep.subr.bf16.mxu0 %v4901_v53  ;;  %2588 = vmatprep.subr.bf16.mxu1 %v4903_v3 }
 0xaaf   :  { %2548 = vmatpush1.bf16.msra.mxu0 %v4905_v39  ;;  %2589 = vmatpush1.bf16.msra.mxu1 %v4907_v36 }
 0xab0   :  { %2549 = vmatprep.subr.bf16.mxu0 %v4909_v50  ;;  %2590 = vmatprep.subr.bf16.mxu1 %v4913_v45 }
 0xab3   :  { %2550 = vmatpush1.bf16.msra.mxu0 %v4917_v26  ;;  %2591 = vmatpush1.bf16.msra.mxu1 %v4919_v37 }
 0xab4   :  { %2654 = vmatprep.subr.bf16.mxu0 %v4829_v17  ;;  %2695 = vmatprep.subr.bf16.mxu1 %v4831_v18 }
 0xb69   :  { %v2438_v58 = vpop.f32.mrb[72].mxu0  ;;  %v2479_v55 = vpop.f32.mrb[72].mxu1 }
 0xb6a   :  { %v2486_v32 = vadd.f32 %v2438_v58, %v2399_v56  ;;  %v2440_v4 = vpop.f32.mrb[73].mxu0  ;;  %v2481_v57 = vpop.f32.mrb[73].mxu1  ;;  %v2488_v28 = vadd.f32 %v2479_v55, %v2401_v27  ;;  %v5137_v27 = vld [vmem:[#allocation8 + $0x8] ss:$16 sps:$4 sm:$0xff]  }
 0xb6b   :  { %v2487_v52 = vadd.f32 %v2440_v4, %v2400_v59  ;;  %v2442_v54 = vpop.f32.mrb[74].mxu0  ;;  %v2483_v14 = vpop.f32.mrb[74].mxu1  ;;  %v2489_v16 = vadd.f32 %v2481_v57, %v2402_v15 }
 0xb6c   :  { %v3521_v47 = vmul.f32 -1.442695, %v2486_v32  ;;  %v2443_v62 = vpop.f32.mrb[75].mxu0  ;;  %v2484_v7 = vpop.f32.mrb[75].mxu1 }
 0xb6d   :  { %v3522_v5 = vmul.f32 -1.442695, %v2487_v52  ;;  %v3523_v51 = vmul.f32 -1.442695, %v2489_v16  ;;  %v5134_v16 = vld [vmem:[#allocation8] ss:$16 sps:$4 sm:$0xff]  }
 0xb6e   :  { %3951 = vpow2.f32 %v3521_v47 }
 0xb6f   :  { %3953 = vpow2.f32 %v3522_v5 }
 0xb70   :  { %3955 = vpow2.f32 %v3523_v51  ;;  %v5140_v51 = vld [vmem:[#allocation8 + $0x24] ss:$16 sps:$4 sm:$0xff]  }
 0xb71   :  { %3957 = vtanh.f32 %v2488_v28  ;;  %v5143_v28 = vld [vmem:[#allocation8 + $0x2c] ss:$16 sps:$4 sm:$0xff]  }
 0xb78   :  { %v3952_v9 = vpop.eup %3951 }
 0xb79   :  { %v3954_v46 = vpop.eup %3953  ;;  %v2493_v10 = vadd.f32 1.0, %v3952_v9  ;;  %v5148_v9 = vld [vmem:[#allocation8 + $0x20] ss:$16 sps:$4 sm:$0xff]  }
 0xb7a   :  { %v2499_v48 = vadd.f32 1.0, %v3954_v46  ;;  %v3956_v40 = vpop.eup %3955  ;;  %v5151_v46 = vld [vmem:[#allocation8 + $0x28] ss:$16 sps:$4 sm:$0xff]  }
 0xb7b   :  { %3959 = vrcp.f32 %v2493_v10  ;;  %v3958_v30 = vpop.eup %3957  ;;  %v2506_v56 = vadd.f32 1.0, %v3956_v40  ;;  %v5154_v10 = vld [vmem:[#allocation8 + $0x44] ss:$16 sps:$4 sm:$0xff]   ;;  %v5160_v40 = vld [vmem:[#allocation8 + $0x40] ss:$16 sps:$4 sm:$0xff]  }
 0xb7c   :  { %3961 = vrcp.f32 %v2499_v48  ;;  %v5157_v48 = vld [vmem:[#allocation8 + $0x4c] ss:$16 sps:$4 sm:$0xff]  }
 0xb7d   :  { %3963 = vrcp.f32 %v2506_v56  ;;  %v5175_v56 = vld [vmem:[#allocation8 + $0x68] ss:$16 sps:$4 sm:$0xff]  }
 0xb85   :  { %v3960_v31 = vpop.eup %3959 }
 0xb86   :  { %v3962_v38 = vpop.eup %3961  ;;  %v2510_v11 = vmul.f32 %v3960_v31, %v3958_v30  ;;  %v5163_v30 = vld [vmem:[#allocation8 + $0x48] ss:$16 sps:$4 sm:$0xff]   ;;  %v5166_v31 = vld [vmem:[#allocation8 + $0x64] ss:$16 sps:$4 sm:$0xff]  }
 0xb87   :  { %v2509_v60 = vmul.f32 %v3962_v38, %v5055_v41  ;;  %v3964_v49 = vpop.eup %3963  ;;  %v5169_v38 = vld [vmem:[#allocation8 + $0x6c] ss:$16 sps:$4 sm:$0xff]  }
 0xb89   :  { %v5093_v58 = vadd.f32 %v2510_v11, %v2509_v60  ;;  %v5172_v11 = vld [vmem:[#allocation8 + $0x60] ss:$16 sps:$4 sm:$0xff]   ;;  %v5178_v60 = vld [vmem:[#allocation8 + $0x84] ss:$16 sps:$4 sm:$0xff]  }
 0xb8b   :  { %3965 = vtanh.f32 %v5093_v58 }
 0xb95   :  { %v3966_v55 = vpop.eup %3965 }
 0xb96   :  { %v2513_v59 = vmul.f32 %v3966_v55, %v3964_v49  ;;  %v5184_v49 = vld [vmem:[#allocation8 + $0x80] ss:$16 sps:$4 sm:$0xff]   ;;  %v5187_v55 = vld [vmem:[#allocation8 + $0x88] ss:$16 sps:$4 sm:$0xff]  }
 0xb98   :  { %v2534_v32 = vpack.c.bf16 %v2513_v59, %v2513_v59  ;;  %v5190_v59 = vld [vmem:[#allocation8 + $0xa4] ss:$16 sps:$4 sm:$0xff]  }
 0xb9a   :  { %2568 = vmatmul.mubr.bf16.vlgmr.msra.gmra.mrb[76].mxu0 %v2534_v32  ;;  %2609 = vmatmul.mubr.bf16.vlgmr.msra.gmra.mrb[76].mxu1 %v2534_v32  ;;  %v5193_v32 = vld [vmem:[#allocation8 + $0xac] ss:$16 sps:$4 sm:$0xff]  }
 0xb9b   :  { %2655 = vmatpush1.bf16.msra.mxu0 %v4833_v19  ;;  %2696 = vmatpush1.bf16.msra.mxu1 %v4835_v21  ;;  %v2514_v19 = vld [vmem:[#allocation3 + $0x20] sm:$0xf0]  ;;  %v2515_v21 = vld [vmem:[#allocation3 + $0x28] sm:$0xf0] }
 0xb9c   :  { %2656 = vmatprep.subr.bf16.mxu0 %v4841_v22  ;;  %2697 = vmatprep.subr.bf16.mxu1 %v4843_v23  ;;  %v2522_v22 = vrot.slane %v2514_v19, 4  ;;  %v2523_v23 = vrot.slane %v2515_v21, 4  ;;  %v5196_v19 = vld [vmem:[#allocation8 + $0xa0] ss:$16 sps:$4 sm:$0xff]   ;;  %v5199_v21 = vld [vmem:[#allocation8 + $0xa8] ss:$16 sps:$4 sm:$0xff]  }
 0xb9d   :  { %2686 = vmatprep.mubr.bf16.mxu0 %v4186_v0  ;;  %2727 = vmatprep.mubr.bf16.mxu1 %v4186_v0 }
 0xb9f   :  { %2657 = vmatpush1.bf16.msra.mxu0 %v4845_v24  ;;  %2698 = vmatpush1.bf16.msra.mxu1 %v4847_v25  ;;  %v2530_v24 = vunpack.c.l.bf16 %v2522_v22  ;;  %v2517_v25 = vld [vmem:[#allocation3 + $0x38] sm:$0xf0]  ;;  %v5202_v22 = vld [vmem:[#allocation8 + $0xc4] ss:$16 sps:$4 sm:$0xff]  }
 0xba0   :  { %2658 = vmatprep.subr.bf16.mxu0 %v4853_v1  ;;  %2699 = vmatprep.subr.bf16.mxu1 %v4855_v42 }
 0xba3   :  { %2659 = vmatpush1.bf16.msra.mxu0 %v4857_v33  ;;  %2700 = vmatpush1.bf16.msra.mxu1 %v4859_v43  ;;  %v2531_v33 = vunpack.c.l.bf16 %v2523_v23  ;;  %v5205_v23 = vld [vmem:[#allocation8 + $0xcc] ss:$16 sps:$4 sm:$0xff]  }
 0xba4   :  { %2660 = vmatprep.subr.bf16.mxu0 %v4865_v34  ;;  %2701 = vmatprep.subr.bf16.mxu1 %v4867_v44 }
 0xba7   :  { %2661 = vmatpush1.bf16.msra.mxu0 %v4869_v35  ;;  %2702 = vmatpush1.bf16.msra.mxu1 %v4871_v6  ;;  %v2525_v6 = vrot.slane %v2517_v25, 4  ;;  %v5211_v25 = vld [vmem:[#allocation8 + $0xc8] ss:$16 sps:$4 sm:$0xff]  }
 0xba8   :  { %2662 = vmatprep.subr.bf16.mxu0 %v4877_v61  ;;  %2703 = vmatprep.subr.bf16.mxu1 %v4879_v12 }
 0xbab   :  { %2663 = vmatpush1.bf16.msra.mxu0 %v4881_v2  ;;  %2704 = vmatpush1.bf16.msra.mxu1 %v4883_v13 }
 0xbac   :  { %2664 = vmatprep.subr.bf16.mxu0 %v4889_v63  ;;  %2705 = vmatprep.subr.bf16.mxu1 %v4891_v20  ;;  %v2533_v20 = vunpack.c.l.bf16 %v2525_v6  ;;  %v2646_v6 = vld [vmem:[#allocation3 + $0x48] ss:$16 sps:$4 sm:$0xff]  }
 0xbaf   :  { %2665 = vmatpush1.bf16.msra.mxu0 %v4893_v8  ;;  %2706 = vmatpush1.bf16.msra.mxu1 %v4895_v29 }
 0xbb0   :  { %2666 = vmatprep.subr.bf16.mxu0 %v4901_v53  ;;  %2707 = vmatprep.subr.bf16.mxu1 %v4903_v3 }
 0xbb3   :  { %2667 = vmatpush1.bf16.msra.mxu0 %v4905_v39  ;;  %2708 = vmatpush1.bf16.msra.mxu1 %v4907_v36 }
 0xbb4   :  { %2668 = vmatprep.subr.bf16.mxu0 %v4909_v50  ;;  %2709 = vmatprep.subr.bf16.mxu1 %v4913_v45 }
 0xbb7   :  { %2669 = vmatpush1.bf16.msra.mxu0 %v4917_v26  ;;  %2710 = vmatpush1.bf16.msra.mxu1 %v4919_v37 }
 0xbb8   :  { %2785 = vmatprep.subr.bf16.mxu0 %v4829_v17  ;;  %2826 = vmatprep.subr.bf16.mxu1 %v4831_v18  ;;  %v2516_v18 = vld [vmem:[#allocation3 + $0x30] sm:$0xf0] }
 0xbb9   :  { %v2524_v8 = vrot.slane %v2516_v18, 4 }
 0xbbb   :  { %v2532_v53 = vunpack.c.l.bf16 %v2524_v8 }
 0xc6d   :  { %v2569_v1 = vpop.f32.mrb[76].mxu0  ;;  %v2610_v42 = vpop.f32.mrb[76].mxu1 }
 0xc6e   :  { %v2617_v43 = vadd.f32 %v2569_v1, %v2530_v24  ;;  %v2571_v34 = vpop.f32.mrb[77].mxu0  ;;  %v2612_v44 = vpop.f32.mrb[77].mxu1  ;;  %v2619_v39 = vadd.f32 %v2610_v42, %v2532_v53  ;;  %v5208_v24 = vld [vmem:[#allocation8 + $0xc0] ss:$16 sps:$4 sm:$0xff]   ;;  %v5214_v1 = vld [vmem:[#allocation8 + $0xe4] ss:$16 sps:$4 sm:$0xff]  }
 0xc6f   :  { %v2618_v35 = vadd.f32 %v2571_v34, %v2531_v33  ;;  %v2573_v61 = vpop.f32.mrb[78].mxu0  ;;  %v2614_v12 = vpop.f32.mrb[78].mxu1  ;;  %v2620_v29 = vadd.f32 %v2612_v44, %v2533_v20  ;;  %v5217_v42 = vld [vmem:[#allocation8 + $0xec] ss:$16 sps:$4 sm:$0xff]   ;;  %v5220_v33 = vld [vmem:[#allocation8 + $0xe0] ss:$16 sps:$4 sm:$0xff]  }
 0xc70   :  { %v3524_v2 = vmul.f32 -1.442695, %v2617_v43  ;;  %v2574_v17 = vpop.f32.mrb[79].mxu0  ;;  %v2615_v13 = vpop.f32.mrb[79].mxu1  ;;  %v5223_v43 = vld [vmem:[#allocation8 + $0xe8] ss:$16 sps:$4 sm:$0xff]  }
 0xc71   :  { %v3525_v63 = vmul.f32 -1.442695, %v2618_v35  ;;  %v3526_v3 = vmul.f32 -1.442695, %v2620_v29  ;;  %v5226_v34 = vld [vmem:[#allocation8 + $0x4] ss:$16 sps:$4 sm:$0xff]   ;;  %v2650_v17 = vunpack.c.l.bf16 %v2646_v6 }
 0xc72   :  { %3967 = vpow2.f32 %v3524_v2  ;;  %v5229_v44 = vld [vmem:[#allocation8 + $0xc] ss:$16 sps:$4 sm:$0xff]   ;;  %v2645_v35 = vld [vmem:[#allocation3 + $0x40] ss:$16 sps:$4 sm:$0xff]  }
 0xc73   :  { %3969 = vpow2.f32 %v3525_v63  ;;  %v2649_v61 = vunpack.c.l.bf16 %v2645_v35 }
 0xc74   :  { %3971 = vpow2.f32 %v3526_v3 }
 0xc75   :  { %3973 = vtanh.f32 %v2619_v39 }
 0xc7c   :  { %v3968_v36 = vpop.eup %3967 }
 0xc7d   :  { %v3970_v50 = vpop.eup %3969  ;;  %v2624_v45 = vadd.f32 1.0, %v3968_v36 }
 0xc7e   :  { %v2630_v26 = vadd.f32 1.0, %v3970_v50  ;;  %v3972_v37 = vpop.eup %3971  ;;  %v2652_v50 = vunpack.c.h.bf16 %v2646_v6 }
 0xc7f   :  { %3975 = vrcp.f32 %v2624_v45  ;;  %v3974_v41 = vpop.eup %3973  ;;  %v2637_v54 = vadd.f32 1.0, %v3972_v37 }
 0xc80   :  { %3977 = vrcp.f32 %v2630_v26  ;;  %v2651_v26 = vunpack.c.h.bf16 %v2645_v35 }
 0xc81   :  { %3979 = vrcp.f32 %v2637_v54 }
 0xc89   :  { %v3976_v4 = vpop.eup %3975 }
 0xc8a   :  { %v3978_v57 = vpop.eup %3977  ;;  %v2641_v52 = vmul.f32 %v3976_v4, %v3974_v41 }
 0xc8b   :  { %v2640_v14 = vmul.f32 %v3978_v57, %v5093_v58  ;;  %v3980_v62 = vpop.eup %3979  ;;  %v5181_v58 = vld [vmem:[#allocation8 + $0x8c] ss:$16 sps:$4 sm:$0xff]  }
 0xc8d   :  { %v5131_v47 = vadd.f32 %v2641_v52, %v2640_v14 }
 0xc8f   :  { %3981 = vtanh.f32 %v5131_v47 }
 0xc99   :  { %v3982_v7 = vpop.eup %3981 }
 0xc9a   :  { %v2644_v5 = vmul.f32 %v3982_v7, %v3980_v62 }
 0xc9c   :  { %v2653_v15 = vpack.c.bf16 %v2644_v5, %v2644_v5 }
 0xc9e   :  { %2687 = vmatmul.mubr.bf16.vlgmr.msra.gmra.mrb[80].mxu0 %v2653_v15  ;;  %2728 = vmatmul.mubr.bf16.vlgmr.msra.gmra.mrb[80].mxu1 %v2653_v15 }
 0xc9f   :  { %2786 = vmatpush1.bf16.msra.mxu0 %v5134_v16  ;;  %2827 = vmatpush1.bf16.msra.mxu1 %v5137_v27 }
 0xca0   :  { %2787 = vmatprep.subr.bf16.mxu0 %v5140_v51  ;;  %2828 = vmatprep.subr.bf16.mxu1 %v5143_v28 }
 0xca1   :  { %2817 = vmatprep.mubr.bf16.mxu0 %v4186_v0  ;;  %2858 = vmatprep.mubr.bf16.mxu1 %v4186_v0 }
 0xca3   :  { %2788 = vmatpush1.bf16.msra.mxu0 %v5148_v9  ;;  %2829 = vmatpush1.bf16.msra.mxu1 %v5151_v46 }
 0xca4   :  { %2789 = vmatprep.subr.bf16.mxu0 %v5154_v10  ;;  %2830 = vmatprep.subr.bf16.mxu1 %v5157_v48 }
 0xca7   :  { %2790 = vmatpush1.bf16.msra.mxu0 %v5160_v40  ;;  %2831 = vmatpush1.bf16.msra.mxu1 %v5163_v30 }
 0xca8   :  { %2791 = vmatprep.subr.bf16.mxu0 %v5166_v31  ;;  %2832 = vmatprep.subr.bf16.mxu1 %v5169_v38 }
 0xcab   :  { %2792 = vmatpush1.bf16.msra.mxu0 %v5172_v11  ;;  %2833 = vmatpush1.bf16.msra.mxu1 %v5175_v56 }
 0xcac   :  { %2793 = vmatprep.subr.bf16.mxu0 %v5178_v60  ;;  %2834 = vmatprep.subr.bf16.mxu1 %v5181_v58 }
 0xcaf   :  { %2794 = vmatpush1.bf16.msra.mxu0 %v5184_v49  ;;  %2835 = vmatpush1.bf16.msra.mxu1 %v5187_v55 }
 0xcb0   :  { %2795 = vmatprep.subr.bf16.mxu0 %v5190_v59  ;;  %2836 = vmatprep.subr.bf16.mxu1 %v5193_v32 }
 0xcb3   :  { %2796 = vmatpush1.bf16.msra.mxu0 %v5196_v19  ;;  %2837 = vmatpush1.bf16.msra.mxu1 %v5199_v21 }
 0xcb4   :  { %2797 = vmatprep.subr.bf16.mxu0 %v5202_v22  ;;  %2838 = vmatprep.subr.bf16.mxu1 %v5205_v23 }
 0xcb7   :  { %2798 = vmatpush1.bf16.msra.mxu0 %v5208_v24  ;;  %2839 = vmatpush1.bf16.msra.mxu1 %v5211_v25 }
 0xcb8   :  { %2799 = vmatprep.subr.bf16.mxu0 %v5214_v1  ;;  %2840 = vmatprep.subr.bf16.mxu1 %v5217_v42 }
 0xcbb   :  { %2800 = vmatpush1.bf16.msra.mxu0 %v5220_v33  ;;  %2841 = vmatpush1.bf16.msra.mxu1 %v5223_v43 }
 0xcbc   :  { %2904 = vmatprep.subr.bf16.mxu0 %v5226_v34  ;;  %2945 = vmatprep.subr.bf16.mxu1 %v5229_v44 }
 0xd71   :  { %v2688_v12 = vpop.f32.mrb[80].mxu0  ;;  %v2729_v2 = vpop.f32.mrb[80].mxu1 }
 0xd72   :  { %v2736_v13 = vadd.f32 %v2688_v12, %v2649_v61  ;;  %v2690_v18 = vpop.f32.mrb[81].mxu0  ;;  %v2731_v63 = vpop.f32.mrb[81].mxu1  ;;  %v2738_v41 = vadd.f32 %v2729_v2, %v2651_v26 }
 0xd73   :  { %v2737_v20 = vadd.f32 %v2690_v18, %v2650_v17  ;;  %v2692_v8 = vpop.f32.mrb[82].mxu0  ;;  %v2733_v29 = vpop.f32.mrb[82].mxu1  ;;  %v2739_v45 = vadd.f32 %v2731_v63, %v2652_v50  ;;  %v2765_v18 = vld [vmem:[#allocation3 + $0x48] sm:$0xf0] }
 0xd74   :  { %v3527_v53 = vmul.f32 -1.442695, %v2736_v13  ;;  %v2693_v3 = vpop.f32.mrb[83].mxu0  ;;  %v2734_v39 = vpop.f32.mrb[83].mxu1  ;;  %v2767_v29 = vld [vmem:[#allocation3 + $0x58] sm:$0xf0] }
 0xd75   :  { %v3528_v36 = vmul.f32 -1.442695, %v2737_v20  ;;  %v3529_v37 = vmul.f32 -1.442695, %v2739_v45  ;;  %v2773_v20 = vrot.slane %v2765_v18, 4 }
 0xd76   :  { %3983 = vpow2.f32 %v3527_v53 }
 0xd77   :  { %3985 = vpow2.f32 %v3528_v36  ;;  %v2781_v39 = vunpack.c.l.bf16 %v2773_v20 }
 0xd78   :  { %3987 = vpow2.f32 %v3529_v37  ;;  %v2775_v37 = vrot.slane %v2767_v29, 4 }
 0xd79   :  { %3989 = vtanh.f32 %v2738_v41 }
 0xd80   :  { %v3984_v4 = vpop.eup %3983 }
 0xd81   :  { %v3986_v57 = vpop.eup %3985  ;;  %v2743_v52 = vadd.f32 1.0, %v3984_v4 }
 0xd82   :  { %v2749_v54 = vadd.f32 1.0, %v3986_v57  ;;  %v3988_v14 = vpop.eup %3987 }
 0xd83   :  { %3991 = vrcp.f32 %v2743_v52  ;;  %v3990_v62 = vpop.eup %3989  ;;  %v2756_v61 = vadd.f32 1.0, %v3988_v14  ;;  %v2783_v14 = vunpack.c.l.bf16 %v2775_v37 }
 0xd84   :  { %3993 = vrcp.f32 %v2749_v54 }
 0xd85   :  { %3995 = vrcp.f32 %v2756_v61 }
 0xd8d   :  { %v3992_v7 = vpop.eup %3991 }
 0xd8e   :  { %v3994_v5 = vpop.eup %3993  ;;  %v2760_v15 = vmul.f32 %v3992_v7, %v3990_v62 }
 0xd8f   :  { %v2759_v6 = vmul.f32 %v3994_v5, %v5131_v47  ;;  %v3996_v35 = vpop.eup %3995  ;;  %v2764_v47 = vld [vmem:[#allocation3 + $0x40] sm:$0xf0] }
 0xd90   :  { %v2772_v63 = vrot.slane %v2764_v47, 4 }
 0xd91   :  { %v5233_v12 = vadd.f32 %v2760_v15, %v2759_v6 }
 0xd92   :  { %v2780_v8 = vunpack.c.l.bf16 %v2772_v63 }
 0xd93   :  { %3997 = vtanh.f32 %v5233_v12 }
 0xd9d   :  { %v3998_v2 = vpop.eup %3997 }
 0xd9e   :  { %v2763_v17 = vmul.f32 %v3998_v2, %v3996_v35 }
 0xda0   :  { %v2784_v13 = vpack.c.bf16 %v2763_v17, %v2763_v17 }
 0xda2   :  { %2818 = vmatmul.mubr.bf16.vlgmr.msra.gmra.mrb[84].mxu0 %v2784_v13  ;;  %2859 = vmatmul.mubr.bf16.vlgmr.msra.gmra.mrb[84].mxu1 %v2784_v13 }
 0xda3   :  { %2905 = vmatpush1.bf16.msra.mxu0 %v5134_v16  ;;  %2946 = vmatpush1.bf16.msra.mxu1 %v5137_v27 }
 0xda4   :  { %2906 = vmatprep.subr.bf16.mxu0 %v5140_v51  ;;  %2947 = vmatprep.subr.bf16.mxu1 %v5143_v28 }
 0xda5   :  { %2936 = vmatprep.mubr.bf16.mxu0 %v4186_v0  ;;  %2977 = vmatprep.mubr.bf16.mxu1 %v4186_v0 }
 0xda7   :  { %2907 = vmatpush1.bf16.msra.mxu0 %v5148_v9  ;;  %2948 = vmatpush1.bf16.msra.mxu1 %v5151_v46 }
 0xda8   :  { %2908 = vmatprep.subr.bf16.mxu0 %v5154_v10  ;;  %2949 = vmatprep.subr.bf16.mxu1 %v5157_v48 }
 0xdab   :  { %2909 = vmatpush1.bf16.msra.mxu0 %v5160_v40  ;;  %2950 = vmatpush1.bf16.msra.mxu1 %v5163_v30 }
 0xdac   :  { %2910 = vmatprep.subr.bf16.mxu0 %v5166_v31  ;;  %2951 = vmatprep.subr.bf16.mxu1 %v5169_v38 }
 0xdaf   :  { %2911 = vmatpush1.bf16.msra.mxu0 %v5172_v11  ;;  %2952 = vmatpush1.bf16.msra.mxu1 %v5175_v56 }
 0xdb0   :  { %2912 = vmatprep.subr.bf16.mxu0 %v5178_v60  ;;  %2953 = vmatprep.subr.bf16.mxu1 %v5181_v58 }
 0xdb3   :  { %2913 = vmatpush1.bf16.msra.mxu0 %v5184_v49  ;;  %2954 = vmatpush1.bf16.msra.mxu1 %v5187_v55 }
 0xdb4   :  { %2914 = vmatprep.subr.bf16.mxu0 %v5190_v59  ;;  %2955 = vmatprep.subr.bf16.mxu1 %v5193_v32 }
 0xdb7   :  { %2915 = vmatpush1.bf16.msra.mxu0 %v5196_v19  ;;  %2956 = vmatpush1.bf16.msra.mxu1 %v5199_v21 }
 0xdb8   :  { %2916 = vmatprep.subr.bf16.mxu0 %v5202_v22  ;;  %2957 = vmatprep.subr.bf16.mxu1 %v5205_v23 }
 0xdbb   :  { %2917 = vmatpush1.bf16.msra.mxu0 %v5208_v24  ;;  %2958 = vmatpush1.bf16.msra.mxu1 %v5211_v25 }
 0xdbc   :  { %2918 = vmatprep.subr.bf16.mxu0 %v5214_v1  ;;  %2959 = vmatprep.subr.bf16.mxu1 %v5217_v42 }
 0xdbf   :  { %2919 = vmatpush1.bf16.msra.mxu0 %v5220_v33  ;;  %2960 = vmatpush1.bf16.msra.mxu1 %v5223_v43 }
 0xdc0   :  { %3035 = vmatprep.subr.bf16.mxu0 %v5226_v34  ;;  %3076 = vmatprep.subr.bf16.mxu1 %v5229_v44  ;;  %v2766_v44 = vld [vmem:[#allocation3 + $0x50] sm:$0xf0] }
 0xdc1   :  { %v2774_v62 = vrot.slane %v2766_v44, 4  ;;  %v3777_v44 = vld [vmem:[%s5375_s7 + $0x10] sm:$0xff]  }
 0xdc3   :  { %v2782_v5 = vunpack.c.l.bf16 %v2774_v62  ;;  %v3780_v62 = vld [vmem:[%s5375_s7 + $0x28] sm:$0xff]  }
 0xe75   :  { %v2819_v53 = vpop.f32.mrb[84].mxu0  ;;  %v2860_v3 = vpop.f32.mrb[84].mxu1 }
 0xe76   :  { %v2867_v36 = vadd.f32 %v2819_v53, %v2780_v8  ;;  %v2821_v50 = vpop.f32.mrb[85].mxu0  ;;  %v2862_v45 = vpop.f32.mrb[85].mxu1  ;;  %v2869_v61 = vadd.f32 %v2860_v3, %v2782_v5  ;;  %v3782_v5 = vld [vmem:[%s5375_s7 + $0x38] sm:$0xff]  }
 0xe77   :  { %v2868_v26 = vadd.f32 %v2821_v50, %v2781_v39  ;;  %v2823_v41 = vpop.f32.mrb[86].mxu0  ;;  %v2864_v4 = vpop.f32.mrb[86].mxu1  ;;  %v2870_v7 = vadd.f32 %v2862_v45, %v2783_v14  ;;  %v3779_v14 = vld [vmem:[%s5375_s7 + $0x20] sm:$0xff]  }
 0xe78   :  { %v3530_v57 = vmul.f32 -1.442695, %v2867_v36  ;;  %v2824_v34 = vpop.f32.mrb[87].mxu0  ;;  %v2865_v52 = vpop.f32.mrb[87].mxu1 }
 0xe79   :  { %v3531_v54 = vmul.f32 -1.442695, %v2868_v26  ;;  %v3532_v15 = vmul.f32 -1.442695, %v2870_v7  ;;  %v4187_v34 = vmov 0.0   ;;  %v3776_v52 = vld [vmem:[%s5375_s7 + $0x8] sm:$0xff]  }
 0xe7a   :  { %3999 = vpow2.f32 %v3530_v57  ;;  %v3775_v57 = vld [vmem:[%s5375_s7] sm:$0xff]   ;;  %v3781_v7 = vld [vmem:[%s5375_s7 + $0x30] sm:$0xff]  }
 0xe7b   :  { %4001 = vpow2.f32 %v3531_v54  ;;  %v3778_v54 = vld [vmem:[%s5375_s7 + $0x18] sm:$0xff]  }
 0xe7c   :  { %4003 = vpow2.f32 %v3532_v15  ;;  %v3783_v15 = vld [vmem:[%s5377_s9] sm:$0xff]  }
 0xe7d   :  { %4005 = vtanh.f32 %v2869_v61  ;;  %v3784_v61 = vld [vmem:[%s5377_s9 + $0x8] sm:$0xff]  }
 0xe84   :  { %v4000_v6 = vpop.eup %3999 }
 0xe85   :  { %v4002_v35 = vpop.eup %4001  ;;  %v2874_v2 = vadd.f32 1.0, %v4000_v6  ;;  %v3785_v6 = vld [vmem:[%s5377_s9 + $0x10] sm:$0xff]  }
 0xe86   :  { %v2880_v17 = vadd.f32 1.0, %v4002_v35  ;;  %v4004_v13 = vpop.eup %4003  ;;  %v3786_v35 = vld [vmem:[%s5377_s9 + $0x18] sm:$0xff]  }
 0xe87   :  { %4007 = vrcp.f32 %v2874_v2  ;;  %v4006_v47 = vpop.eup %4005  ;;  %v2887_v8 = vadd.f32 1.0, %v4004_v13  ;;  %v3787_v2 = vld [vmem:[%s5377_s9 + $0x20] sm:$0xff]   ;;  %v3789_v13 = vld [vmem:[%s5377_s9 + $0x30] sm:$0xff]  }
 0xe88   :  { %4009 = vrcp.f32 %v2880_v17  ;;  %v3788_v17 = vld [vmem:[%s5377_s9 + $0x28] sm:$0xff]  }
 0xe89   :  { %4011 = vrcp.f32 %v2887_v8 }
 0xe91   :  { %v4008_v18 = vpop.eup %4007 }
 0xe92   :  { %v4010_v63 = vpop.eup %4009  ;;  %v2891_v20 = vmul.f32 %v4008_v18, %v4006_v47  ;;  %v3014_v47 = vld [vmem:[#allocation3 + $0x60] sm:$0xf0]  ;;  %v3015_v18 = vld [vmem:[#allocation3 + $0x68] sm:$0xf0] }
 0xe93   :  { %v2890_v29 = vmul.f32 %v4010_v63, %v5233_v12  ;;  %v4012_v3 = vpop.eup %4011  ;;  %v3022_v63 = vrot.slane %v3014_v47, 4 }
 0xe95   :  { %v5271_v53 = vadd.f32 %v2891_v20, %v2890_v29  ;;  %v3023_v20 = vrot.slane %v3015_v18, 4  ;;  %v3030_v8 = vunpack.c.l.bf16 %v3022_v63  ;;  %v3017_v29 = vld [vmem:[#allocation3 + $0x78] sm:$0xf0] }
 0xe97   :  { %4013 = vtanh.f32 %v5271_v53 }
 0xea1   :  { %v4014_v39 = vpop.eup %4013 }
 0xea2   :  { %v2894_v36 = vmul.f32 %v4014_v39, %v4012_v3  ;;  %v3031_v39 = vunpack.c.l.bf16 %v3023_v20 }
 0xea4   :  { %v2903_v50 = vpack.c.bf16 %v2894_v36, %v2894_v36 }
 0xea6   :  { %2937 = vmatmul.mubr.bf16.vlgmr.msra.gmra.mrb[88].mxu0 %v2903_v50  ;;  %2978 = vmatmul.mubr.bf16.vlgmr.msra.gmra.mrb[88].mxu1 %v2903_v50 }
 0xea7   :  { %3036 = vmatpush1.bf16.msra.mxu0 %v5134_v16  ;;  %3077 = vmatpush1.bf16.msra.mxu1 %v5137_v27  ;;  %v2896_v16 = vld [vmem:[#allocation3 + $0x68] ss:$16 sps:$4 sm:$0xff]  }
 0xea8   :  { %3037 = vmatprep.subr.bf16.mxu0 %v5140_v51  ;;  %3078 = vmatprep.subr.bf16.mxu1 %v5143_v28 }
 0xea9   :  { %3067 = vmatprep.mubr.bf16.mxu0 %v4186_v0  ;;  %3108 = vmatprep.mubr.bf16.mxu1 %v4186_v0  ;;  %v2895_v0 = vld [vmem:[#allocation3 + $0x60] ss:$16 sps:$4 sm:$0xff]  }
 0xeaa   :  { %v2899_v27 = vunpack.c.l.bf16 %v2895_v0 }
 0xeab   :  { %3038 = vmatpush1.bf16.msra.mxu0 %v5148_v9  ;;  %3079 = vmatpush1.bf16.msra.mxu1 %v5151_v46  ;;  %v2900_v9 = vunpack.c.l.bf16 %v2896_v16 }
 0xeac   :  { %3039 = vmatprep.subr.bf16.mxu0 %v5154_v10  ;;  %3080 = vmatprep.subr.bf16.mxu1 %v5157_v48 }
 0xeaf   :  { %3040 = vmatpush1.bf16.msra.mxu0 %v5160_v40  ;;  %3081 = vmatpush1.bf16.msra.mxu1 %v5163_v30 }
 0xeb0   :  { %3041 = vmatprep.subr.bf16.mxu0 %v5166_v31  ;;  %3082 = vmatprep.subr.bf16.mxu1 %v5169_v38 }
 0xeb3   :  { %3042 = vmatpush1.bf16.msra.mxu0 %v5172_v11  ;;  %3083 = vmatpush1.bf16.msra.mxu1 %v5175_v56 }
 0xeb4   :  { %3043 = vmatprep.subr.bf16.mxu0 %v5178_v60  ;;  %3084 = vmatprep.subr.bf16.mxu1 %v5181_v58  ;;  %v2902_v58 = vunpack.c.h.bf16 %v2896_v16 }
 0xeb7   :  { %3044 = vmatpush1.bf16.msra.mxu0 %v5184_v49  ;;  %3085 = vmatpush1.bf16.msra.mxu1 %v5187_v55  ;;  %v2901_v55 = vunpack.c.h.bf16 %v2895_v0 }
 0xeb8   :  { %3045 = vmatprep.subr.bf16.mxu0 %v5190_v59  ;;  %3086 = vmatprep.subr.bf16.mxu1 %v5193_v32 }
 0xebb   :  { %3046 = vmatpush1.bf16.msra.mxu0 %v5196_v19  ;;  %3087 = vmatpush1.bf16.msra.mxu1 %v5199_v21 }
 0xebc   :  { %3047 = vmatprep.subr.bf16.mxu0 %v5202_v22  ;;  %3088 = vmatprep.subr.bf16.mxu1 %v5205_v23 }
 0xebf   :  { %3048 = vmatpush1.bf16.msra.mxu0 %v5208_v24  ;;  %3089 = vmatpush1.bf16.msra.mxu1 %v5211_v25 }
 0xec0   :  { %3049 = vmatprep.subr.bf16.mxu0 %v5214_v1  ;;  %3090 = vmatprep.subr.bf16.mxu1 %v5217_v42 }
 0xec3   :  { %3050 = vmatpush1.bf16.msra.mxu0 %v5220_v33  ;;  %3091 = vmatpush1.bf16.msra.mxu1 %v5223_v43 }
 0xec4   :  { %3575 = vmatprep.subr.bf16.mxu0 %v4187_v34  ;;  %3595 = vmatprep.subr.bf16.mxu1 %v4187_v34 }
 0xf79   :  { %v2938_v51 = vpop.f32.mrb[88].mxu0  ;;  %v2979_v28 = vpop.f32.mrb[88].mxu1 }
 0xf7a   :  { %v2986_v46 = vadd.f32 %v2938_v51, %v2899_v27  ;;  %v2940_v10 = vpop.f32.mrb[89].mxu0  ;;  %v2981_v48 = vpop.f32.mrb[89].mxu1  ;;  %v2988_v32 = vadd.f32 %v2979_v28, %v2901_v55  ;;  %v3025_v27 = vrot.slane %v3017_v29, 4 }
 0xf7b   :  { %v2987_v40 = vadd.f32 %v2940_v10, %v2900_v9  ;;  %v2942_v30 = vpop.f32.mrb[90].mxu0  ;;  %v2983_v31 = vpop.f32.mrb[90].mxu1  ;;  %v2989_v49 = vadd.f32 %v2981_v48, %v2902_v58  ;;  %v3016_v48 = vld [vmem:[#allocation3 + $0x70] sm:$0xf0] }
 0xf7c   :  { %v3533_v38 = vmul.f32 -1.442695, %v2986_v46  ;;  %v2943_v11 = vpop.f32.mrb[91].mxu0  ;;  %v2984_v56 = vpop.f32.mrb[91].mxu1  ;;  %v3033_v30 = vunpack.c.l.bf16 %v3025_v27  ;;  %v3024_v31 = vrot.slane %v3016_v48, 4 }
 0xf7d   :  { %v3534_v60 = vmul.f32 -1.442695, %v2987_v40  ;;  %v3535_v59 = vmul.f32 -1.442695, %v2989_v49 }
 0xf7e   :  { %4015 = vpow2.f32 %v3533_v38  ;;  %v3032_v11 = vunpack.c.l.bf16 %v3024_v31 }
 0xf7f   :  { %4017 = vpow2.f32 %v3534_v60 }
 0xf80   :  { %4019 = vpow2.f32 %v3535_v59 }
 0xf81   :  { %4021 = vtanh.f32 %v2988_v32 }
 0xf88   :  { %v4016_v19 = vpop.eup %4015 }
 0xf89   :  { %v4018_v21 = vpop.eup %4017  ;;  %v2993_v22 = vadd.f32 1.0, %v4016_v19 }
 0xf8a   :  { %v2999_v23 = vadd.f32 1.0, %v4018_v21  ;;  %v4020_v24 = vpop.eup %4019 }
 0xf8b   :  { %4023 = vrcp.f32 %v2993_v22  ;;  %v4022_v25 = vpop.eup %4021  ;;  %v3006_v43 = vadd.f32 1.0, %v4020_v24 }
 0xf8c   :  { %4025 = vrcp.f32 %v2999_v23 }
 0xf8d   :  { %4027 = vrcp.f32 %v3006_v43 }
 0xf95   :  { %v4024_v1 = vpop.eup %4023 }
 0xf96   :  { %v4026_v42 = vpop.eup %4025  ;;  %v3010_v33 = vmul.f32 %v4024_v1, %v4022_v25 }
 0xf97   :  { %v3009_v12 = vmul.f32 %v4026_v42, %v5271_v53  ;;  %v4028_v26 = vpop.eup %4027 }
 0xf99   :  { %v5307_v45 = vadd.f32 %v3010_v33, %v3009_v12 }
 0xf9b   :  { %4029 = vtanh.f32 %v5307_v45 }
 0xfa5   :  { %v4030_v37 = vpop.eup %4029 }
 0xfa6   :  { %v3013_v41 = vmul.f32 %v4030_v37, %v4028_v26  ;;  %v3790_v26 = vld [vmem:[%s5377_s9 + $0x38] sm:$0xff]   ;;  %v3539_v37 = vld [vmem:[%s5376_s8] ss:$0 sm:$0xff] }
 0xfa8   :  { %v3034_v4 = vpack.c.bf16 %v3013_v41, %v3013_v41 }
 0xfaa   :  { %3068 = vmatmul.mubr.bf16.vlgmr.msra.gmra.mrb[92].mxu0 %v3034_v4  ;;  %3109 = vmatmul.mubr.bf16.vlgmr.msra.gmra.mrb[92].mxu1 %v3034_v4 }
 0xfab   :  { %3576 = vmatpush3.bf16.msra.mxu0 %v3775_v57  ;;  %3591 = vmatprep.mubr.msk.bf16.mxu0 %vm4188_vm2, %v4187_v34 }
 0xfac   :  { %3577 = vmatprep.subr.bf16.mxu0 %v4187_v34  ;;  %3611 = vmatprep.mubr.msk.bf16.mxu1 %vm4188_vm2, %v4187_v34 }
 0xfad   :  { %3596 = vmatpush3.bf16.msra.mxu1 %v3783_v15 }
 0xfae   :  { %3597 = vmatprep.subr.bf16.mxu1 %v4187_v34 }
 0xfaf   :  { %3578 = vmatpush3.bf16.msra.mxu0 %v3776_v52 }
 0xfb0   :  { %3579 = vmatprep.subr.bf16.mxu0 %v4187_v34 }
 0xfb1   :  { %3598 = vmatpush3.bf16.msra.mxu1 %v3784_v61 }
 0xfb2   :  { %3599 = vmatprep.subr.bf16.mxu1 %v4187_v34 }
 0xfb3   :  { %3580 = vmatpush3.bf16.msra.mxu0 %v3777_v44  ;;  %v3548_v44 = vld [vmem:[%s5378_s10] ss:$0 sm:$0xff] }
 0xfb4   :  { %3581 = vmatprep.subr.bf16.mxu0 %v4187_v34 }
 0xfb5   :  { %3600 = vmatpush3.bf16.msra.mxu1 %v3785_v6 }
 0xfb6   :  { %3601 = vmatprep.subr.bf16.mxu1 %v4187_v34 }
 0xfb7   :  { %3582 = vmatpush3.bf16.msra.mxu0 %v3778_v54 }
 0xfb8   :  { %3583 = vmatprep.subr.bf16.mxu0 %v4187_v34 }
 0xfb9   :  { %3602 = vmatpush3.bf16.msra.mxu1 %v3786_v35 }
 0xfba   :  { %3603 = vmatprep.subr.bf16.mxu1 %v4187_v34 }
 0xfbb   :  { %3584 = vmatpush3.bf16.msra.mxu0 %v3779_v14 }
 0xfbc   :  { %3585 = vmatprep.subr.bf16.mxu0 %v4187_v34 }
 0xfbd   :  { %3604 = vmatpush3.bf16.msra.mxu1 %v3787_v2 }
 0xfbe   :  { %3605 = vmatprep.subr.bf16.mxu1 %v4187_v34 }
 0xfbf   :  { %3586 = vmatpush3.bf16.msra.mxu0 %v3780_v62 }
 0xfc0   :  { %3587 = vmatprep.subr.bf16.mxu0 %v4187_v34 }
 0xfc1   :  { %3606 = vmatpush3.bf16.msra.mxu1 %v3788_v17 }
 0xfc2   :  { %3607 = vmatprep.subr.bf16.mxu1 %v4187_v34 }
 0xfc3   :  { %3588 = vmatpush3.bf16.msra.mxu0 %v3781_v7 }
 0xfc4   :  { %3589 = vmatprep.subr.bf16.mxu0 %v4187_v34 }
 0xfc5   :  { %3608 = vmatpush3.bf16.msra.mxu1 %v3789_v13 }
 0xfc6   :  { %3609 = vmatprep.subr.bf16.mxu1 %v4187_v34 }
 0xfc7   :  { %3590 = vmatpush3.bf16.msra.mxu0 %v3782_v5 }
 0xfc9   :  { %3610 = vmatpush3.bf16.msra.mxu1 %v3790_v26 }
0x107d   :  { %v3069_v53 = vpop.f32.mrb[92].mxu0  ;;  %v3110_v3 = vpop.f32.mrb[92].mxu1 }
0x107e   :  { %v3117_v36 = vadd.f32 %v3069_v53, %v3030_v8  ;;  %v3071_v50 = vpop.f32.mrb[93].mxu0  ;;  %v3112_v0 = vpop.f32.mrb[93].mxu1  ;;  %v3119_v60 = vadd.f32 %v3110_v3, %v3032_v11 }
0x107f   :  { %v3118_v16 = vadd.f32 %v3071_v50, %v3031_v39  ;;  %v3073_v51 = vpop.f32.mrb[94].mxu0  ;;  %v3114_v28 = vpop.f32.mrb[94].mxu1  ;;  %v3120_v38 = vadd.f32 %v3112_v0, %v3033_v30 }
0x1080   :  { %v3536_v9 = vmul.f32 -1.442695, %v3117_v36  ;;  %v3074_v46 = vpop.f32.mrb[95].mxu0  ;;  %v3115_v10 = vpop.f32.mrb[95].mxu1 }
0x1081   :  { %v3537_v40 = vmul.f32 -1.442695, %v3118_v16  ;;  %v3538_v56 = vmul.f32 -1.442695, %v3120_v38 }
0x1082   :  { %4031 = vpow2.f32 %v3536_v9 }
0x1083   :  { %4033 = vpow2.f32 %v3537_v40 }
0x1084   :  { %4035 = vpow2.f32 %v3538_v56 }
0x1085   :  { %4037 = vtanh.f32 %v3119_v60 }
0x108c   :  { %v4032_v58 = vpop.eup %4031 }
0x108d   :  { %v4034_v49 = vpop.eup %4033  ;;  %v3124_v55 = vadd.f32 1.0, %v4032_v58 }
0x108e   :  { %v3130_v59 = vadd.f32 1.0, %v4034_v49  ;;  %v4036_v32 = vpop.eup %4035 }
0x108f   :  { %4039 = vrcp.f32 %v3124_v55  ;;  %v4038_v19 = vpop.eup %4037  ;;  %v3137_v24 = vadd.f32 1.0, %v4036_v32 }
0x1090   :  { %4041 = vrcp.f32 %v3130_v59 }
0x1091   :  { %4043 = vrcp.f32 %v3137_v24 }
0x1099   :  { %v4040_v21 = vpop.eup %4039 }
0x109a   :  { %v4042_v22 = vpop.eup %4041  ;;  %v3141_v23 = vmul.f32 %v4040_v21, %v4038_v19 }
0x109b   :  { %v3140_v25 = vmul.f32 %v4042_v22, %v5307_v45  ;;  %v4044_v42 = vpop.eup %4043 }
0x109d   :  { %v3142_v1 = vadd.f32 %v3141_v23, %v3140_v25 }
0x109f   :  { %4045 = vtanh.f32 %v3142_v1 }
0x10a9   :  { %v4046_v33 = vpop.eup %4045 }
0x10aa   :  { %v3144_v43 = vmul.f32 %v4046_v33, %v4044_v42 }
0x10ac   :  { %v3161_v12 = vpack.c.bf16 %v3144_v43, %v3144_v43 }
0x10ae   :  { %3592 = vmatmul.mubr.bf16.vlgmr.msra.gmra.mrb[96].mxu0 %v3161_v12 }
0x1181   :  { %v3251_v41 = vpop.f32.mrb[96].mxu0 }
0x1182   :  { %v3252_v4 = vadd.f32 %v3539_v37, %v3251_v41  ;;  %v3593_v45 = vpop.f32.mrb[97].mxu0 }
0x1183   :  { %v3254_v57 = vpop.f32.mrb[98].mxu0 }
0x1184   :  { %v3273_v34 = vpack.c.bf16 %v3252_v4, %v3252_v4  ;;  %v3594_v52 = vpop.f32.mrb[99].mxu0 }
0x1186   :  { %3612 = vmatmul.mubr.bf16.vlgmr.msra.gmra.mrb[96].mxu1 %v3273_v34 }
0x1259   :  { %v3363_v54 = vpop.f32.mrb[96].mxu1 }
0x125a   :  { %v3364_v14 = vadd.f32 %v3548_v44, %v3363_v54  ;;  %v3613_v62 = vpop.f32.mrb[97].mxu1 }
0x125b   :  { %v3366_v7 = vpop.f32.mrb[98].mxu1 }
0x125c   :  { %3370 = vst.msk [vmem:[%s5379_s11] sm:$0xff] %vm3369_vm3, %v3364_v14  ;;  %v3614_v5 = vpop.f32.mrb[99].mxu1 }
0x125d   :  { %3375 = vsyncpa [#allocation5], 1 }
0x125e   :  { %3376 = vsyncpa [#allocation7], 1 }

</bundles_post_ra>
